<compile_context>
chip_gen: v5e
topology: v5e:2x2
jax: 0.10.0
libtpu: 0.0.40
codegen_flags: <defaults>
</compile_context>

<pallas_src>
import jax
import jax.numpy as jnp
from jax import lax
from jax.experimental import pallas as pl
from jax.experimental.pallas import tpu as pltpu

EPS = 1e-5
LANE = 128                              # lane-dense channel padding
VMEM_LIMIT_BYTES = 32 * 1024 * 1024     # explicit cap, safe on v5e/v6e/v7x


def _round_up(x, m):
    return (x + m - 1) // m * m


def _compiler_params(sem):
    return pltpu.CompilerParams(dimension_semantics=sem,
                                vmem_limit_bytes=VMEM_LIMIT_BYTES)


# ----------------------------- Pallas kernels ------------------------------

def _make_conv_stats_kernel(kh, kw, stride, pad, ho, wo, cin, cp, with_shortcut):
    """Pass 1: per-image 3x3 conv (9 accumulated MXU matmuls over polyphase
    taps) + per-image BN partial stats; optionally fused 1x1 shortcut conv."""

    def patch(x_ref, p, q, dh, dw):
        slab = x_ref[p * stride + q, dh:dh + ho, dw:dw + wo, :]      # (ho,wo,cin)
        # widen to f32 so the (ho,wo,cin)->(ho*wo,cin) collapse is a clean
        # sublane-tile merge, then narrow back to bf16 for the MXU.
        lhs = slab.astype(jnp.float32).reshape(ho * wo, cin)
        return lhs.astype(jnp.bfloat16)

    def kernel(*refs):
        if with_shortcut:
            x_ref, w_ref, ws_ref, y_ref, st_ref, ys_ref, sts_ref = refs
        else:
            x_ref, w_ref, y_ref, st_ref = refs

        # accumulate into the VMEM-resident output block (f32)
        y_ref[...] = jnp.zeros_like(y_ref)
        for ki in range(kh):
            for kj in range(kw):
                lhs = patch(x_ref, ki % stride, kj % stride,
                            ki // stride, kj // stride)
                y_ref[...] += jnp.dot(lhs, w_ref[ki * kw + kj],
                                      preferred_element_type=jnp.float32)
        y = y_ref[...]
        st_ref[0, 0:1, :] = jnp.sum(y, axis=0, keepdims=True)
        st_ref[0, 1:2, :] = jnp.sum(y * y, axis=0, keepdims=True)

        if with_shortcut:
            # 1x1/stride shortcut conv: same input tile, tap at offset `pad`.
            lhs = patch(x_ref, pad % stride, pad % stride,
                        pad // stride, pad // stride)
            sc = jnp.dot(lhs, ws_ref[...], preferred_element_type=jnp.float32)
            ys_ref[...] = sc
            sts_ref[0, 0:1, :] = jnp.sum(sc, axis=0, keepdims=True)
            sts_ref[0, 1:2, :] = jnp.sum(sc * sc, axis=0, keepdims=True)

    return kernel


def _bn_relu_kernel(y_ref, sc_ref, sh_ref, o_ref):
    # Pass 2a: y*scale + shift, ReLU  (elementwise in f32)
    o_ref[...] = jnp.maximum(y_ref[...] * sc_ref[...] + sh_ref[...],
                             0.0).astype(o_ref.dtype)


def _bn_add_relu_kernel(y_ref, sc_ref, sh_ref, r_ref, rsc_ref, rsh_ref, o_ref):
    # Pass 2b: y*scale + shift + res*rscale + rshift, ReLU
    out = y_ref[...] * sc_ref[...] + sh_ref[...]
    out = out + r_ref[...] * rsc_ref[...] + rsh_ref[...]
    o_ref[...] = jnp.maximum(out, 0.0).astype(o_ref.dtype)


# ----------------------------- pallas_call wrappers -------------------------

def _conv_stats(x_poly, w_flat, kh, kw, stride, pad, ho, wo, ws=None):
    nphase, ph, pw, cin = x_poly.shape
    s2 = stride * stride
    n = nphase // s2
    cp = w_flat.shape[-1]
    m = n * ho * wo
    kernel = _make_conv_stats_kernel(kh, kw, stride, pad, ho, wo, cin, cp,
                                     ws is not None)

    in_specs = [pl.BlockSpec((s2, ph, pw, cin), lambda i: (i, 0, 0, 0)),
                pl.BlockSpec((kh * kw, cin, cp), lambda i: (0, 0, 0))]
    args = [x_poly, w_flat]
    out_shape = [jax.ShapeDtypeStruct((m, cp), jnp.float32),
                 jax.ShapeDtypeStruct((n, 2, cp), jnp.float32)]
    out_specs = [pl.BlockSpec((ho * wo, cp), lambda i: (i, 0)),
                 pl.BlockSpec((1, 2, cp), lambda i: (i, 0, 0))]
    if ws is not None:
        in_specs.append(pl.BlockSpec((cin, cp), lambda i: (0, 0)))
        args.append(ws)
        out_shape += [jax.ShapeDtypeStruct((m, cp), jnp.float32),
                      jax.ShapeDtypeStruct((n, 2, cp), jnp.float32)]
        out_specs += [pl.BlockSpec((ho * wo, cp), lambda i: (i, 0)),
                      pl.BlockSpec((1, 2, cp), lambda i: (i, 0, 0))]

    return pl.pallas_call(
        kernel,
        out_shape=tuple(out_shape),
        grid_spec=pltpu.PrefetchScalarGridSpec(
            num_scalar_prefetch=0, grid=(n,),
            in_specs=in_specs, out_specs=out_specs),
        compiler_params=_compiler_params(("parallel",)),
    )(*args)


def _pick_tile_m(m):
    for t in (1024, 512, 256, 128, 64, 32, 16, 8):
        if m % t == 0:
            return t
    return m


def _row_spec(cp):
    return pl.BlockSpec((1, cp), lambda i: (0, 0))


def _bn_relu_apply(y, scale, shift, out_dtype):
    m, cp = y.shape
    tm = _pick_tile_m(m)
    return pl.pallas_call(
        _bn_relu_kernel,
        out_shape=jax.ShapeDtypeStruct((m, cp), out_dtype),
        grid_spec=pltpu.PrefetchScalarGridSpec(
            num_scalar_prefetch=0, grid=(m // tm,),
            in_specs=[pl.BlockSpec((tm, cp), lambda i: (i, 0)),
                      _row_spec(cp), _row_spec(cp)],
            out_specs=pl.BlockSpec((tm, cp), lambda i: (i, 0))),
        compiler_params=_compiler_params(("parallel",)),
    )(y, scale, shift)


def _bn_add_relu_apply(y, scale, shift, res, rscale, rshift):
    m, cp = y.shape
    tm = _pick_tile_m(m)
    return pl.pallas_call(
        _bn_add_relu_kernel,
        out_shape=jax.ShapeDtypeStruct((m, cp), jnp.float32),
        grid_spec=pltpu.PrefetchScalarGridSpec(
            num_scalar_prefetch=0, grid=(m // tm,),
            in_specs=[pl.BlockSpec((tm, cp), lambda i: (i, 0)),
                      _row_spec(cp), _row_spec(cp),
                      pl.BlockSpec((tm, cp), lambda i: (i, 0)),
                      _row_spec(cp), _row_spec(cp)],
            out_specs=pl.BlockSpec((tm, cp), lambda i: (i, 0))),
        compiler_params=_compiler_params(("parallel",)),
    )(y, scale, shift, res, rscale, rshift)


# ------------------------------ JAX-side glue -------------------------------

def _polyphase(x_nhwc, kh, kw, stride, pad):
    """Zero-pad then split NHWC into stride*stride polyphase components so every
    kxk tap becomes an UNSTRIDED slice inside the kernel.  Total element count
    equals the input (no im2col blow-up)."""
    n, h, w, c = x_nhwc.shape
    ho = (h + 2 * pad - kh) // stride + 1
    wo = (w + 2 * pad - kw) // stride + 1
    ph = ho + (kh - 1) // stride
    pw = wo + (kw - 1) // stride
    hp, wp = stride * ph, stride * pw
    xp = jnp.pad(x_nhwc, ((0, 0), (pad, hp - h - pad), (pad, wp - w - pad), (0, 0)))
    xr = xp.reshape(n, ph, stride, pw, stride, c)
    xr = jnp.transpose(xr, (0, 2, 4, 1, 3, 5))                 # (n, s, s, ph, pw, c)
    return xr.reshape(n * stride * stride, ph, pw, c), ho, wo


def _w_to_flat(w_oihw, cin_p, cout_p):
    """PyTorch OIHW conv weight -> (kh*kw, cin_p, cout_p), bf16, zero padded."""
    cout, cin, kh, kw = w_oihw.shape
    w = jnp.transpose(w_oihw, (2, 3, 1, 0))                    # (kh, kw, cin, cout)
    w = jnp.pad(w, ((0, 0), (0, 0), (0, cin_p - cin), (0, cout_p - cout)))
    return w.reshape(kh * kw, cin_p, cout_p).astype(jnp.bfloat16)


def _pad_channels(v, cp):
    return jnp.pad(v, [(0, 0)] * (v.ndim - 1) + [(0, cp - v.shape[-1])])


def _scale_shift(stats, gamma, beta, m_total, cp):
    """Combine per-block partial (sum, sum_sq) into fused BN scale/shift rows."""
    tot = jnp.sum(stats, axis=0)                               # (2, cp)
    mean = tot[0] / m_total
    var = jnp.maximum(tot[1] / m_total - mean * mean, 0.0)
    scale = _pad_channels(gamma.astype(jnp.float32), cp) * lax.rsqrt(var + EPS)
    shift = _pad_channels(beta.astype(jnp.float32), cp) - mean * scale
    return scale.reshape(1, cp), shift.reshape(1, cp)


def init_residual_block_params(key, in_channels, out_channels, stride):
    ks = jax.random.split(key, 9)
    p = {
        "w1": 0.1 * jax.random.normal(ks[0], (out_channels, in_channels, 3, 3), jnp.float32),
        "g1": 1.0 + 0.1 * jax.random.normal(ks[1], (out_channels,), jnp.float32),
        "b1": 0.1 * jax.random.normal(ks[2], (out_channels,), jnp.float32),
        "w2": 0.1 * jax.random.normal(ks[3], (out_channels, out_channels, 3, 3), jnp.float32),
        "g2": 1.0 + 0.1 * jax.random.normal(ks[4], (out_channels,), jnp.float32),
        "b2": 0.1 * jax.random.normal(ks[5], (out_channels,), jnp.float32),
    }
    if stride != 1 or in_channels != out_channels:
        p["ws"] = 0.1 * jax.random.normal(ks[6], (out_channels, in_channels, 1, 1), jnp.float32)
        p["gs"] = 1.0 + 0.05 * jax.random.normal(ks[7], (out_channels,), jnp.float32)
        p["bs"] = 0.05 * jax.random.normal(ks[8], (out_channels,), jnp.float32)
    return p


def residual_block_forward(x_nchw, params, stride):
    """Forward pass of ResidualBlock.  x_nchw: (N, Cin, H, W) float32."""
    in_ch = x_nchw.shape[1]
    out_ch = params["w1"].shape[0]
    cp = _round_up(out_ch, LANE)                               # lane-dense channels
    projected = (stride != 1) or (in_ch != out_ch)

    x = jnp.transpose(x_nchw, (0, 2, 3, 1)).astype(jnp.float32)   # NHWC
    n = x.shape[0]

    # ---- pass 1: conv1 (3x3/stride) + partial BN stats (+ fused 1x1 shortcut) ----
    x_poly, ho, wo = _polyphase(x.astype(jnp.bfloat16), 3, 3, stride, 1)
    w1 = _w_to_flat(params["w1"], in_ch, cp)
    m = n * ho * wo
    if projected:
        ws = _w_to_flat(params["ws"], in_ch, cp).reshape(in_ch, cp)
        y1, st1, ys, sts = _conv_stats(x_poly, w1, 3, 3, stride, 1, ho, wo, ws=ws)
    else:
        y1, st1 = _conv_stats(x_poly, w1, 3, 3, stride, 1, ho, wo)
    sc1, sh1 = _scale_shift(st1, params["g1"], params["b1"], m, cp)

    # ---- pass 2: BN1 + ReLU (tiled over M, parallel) -> bf16 for conv2's MXU ----
    out1 = _bn_relu_apply(y1, sc1, sh1, jnp.bfloat16)          # (m, cp) bf16

    # ---- pass 1: conv2 (3x3 / stride 1) + partial BN stats ----
    o_poly, _, _ = _polyphase(out1.reshape(n, ho, wo, cp), 3, 3, 1, 1)
    w2 = _w_to_flat(params["w2"], cp, cp)
    y2, st2 = _conv_stats(o_poly, w2, 3, 3, 1, 1, ho, wo)
    sc2, sh2 = _scale_shift(st2, params["g2"], params["b2"], m, cp)

    # ---- residual branch (fused per-channel scale/shift) ----
    if projected:
        res = ys                                               # raw 1x1-conv output
        rsc, rsh = _scale_shift(sts, params["gs"], params["bs"], m, cp)
    else:
        res = _pad_channels(x, cp).reshape(m, cp)              # identity (f32)
        rsc = jnp.ones((1, cp), jnp.float32)
        rsh = jnp.zeros((1, cp), jnp.float32)

    # ---- pass 2: BN2 + residual add + ReLU (tiled over M, parallel) ----
    out = _bn_add_relu_apply(y2, sc2, sh2, res, rsc, rsh)      # (m, cp) f32

    out = out.reshape(n, ho, wo, cp)[..., :out_ch]
    return jnp.transpose(out, (0, 3, 1, 2))                    # back to NCHW


# ------------------------- pure-JAX reference model --------------------------

def _reference(x, params, stride):
    def conv(z, w, s, pad):
        return lax.conv_general_dilated(z, w, (s, s), ((pad, pad), (pad, pad)),
                                        dimension_numbers=("NCHW", "OIHW", "NCHW"))

    def bn(y, g, b):
        mu = jnp.mean(y, axis=(0, 2, 3), keepdims=True)
        var = jnp.mean((y - mu) ** 2, axis=(0, 2, 3), keepdims=True)
        return (y - mu) * lax.rsqrt(var + EPS) * g.reshape(1, -1, 1, 1) + b.reshape(1, -1, 1, 1)

    out = jax.nn.relu(bn(conv(x, params["w1"], stride, 1), params["g1"], params["b1"]))
    out = bn(conv(out, params["w2"], 1, 1), params["g2"], params["b2"])
    if "ws" in params:
        sc = bn(conv(x, params["ws"], stride, 0), params["gs"], params["bs"])
    else:
        sc = x
    return jax.nn.relu(out + sc)


# ----------------------------------- main ------------------------------------

if __name__ == "__main__":
    key = jax.random.PRNGKey(0)
    kx, kp1, kp2 = jax.random.split(key, 3)

    fwd = jax.jit(residual_block_forward, static_argnames=("stride",))

    # Case 1: projected shortcut (stride=2, in_channels != out_channels)
    x = jax.random.normal(kx, (2, 4, 16, 16), jnp.float32)        # NCHW
    params_a = init_residual_block_params(kp1, in_channels=4, out_channels=8, stride=2)
    out_a = jax.block_until_ready(fwd(x, params_a, stride=2))
    ref_a = _reference(x, params_a, stride=2)
    assert out_a.shape == (2, 8, 8, 8)
    assert jnp.allclose(out_a, ref_a, atol=2e-2, rtol=2e-2), (
        float(jnp.max(jnp.abs(out_a - ref_a))))

    # Case 2: identity shortcut (stride=1, in_channels == out_channels)
    x2 = jax.random.normal(kx, (2, 8, 16, 16), jnp.float32)
    params_b = init_residual_block_params(kp2, in_channels=8, out_channels=8, stride=1)
    out_b = jax.block_until_ready(fwd(x2, params_b, stride=1))
    ref_b = _reference(x2, params_b, stride=1)
    assert out_b.shape == (2, 8, 16, 16)
    assert jnp.allclose(out_b, ref_b, atol=2e-2, rtol=2e-2), (
        float(jnp.max(jnp.abs(out_b - ref_b))))

    print("KERNEL_OK")
</pallas_src>

<mosaic_0001>
module attributes {stable_mosaic.version = 11 : i64} {
  func.func @kernel(%arg0: i32, %arg1: memref<4x9x9x4xbf16, #tpu.memory_space<vmem>>, %arg2: memref<9x4x128xbf16, #tpu.memory_space<vmem>>, %arg3: memref<4x128xbf16, #tpu.memory_space<vmem>>, %arg4: memref<64x128xf32, #tpu.memory_space<vmem>>, %arg5: memref<1x2x128xf32, #tpu.memory_space<vmem>>, %arg6: memref<64x128xf32, #tpu.memory_space<vmem>>, %arg7: memref<1x2x128xf32, #tpu.memory_space<vmem>>) attributes {dimension_semantics = [#tpu.dimension_semantics<parallel>], iteration_bounds = array<i64: 2>, scalar_prefetch = 0 : i64, scratch_operands = 0 : i64, tpu.core_type = #tpu.core_type<tc>, window_params = [{transform_indices = @transform_0, window_bounds = array<i64: 4, 9, 9, 4>}, {pipeline_mode = #tpu.pipeline_mode<synchronous>, transform_indices = @transform_1, window_bounds = array<i64: 9, 4, 128>}, {pipeline_mode = #tpu.pipeline_mode<synchronous>, transform_indices = @transform_2, window_bounds = array<i64: 4, 128>}, {transform_indices = @transform_3, window_bounds = array<i64: 64, 128>}, {transform_indices = @transform_4, window_bounds = array<i64: 1, 2, 128>}, {transform_indices = @transform_5, window_bounds = array<i64: 64, 128>}, {transform_indices = @transform_6, window_bounds = array<i64: 1, 2, 128>}]} {
    %cst = arith.constant 0.000000e+00 : f32
    %0 = vector.broadcast %cst : f32 to vector<64x128xf32>
    %c0 = arith.constant 0 : index
    %c0_0 = arith.constant 0 : index
    %1 = vector.load %arg4[%c0, %c0_0] : memref<64x128xf32, #tpu.memory_space<vmem>>, vector<64x128xf32>
    tpu.vector_store %arg4[%c0, %c0_0], %0 {strides = array<i32>} : memref<64x128xf32, #tpu.memory_space<vmem>>, vector<64x128xf32>,
    %c0_1 = arith.constant 0 : index
    %c0_2 = arith.constant 0 : index
    %c0_3 = arith.constant 0 : index
    %c0_4 = arith.constant 0 : index
    %2 = vector.load %arg1[%c0_1, %c0_2, %c0_3, %c0_4] : memref<4x9x9x4xbf16, #tpu.memory_space<vmem>>, vector<1x8x8x4xbf16>
    %3 = vector.shape_cast %2 : vector<1x8x8x4xbf16> to vector<8x8x4xbf16>
    %4 = arith.extf %3 : vector<8x8x4xbf16> to vector<8x8x4xf32>
    %5 = vector.shape_cast %4 : vector<8x8x4xf32> to vector<64x4xf32>
    %6 = arith.truncf %5 : vector<64x4xf32> to vector<64x4xbf16>
    %c0_5 = arith.constant 0 : index
    %c0_6 = arith.constant 0 : index
    %7 = vector.load %arg4[%c0_5, %c0_6] : memref<64x128xf32, #tpu.memory_space<vmem>>, vector<64x128xf32>
    %c0_7 = arith.constant 0 : index
    %c0_8 = arith.constant 0 : index
    %c0_9 = arith.constant 0 : index
    %8 = vector.load %arg2[%c0_7, %c0_8, %c0_9] : memref<9x4x128xbf16, #tpu.memory_space<vmem>>, vector<1x4x128xbf16>
    %9 = vector.shape_cast %8 : vector<1x4x128xbf16> to vector<4x128xbf16>
    %cst_10 = arith.constant dense<0.000000e+00> : vector<64x128xf32>
    %10 = tpu.matmul %6, %9, %cst_10 {dimension_numbers = #tpu.dot_dimension_numbers<[1], [0], [0], [1], [0, 0, 1, 1], [], []>} : vector<64x4xbf16>, vector<4x128xbf16>, vector<64x128xf32> -> vector<64x128xf32>
    %11 = arith.addf %7, %10 : vector<64x128xf32>
    %c0_11 = arith.constant 0 : index
    %c0_12 = arith.constant 0 : index
    %12 = vector.load %arg4[%c0_11, %c0_12] : memref<64x128xf32, #tpu.memory_space<vmem>>, vector<64x128xf32>
    tpu.vector_store %arg4[%c0_11, %c0_12], %11 {strides = array<i32>} : memref<64x128xf32, #tpu.memory_space<vmem>>, vector<64x128xf32>,
    %c1 = arith.constant 1 : index
    %c0_13 = arith.constant 0 : index
    %c0_14 = arith.constant 0 : index
    %c0_15 = arith.constant 0 : index
    %13 = vector.load %arg1[%c1, %c0_13, %c0_14, %c0_15] : memref<4x9x9x4xbf16, #tpu.memory_space<vmem>>, vector<1x8x8x4xbf16>
    %14 = vector.shape_cast %13 : vector<1x8x8x4xbf16> to vector<8x8x4xbf16>
    %15 = arith.extf %14 : vector<8x8x4xbf16> to vector<8x8x4xf32>
    %16 = vector.shape_cast %15 : vector<8x8x4xf32> to vector<64x4xf32>
    %17 = arith.truncf %16 : vector<64x4xf32> to vector<64x4xbf16>
    %c0_16 = arith.constant 0 : index
    %c0_17 = arith.constant 0 : index
    %18 = vector.load %arg4[%c0_16, %c0_17] : memref<64x128xf32, #tpu.memory_space<vmem>>, vector<64x128xf32>
    %c1_18 = arith.constant 1 : index
    %c0_19 = arith.constant 0 : index
    %c0_20 = arith.constant 0 : index
    %19 = vector.load %arg2[%c1_18, %c0_19, %c0_20] : memref<9x4x128xbf16, #tpu.memory_space<vmem>>, vector<1x4x128xbf16>
    %20 = vector.shape_cast %19 : vector<1x4x128xbf16> to vector<4x128xbf16>
    %cst_21 = arith.constant dense<0.000000e+00> : vector<64x128xf32>
    %21 = tpu.matmul %17, %20, %cst_21 {dimension_numbers = #tpu.dot_dimension_numbers<[1], [0], [0], [1], [0, 0, 1, 1], [], []>} : vector<64x4xbf16>, vector<4x128xbf16>, vector<64x128xf32> -> vector<64x128xf32>
    %22 = arith.addf %18, %21 : vector<64x128xf32>
    %c0_22 = arith.constant 0 : index
    %c0_23 = arith.constant 0 : index
    %23 = vector.load %arg4[%c0_22, %c0_23] : memref<64x128xf32, #tpu.memory_space<vmem>>, vector<64x128xf32>
    tpu.vector_store %arg4[%c0_22, %c0_23], %22 {strides = array<i32>} : memref<64x128xf32, #tpu.memory_space<vmem>>, vector<64x128xf32>,
    %c0_24 = arith.constant 0 : index
    %c0_25 = arith.constant 0 : index
    %c1_26 = arith.constant 1 : index
    %c0_27 = arith.constant 0 : index
    %24 = vector.load %arg1[%c0_24, %c0_25, %c1_26, %c0_27] : memref<4x9x9x4xbf16, #tpu.memory_space<vmem>>, vector<1x8x8x4xbf16>
    %25 = vector.shape_cast %24 : vector<1x8x8x4xbf16> to vector<8x8x4xbf16>
    %26 = arith.extf %25 : vector<8x8x4xbf16> to vector<8x8x4xf32>
    %27 = vector.shape_cast %26 : vector<8x8x4xf32> to vector<64x4xf32>
    %28 = arith.truncf %27 : vector<64x4xf32> to vector<64x4xbf16>
    %c0_28 = arith.constant 0 : index
    %c0_29 = arith.constant 0 : index
    %29 = vector.load %arg4[%c0_28, %c0_29] : memref<64x128xf32, #tpu.memory_space<vmem>>, vector<64x128xf32>
    %c2 = arith.constant 2 : index
    %c0_30 = arith.constant 0 : index
    %c0_31 = arith.constant 0 : index
    %30 = vector.load %arg2[%c2, %c0_30, %c0_31] : memref<9x4x128xbf16, #tpu.memory_space<vmem>>, vector<1x4x128xbf16>
    %31 = vector.shape_cast %30 : vector<1x4x128xbf16> to vector<4x128xbf16>
    %cst_32 = arith.constant dense<0.000000e+00> : vector<64x128xf32>
    %32 = tpu.matmul %28, %31, %cst_32 {dimension_numbers = #tpu.dot_dimension_numbers<[1], [0], [0], [1], [0, 0, 1, 1], [], []>} : vector<64x4xbf16>, vector<4x128xbf16>, vector<64x128xf32> -> vector<64x128xf32>
    %33 = arith.addf %29, %32 : vector<64x128xf32>
    %c0_33 = arith.constant 0 : index
    %c0_34 = arith.constant 0 : index
    %34 = vector.load %arg4[%c0_33, %c0_34] : memref<64x128xf32, #tpu.memory_space<vmem>>, vector<64x128xf32>
    tpu.vector_store %arg4[%c0_33, %c0_34], %33 {strides = array<i32>} : memref<64x128xf32, #tpu.memory_space<vmem>>, vector<64x128xf32>,
    %c2_35 = arith.constant 2 : index
    %c0_36 = arith.constant 0 : index
    %c0_37 = arith.constant 0 : index
    %c0_38 = arith.constant 0 : index
    %35 = vector.load %arg1[%c2_35, %c0_36, %c0_37, %c0_38] : memref<4x9x9x4xbf16, #tpu.memory_space<vmem>>, vector<1x8x8x4xbf16>
    %36 = vector.shape_cast %35 : vector<1x8x8x4xbf16> to vector<8x8x4xbf16>
    %37 = arith.extf %36 : vector<8x8x4xbf16> to vector<8x8x4xf32>
    %38 = vector.shape_cast %37 : vector<8x8x4xf32> to vector<64x4xf32>
    %39 = arith.truncf %38 : vector<64x4xf32> to vector<64x4xbf16>
    %c0_39 = arith.constant 0 : index
    %c0_40 = arith.constant 0 : index
    %40 = vector.load %arg4[%c0_39, %c0_40] : memref<64x128xf32, #tpu.memory_space<vmem>>, vector<64x128xf32>
    %c3 = arith.constant 3 : index
    %c0_41 = arith.constant 0 : index
    %c0_42 = arith.constant 0 : index
    %41 = vector.load %arg2[%c3, %c0_41, %c0_42] : memref<9x4x128xbf16, #tpu.memory_space<vmem>>, vector<1x4x128xbf16>
    %42 = vector.shape_cast %41 : vector<1x4x128xbf16> to vector<4x128xbf16>
    %cst_43 = arith.constant dense<0.000000e+00> : vector<64x128xf32>
    %43 = tpu.matmul %39, %42, %cst_43 {dimension_numbers = #tpu.dot_dimension_numbers<[1], [0], [0], [1], [0, 0, 1, 1], [], []>} : vector<64x4xbf16>, vector<4x128xbf16>, vector<64x128xf32> -> vector<64x128xf32>
    %44 = arith.addf %40, %43 : vector<64x128xf32>
    %c0_44 = arith.constant 0 : index
    %c0_45 = arith.constant 0 : index
    %45 = vector.load %arg4[%c0_44, %c0_45] : memref<64x128xf32, #tpu.memory_space<vmem>>, vector<64x128xf32>
    tpu.vector_store %arg4[%c0_44, %c0_45], %44 {strides = array<i32>} : memref<64x128xf32, #tpu.memory_space<vmem>>, vector<64x128xf32>,
    %c3_46 = arith.constant 3 : index
    %c0_47 = arith.constant 0 : index
    %c0_48 = arith.constant 0 : index
    %c0_49 = arith.constant 0 : index
    %46 = vector.load %arg1[%c3_46, %c0_47, %c0_48, %c0_49] : memref<4x9x9x4xbf16, #tpu.memory_space<vmem>>, vector<1x8x8x4xbf16>
    %47 = vector.shape_cast %46 : vector<1x8x8x4xbf16> to vector<8x8x4xbf16>
    %48 = arith.extf %47 : vector<8x8x4xbf16> to vector<8x8x4xf32>
    %49 = vector.shape_cast %48 : vector<8x8x4xf32> to vector<64x4xf32>
    %50 = arith.truncf %49 : vector<64x4xf32> to vector<64x4xbf16>
    %c0_50 = arith.constant 0 : index
    %c0_51 = arith.constant 0 : index
    %51 = vector.load %arg4[%c0_50, %c0_51] : memref<64x128xf32, #tpu.memory_space<vmem>>, vector<64x128xf32>
    %c4 = arith.constant 4 : index
    %c0_52 = arith.constant 0 : index
    %c0_53 = arith.constant 0 : index
    %52 = vector.load %arg2[%c4, %c0_52, %c0_53] : memref<9x4x128xbf16, #tpu.memory_space<vmem>>, vector<1x4x128xbf16>
    %53 = vector.shape_cast %52 : vector<1x4x128xbf16> to vector<4x128xbf16>
    %cst_54 = arith.constant dense<0.000000e+00> : vector<64x128xf32>
    %54 = tpu.matmul %50, %53, %cst_54 {dimension_numbers = #tpu.dot_dimension_numbers<[1], [0], [0], [1], [0, 0, 1, 1], [], []>} : vector<64x4xbf16>, vector<4x128xbf16>, vector<64x128xf32> -> vector<64x128xf32>
    %55 = arith.addf %51, %54 : vector<64x128xf32>
    %c0_55 = arith.constant 0 : index
    %c0_56 = arith.constant 0 : index
    %56 = vector.load %arg4[%c0_55, %c0_56] : memref<64x128xf32, #tpu.memory_space<vmem>>, vector<64x128xf32>
    tpu.vector_store %arg4[%c0_55, %c0_56], %55 {strides = array<i32>} : memref<64x128xf32, #tpu.memory_space<vmem>>, vector<64x128xf32>,
    %c2_57 = arith.constant 2 : index
    %c0_58 = arith.constant 0 : index
    %c1_59 = arith.constant 1 : index
    %c0_60 = arith.constant 0 : index
    %57 = vector.load %arg1[%c2_57, %c0_58, %c1_59, %c0_60] : memref<4x9x9x4xbf16, #tpu.memory_space<vmem>>, vector<1x8x8x4xbf16>
    %58 = vector.shape_cast %57 : vector<1x8x8x4xbf16> to vector<8x8x4xbf16>
    %59 = arith.extf %58 : vector<8x8x4xbf16> to vector<8x8x4xf32>
    %60 = vector.shape_cast %59 : vector<8x8x4xf32> to vector<64x4xf32>
    %61 = arith.truncf %60 : vector<64x4xf32> to vector<64x4xbf16>
    %c0_61 = arith.constant 0 : index
    %c0_62 = arith.constant 0 : index
    %62 = vector.load %arg4[%c0_61, %c0_62] : memref<64x128xf32, #tpu.memory_space<vmem>>, vector<64x128xf32>
    %c5 = arith.constant 5 : index
    %c0_63 = arith.constant 0 : index
    %c0_64 = arith.constant 0 : index
    %63 = vector.load %arg2[%c5, %c0_63, %c0_64] : memref<9x4x128xbf16, #tpu.memory_space<vmem>>, vector<1x4x128xbf16>
    %64 = vector.shape_cast %63 : vector<1x4x128xbf16> to vector<4x128xbf16>
    %cst_65 = arith.constant dense<0.000000e+00> : vector<64x128xf32>
    %65 = tpu.matmul %61, %64, %cst_65 {dimension_numbers = #tpu.dot_dimension_numbers<[1], [0], [0], [1], [0, 0, 1, 1], [], []>} : vector<64x4xbf16>, vector<4x128xbf16>, vector<64x128xf32> -> vector<64x128xf32>
    %66 = arith.addf %62, %65 : vector<64x128xf32>
    %c0_66 = arith.constant 0 : index
    %c0_67 = arith.constant 0 : index
    %67 = vector.load %arg4[%c0_66, %c0_67] : memref<64x128xf32, #tpu.memory_space<vmem>>, vector<64x128xf32>
    tpu.vector_store %arg4[%c0_66, %c0_67], %66 {strides = array<i32>} : memref<64x128xf32, #tpu.memory_space<vmem>>, vector<64x128xf32>,
    %c0_68 = arith.constant 0 : index
    %c1_69 = arith.constant 1 : index
    %c0_70 = arith.constant 0 : index
    %c0_71 = arith.constant 0 : index
    %68 = vector.load %arg1[%c0_68, %c1_69, %c0_70, %c0_71] : memref<4x9x9x4xbf16, #tpu.memory_space<vmem>>, vector<1x8x8x4xbf16>
    %69 = vector.shape_cast %68 : vector<1x8x8x4xbf16> to vector<8x8x4xbf16>
    %70 = arith.extf %69 : vector<8x8x4xbf16> to vector<8x8x4xf32>
    %71 = vector.shape_cast %70 : vector<8x8x4xf32> to vector<64x4xf32>
    %72 = arith.truncf %71 : vector<64x4xf32> to vector<64x4xbf16>
    %c0_72 = arith.constant 0 : index
    %c0_73 = arith.constant 0 : index
    %73 = vector.load %arg4[%c0_72, %c0_73] : memref<64x128xf32, #tpu.memory_space<vmem>>, vector<64x128xf32>
    %c6 = arith.constant 6 : index
    %c0_74 = arith.constant 0 : index
    %c0_75 = arith.constant 0 : index
    %74 = vector.load %arg2[%c6, %c0_74, %c0_75] : memref<9x4x128xbf16, #tpu.memory_space<vmem>>, vector<1x4x128xbf16>
    %75 = vector.shape_cast %74 : vector<1x4x128xbf16> to vector<4x128xbf16>
    %cst_76 = arith.constant dense<0.000000e+00> : vector<64x128xf32>
    %76 = tpu.matmul %72, %75, %cst_76 {dimension_numbers = #tpu.dot_dimension_numbers<[1], [0], [0], [1], [0, 0, 1, 1], [], []>} : vector<64x4xbf16>, vector<4x128xbf16>, vector<64x128xf32> -> vector<64x128xf32>
    %77 = arith.addf %73, %76 : vector<64x128xf32>
    %c0_77 = arith.constant 0 : index
    %c0_78 = arith.constant 0 : index
    %78 = vector.load %arg4[%c0_77, %c0_78] : memref<64x128xf32, #tpu.memory_space<vmem>>, vector<64x128xf32>
    tpu.vector_store %arg4[%c0_77, %c0_78], %77 {strides = array<i32>} : memref<64x128xf32, #tpu.memory_space<vmem>>, vector<64x128xf32>,
    %c1_79 = arith.constant 1 : index
    %c1_80 = arith.constant 1 : index
    %c0_81 = arith.constant 0 : index
    %c0_82 = arith.constant 0 : index
    %79 = vector.load %arg1[%c1_79, %c1_80, %c0_81, %c0_82] : memref<4x9x9x4xbf16, #tpu.memory_space<vmem>>, vector<1x8x8x4xbf16>
    %80 = vector.shape_cast %79 : vector<1x8x8x4xbf16> to vector<8x8x4xbf16>
    %81 = arith.extf %80 : vector<8x8x4xbf16> to vector<8x8x4xf32>
    %82 = vector.shape_cast %81 : vector<8x8x4xf32> to vector<64x4xf32>
    %83 = arith.truncf %82 : vector<64x4xf32> to vector<64x4xbf16>
    %c0_83 = arith.constant 0 : index
    %c0_84 = arith.constant 0 : index
    %84 = vector.load %arg4[%c0_83, %c0_84] : memref<64x128xf32, #tpu.memory_space<vmem>>, vector<64x128xf32>
    %c7 = arith.constant 7 : index
    %c0_85 = arith.constant 0 : index
    %c0_86 = arith.constant 0 : index
    %85 = vector.load %arg2[%c7, %c0_85, %c0_86] : memref<9x4x128xbf16, #tpu.memory_space<vmem>>, vector<1x4x128xbf16>
    %86 = vector.shape_cast %85 : vector<1x4x128xbf16> to vector<4x128xbf16>
    %cst_87 = arith.constant dense<0.000000e+00> : vector<64x128xf32>
    %87 = tpu.matmul %83, %86, %cst_87 {dimension_numbers = #tpu.dot_dimension_numbers<[1], [0], [0], [1], [0, 0, 1, 1], [], []>} : vector<64x4xbf16>, vector<4x128xbf16>, vector<64x128xf32> -> vector<64x128xf32>
    %88 = arith.addf %84, %87 : vector<64x128xf32>
    %c0_88 = arith.constant 0 : index
    %c0_89 = arith.constant 0 : index
    %89 = vector.load %arg4[%c0_88, %c0_89] : memref<64x128xf32, #tpu.memory_space<vmem>>, vector<64x128xf32>
    tpu.vector_store %arg4[%c0_88, %c0_89], %88 {strides = array<i32>} : memref<64x128xf32, #tpu.memory_space<vmem>>, vector<64x128xf32>,
    %c0_90 = arith.constant 0 : index
    %c1_91 = arith.constant 1 : index
    %c1_92 = arith.constant 1 : index
    %c0_93 = arith.constant 0 : index
    %90 = vector.load %arg1[%c0_90, %c1_91, %c1_92, %c0_93] : memref<4x9x9x4xbf16, #tpu.memory_space<vmem>>, vector<1x8x8x4xbf16>
    %91 = vector.shape_cast %90 : vector<1x8x8x4xbf16> to vector<8x8x4xbf16>
    %92 = arith.extf %91 : vector<8x8x4xbf16> to vector<8x8x4xf32>
    %93 = vector.shape_cast %92 : vector<8x8x4xf32> to vector<64x4xf32>
    %94 = arith.truncf %93 : vector<64x4xf32> to vector<64x4xbf16>
    %c0_94 = arith.constant 0 : index
    %c0_95 = arith.constant 0 : index
    %95 = vector.load %arg4[%c0_94, %c0_95] : memref<64x128xf32, #tpu.memory_space<vmem>>, vector<64x128xf32>
    %c8 = arith.constant 8 : index
    %c0_96 = arith.constant 0 : index
    %c0_97 = arith.constant 0 : index
    %96 = vector.load %arg2[%c8, %c0_96, %c0_97] : memref<9x4x128xbf16, #tpu.memory_space<vmem>>, vector<1x4x128xbf16>
    %97 = vector.shape_cast %96 : vector<1x4x128xbf16> to vector<4x128xbf16>
    %cst_98 = arith.constant dense<0.000000e+00> : vector<64x128xf32>
    %98 = tpu.matmul %94, %97, %cst_98 {dimension_numbers = #tpu.dot_dimension_numbers<[1], [0], [0], [1], [0, 0, 1, 1], [], []>} : vector<64x4xbf16>, vector<4x128xbf16>, vector<64x128xf32> -> vector<64x128xf32>
    %99 = arith.addf %95, %98 : vector<64x128xf32>
    %c0_99 = arith.constant 0 : index
    %c0_100 = arith.constant 0 : index
    %100 = vector.load %arg4[%c0_99, %c0_100] : memref<64x128xf32, #tpu.memory_space<vmem>>, vector<64x128xf32>
    tpu.vector_store %arg4[%c0_99, %c0_100], %99 {strides = array<i32>} : memref<64x128xf32, #tpu.memory_space<vmem>>, vector<64x128xf32>,
    %c0_101 = arith.constant 0 : index
    %c0_102 = arith.constant 0 : index
    %101 = vector.load %arg4[%c0_101, %c0_102] : memref<64x128xf32, #tpu.memory_space<vmem>>, vector<64x128xf32>
    %cst_103 = arith.constant dense<0.000000e+00> : vector<128xf32>
    %102 = vector.multi_reduction <add>, %101, %cst_103 [0] : vector<64x128xf32> to vector<128xf32>
    %103 = vector.shape_cast %102 : vector<128xf32> to vector<1x128xf32>
    %c0_104 = arith.constant 0 : index
    %c0_105 = arith.constant 0 : index
    %c0_106 = arith.constant 0 : index
    %104 = vector.load %arg5[%c0_104, %c0_105, %c0_106] : memref<1x2x128xf32, #tpu.memory_space<vmem>>, vector<1x1x128xf32>
    %105 = vector.shape_cast %104 : vector<1x1x128xf32> to vector<1x128xf32>
    %106 = vector.shape_cast %103 : vector<1x128xf32> to vector<1x1x128xf32>
    tpu.vector_store %arg5[%c0_104, %c0_105, %c0_106], %106 {strides = array<i32>} : memref<1x2x128xf32, #tpu.memory_space<vmem>>, vector<1x1x128xf32>,
    %107 = arith.mulf %101, %101 : vector<64x128xf32>
    %cst_107 = arith.constant dense<0.000000e+00> : vector<128xf32>
    %108 = vector.multi_reduction <add>, %107, %cst_107 [0] : vector<64x128xf32> to vector<128xf32>
    %109 = vector.shape_cast %108 : vector<128xf32> to vector<1x128xf32>
    %c0_108 = arith.constant 0 : index
    %c1_109 = arith.constant 1 : index
    %c0_110 = arith.constant 0 : index
    %110 = vector.load %arg5[%c0_108, %c1_109, %c0_110] : memref<1x2x128xf32, #tpu.memory_space<vmem>>, vector<1x1x128xf32>
    %111 = vector.shape_cast %110 : vector<1x1x128xf32> to vector<1x128xf32>
    %112 = vector.shape_cast %109 : vector<1x128xf32> to vector<1x1x128xf32>
    tpu.vector_store %arg5[%c0_108, %c1_109, %c0_110], %112 {strides = array<i32>} : memref<1x2x128xf32, #tpu.memory_space<vmem>>, vector<1x1x128xf32>,
    %c3_111 = arith.constant 3 : index
    %c0_112 = arith.constant 0 : index
    %c0_113 = arith.constant 0 : index
    %c0_114 = arith.constant 0 : index
    %113 = vector.load %arg1[%c3_111, %c0_112, %c0_113, %c0_114] : memref<4x9x9x4xbf16, #tpu.memory_space<vmem>>, vector<1x8x8x4xbf16>
    %114 = vector.shape_cast %113 : vector<1x8x8x4xbf16> to vector<8x8x4xbf16>
    %115 = arith.extf %114 : vector<8x8x4xbf16> to vector<8x8x4xf32>
    %116 = vector.shape_cast %115 : vector<8x8x4xf32> to vector<64x4xf32>
    %117 = arith.truncf %116 : vector<64x4xf32> to vector<64x4xbf16>
    %c0_115 = arith.constant 0 : index
    %c0_116 = arith.constant 0 : index
    %118 = vector.load %arg3[%c0_115, %c0_116] : memref<4x128xbf16, #tpu.memory_space<vmem>>, vector<4x128xbf16>
    %cst_117 = arith.constant dense<0.000000e+00> : vector<64x128xf32>
    %119 = tpu.matmul %117, %118, %cst_117 {dimension_numbers = #tpu.dot_dimension_numbers<[1], [0], [0], [1], [0, 0, 1, 1], [], []>} : vector<64x4xbf16>, vector<4x128xbf16>, vector<64x128xf32> -> vector<64x128xf32>
    %c0_118 = arith.constant 0 : index
    %c0_119 = arith.constant 0 : index
    %120 = vector.load %arg6[%c0_118, %c0_119] : memref<64x128xf32, #tpu.memory_space<vmem>>, vector<64x128xf32>
    tpu.vector_store %arg6[%c0_118, %c0_119], %119 {strides = array<i32>} : memref<64x128xf32, #tpu.memory_space<vmem>>, vector<64x128xf32>,
    %cst_120 = arith.constant dense<0.000000e+00> : vector<128xf32>
    %121 = vector.multi_reduction <add>, %119, %cst_120 [0] : vector<64x128xf32> to vector<128xf32>
    %122 = vector.shape_cast %121 : vector<128xf32> to vector<1x128xf32>
    %c0_121 = arith.constant 0 : index
    %c0_122 = arith.constant 0 : index
    %c0_123 = arith.constant 0 : index
    %123 = vector.load %arg7[%c0_121, %c0_122, %c0_123] : memref<1x2x128xf32, #tpu.memory_space<vmem>>, vector<1x1x128xf32>
    %124 = vector.shape_cast %123 : vector<1x1x128xf32> to vector<1x128xf32>
    %125 = vector.shape_cast %122 : vector<1x128xf32> to vector<1x1x128xf32>
    tpu.vector_store %arg7[%c0_121, %c0_122, %c0_123], %125 {strides = array<i32>} : memref<1x2x128xf32, #tpu.memory_space<vmem>>, vector<1x1x128xf32>,
    %126 = arith.mulf %119, %119 : vector<64x128xf32>
    %cst_124 = arith.constant dense<0.000000e+00> : vector<128xf32>
    %127 = vector.multi_reduction <add>, %126, %cst_124 [0] : vector<64x128xf32> to vector<128xf32>
    %128 = vector.shape_cast %127 : vector<128xf32> to vector<1x128xf32>
    %c0_125 = arith.constant 0 : index
    %c1_126 = arith.constant 1 : index
    %c0_127 = arith.constant 0 : index
    %129 = vector.load %arg7[%c0_125, %c1_126, %c0_127] : memref<1x2x128xf32, #tpu.memory_space<vmem>>, vector<1x1x128xf32>
    %130 = vector.shape_cast %129 : vector<1x1x128xf32> to vector<1x128xf32>
    %131 = vector.shape_cast %128 : vector<1x128xf32> to vector<1x1x128xf32>
    tpu.vector_store %arg7[%c0_125, %c1_126, %c0_127], %131 {strides = array<i32>} : memref<1x2x128xf32, #tpu.memory_space<vmem>>, vector<1x1x128xf32>,
    return
  }
  func.func @transform_0(%arg0: i32) -> (i32, i32, i32, i32) {
    %c0_i32 = arith.constant 0 : i32
    %c0_i32_0 = arith.constant 0 : i32
    %c0_i32_1 = arith.constant 0 : i32
    %c0_i32_2 = arith.constant 0 : i32
    return %arg0, %c0_i32, %c0_i32_0, %c0_i32_1 : i32, i32, i32, i32
  }
  func.func @transform_1(%arg0: i32) -> (i32, i32, i32) {
    %c0_i32 = arith.constant 0 : i32
    %c0_i32_0 = arith.constant 0 : i32
    %c0_i32_1 = arith.constant 0 : i32
    %c0_i32_2 = arith.constant 0 : i32
    return %c0_i32, %c0_i32_0, %c0_i32_1 : i32, i32, i32
  }
  func.func @transform_2(%arg0: i32) -> (i32, i32) {
    %c0_i32 = arith.constant 0 : i32
    %c0_i32_0 = arith.constant 0 : i32
    %c0_i32_1 = arith.constant 0 : i32
    return %c0_i32, %c0_i32_0 : i32, i32
  }
  func.func @transform_3(%arg0: i32) -> (i32, i32) {
    %c0_i32 = arith.constant 0 : i32
    %c0_i32_0 = arith.constant 0 : i32
    return %arg0, %c0_i32 : i32, i32
  }
  func.func @transform_4(%arg0: i32) -> (i32, i32, i32) {
    %c0_i32 = arith.constant 0 : i32
    %c0_i32_0 = arith.constant 0 : i32
    %c0_i32_1 = arith.constant 0 : i32
    return %arg0, %c0_i32, %c0_i32_0 : i32, i32, i32
  }
  func.func @transform_5(%arg0: i32) -> (i32, i32) {
    %c0_i32 = arith.constant 0 : i32
    %c0_i32_0 = arith.constant 0 : i32
    return %arg0, %c0_i32 : i32, i32
  }
  func.func @transform_6(%arg0: i32) -> (i32, i32, i32) {
    %c0_i32 = arith.constant 0 : i32
    %c0_i32_0 = arith.constant 0 : i32
    %c0_i32_1 = arith.constant 0 : i32
    return %arg0, %c0_i32, %c0_i32_0 : i32, i32, i32
  }
}

module attributes {stable_mosaic.version = 11 : i64} {
  func.func @_bn_relu_kernel(%arg0: i32, %arg1: memref<128x128xf32, #tpu.memory_space<vmem>>, %arg2: memref<1x128xf32, #tpu.memory_space<vmem>>, %arg3: memref<1x128xf32, #tpu.memory_space<vmem>>, %arg4: memref<128x128xbf16, #tpu.memory_space<vmem>>) attributes {dimension_semantics = [#tpu.dimension_semantics<parallel>], iteration_bounds = array<i64: 1>, scalar_prefetch = 0 : i64, scratch_operands = 0 : i64, tpu.core_type = #tpu.core_type<tc>, window_params = [{transform_indices = @transform_0, window_bounds = array<i64: 128, 128>}, {pipeline_mode = #tpu.pipeline_mode<synchronous>, transform_indices = @transform_1, window_bounds = array<i64: 1, 128>}, {pipeline_mode = #tpu.pipeline_mode<synchronous>, transform_indices = @transform_2, window_bounds = array<i64: 1, 128>}, {transform_indices = @transform_3, window_bounds = array<i64: 128, 128>}]} {
    %c0 = arith.constant 0 : index
    %c0_0 = arith.constant 0 : index
    %0 = vector.load %arg1[%c0, %c0_0] : memref<128x128xf32, #tpu.memory_space<vmem>>, vector<128x128xf32>
    %c0_1 = arith.constant 0 : index
    %c0_2 = arith.constant 0 : index
    %1 = vector.load %arg2[%c0_1, %c0_2] : memref<1x128xf32, #tpu.memory_space<vmem>>, vector<1x128xf32>
    %2 = vector.broadcast %1 : vector<1x128xf32> to vector<128x128xf32>
    %3 = arith.mulf %0, %2 : vector<128x128xf32>
    %c0_3 = arith.constant 0 : index
    %c0_4 = arith.constant 0 : index
    %4 = vector.load %arg3[%c0_3, %c0_4] : memref<1x128xf32, #tpu.memory_space<vmem>>, vector<1x128xf32>
    %5 = vector.broadcast %4 : vector<1x128xf32> to vector<128x128xf32>
    %6 = arith.addf %3, %5 : vector<128x128xf32>
    %cst = arith.constant 0.000000e+00 : f32
    %7 = vector.broadcast %cst : f32 to vector<128x128xf32>
    %8 = arith.maximumf %6, %7 : vector<128x128xf32>
    %9 = arith.truncf %8 : vector<128x128xf32> to vector<128x128xbf16>
    %c0_5 = arith.constant 0 : index
    %c0_6 = arith.constant 0 : index
    %10 = vector.load %arg4[%c0_5, %c0_6] : memref<128x128xbf16, #tpu.memory_space<vmem>>, vector<128x128xbf16>
    tpu.vector_store %arg4[%c0_5, %c0_6], %9 {strides = array<i32>} : memref<128x128xbf16, #tpu.memory_space<vmem>>, vector<128x128xbf16>,
    return
  }
  func.func @transform_0(%arg0: i32) -> (i32, i32) {
    %c0_i32 = arith.constant 0 : i32
    %c0_i32_0 = arith.constant 0 : i32
    return %arg0, %c0_i32 : i32, i32
  }
  func.func @transform_1(%arg0: i32) -> (i32, i32) {
    %c0_i32 = arith.constant 0 : i32
    %c0_i32_0 = arith.constant 0 : i32
    %c0_i32_1 = arith.constant 0 : i32
    return %c0_i32, %c0_i32_0 : i32, i32
  }
  func.func @transform_2(%arg0: i32) -> (i32, i32) {
    %c0_i32 = arith.constant 0 : i32
    %c0_i32_0 = arith.constant 0 : i32
    %c0_i32_1 = arith.constant 0 : i32
    return %c0_i32, %c0_i32_0 : i32, i32
  }
  func.func @transform_3(%arg0: i32) -> (i32, i32) {
    %c0_i32 = arith.constant 0 : i32
    %c0_i32_0 = arith.constant 0 : i32
    return %arg0, %c0_i32 : i32, i32
  }
}

module attributes {stable_mosaic.version = 11 : i64} {
  func.func @kernel(%arg0: i32, %arg1: memref<1x10x10x128xbf16, #tpu.memory_space<vmem>>, %arg2: memref<9x128x128xbf16, #tpu.memory_space<vmem>>, %arg3: memref<64x128xf32, #tpu.memory_space<vmem>>, %arg4: memref<1x2x128xf32, #tpu.memory_space<vmem>>) attributes {dimension_semantics = [#tpu.dimension_semantics<parallel>], iteration_bounds = array<i64: 2>, scalar_prefetch = 0 : i64, scratch_operands = 0 : i64, tpu.core_type = #tpu.core_type<tc>, window_params = [{transform_indices = @transform_0, window_bounds = array<i64: 1, 10, 10, 128>}, {pipeline_mode = #tpu.pipeline_mode<synchronous>, transform_indices = @transform_1, window_bounds = array<i64: 9, 128, 128>}, {transform_indices = @transform_2, window_bounds = array<i64: 64, 128>}, {transform_indices = @transform_3, window_bounds = array<i64: 1, 2, 128>}]} {
    %cst = arith.constant 0.000000e+00 : f32
    %0 = vector.broadcast %cst : f32 to vector<64x128xf32>
    %c0 = arith.constant 0 : index
    %c0_0 = arith.constant 0 : index
    %1 = vector.load %arg3[%c0, %c0_0] : memref<64x128xf32, #tpu.memory_space<vmem>>, vector<64x128xf32>
    tpu.vector_store %arg3[%c0, %c0_0], %0 {strides = array<i32>} : memref<64x128xf32, #tpu.memory_space<vmem>>, vector<64x128xf32>,
    %c0_1 = arith.constant 0 : index
    %c0_2 = arith.constant 0 : index
    %c0_3 = arith.constant 0 : index
    %c0_4 = arith.constant 0 : index
    %2 = vector.load %arg1[%c0_1, %c0_2, %c0_3, %c0_4] : memref<1x10x10x128xbf16, #tpu.memory_space<vmem>>, vector<1x8x8x128xbf16>
    %3 = vector.shape_cast %2 : vector<1x8x8x128xbf16> to vector<8x8x128xbf16>
    %4 = arith.extf %3 : vector<8x8x128xbf16> to vector<8x8x128xf32>
    %5 = vector.shape_cast %4 : vector<8x8x128xf32> to vector<64x128xf32>
    %6 = arith.truncf %5 : vector<64x128xf32> to vector<64x128xbf16>
    %c0_5 = arith.constant 0 : index
    %c0_6 = arith.constant 0 : index
    %7 = vector.load %arg3[%c0_5, %c0_6] : memref<64x128xf32, #tpu.memory_space<vmem>>, vector<64x128xf32>
    %c0_7 = arith.constant 0 : index
    %c0_8 = arith.constant 0 : index
    %c0_9 = arith.constant 0 : index
    %8 = vector.load %arg2[%c0_7, %c0_8, %c0_9] : memref<9x128x128xbf16, #tpu.memory_space<vmem>>, vector<1x128x128xbf16>
    %9 = vector.shape_cast %8 : vector<1x128x128xbf16> to vector<128x128xbf16>
    %cst_10 = arith.constant dense<0.000000e+00> : vector<64x128xf32>
    %10 = tpu.matmul %6, %9, %cst_10 {dimension_numbers = #tpu.dot_dimension_numbers<[1], [0], [0], [1], [0, 0, 1, 1], [], []>} : vector<64x128xbf16>, vector<128x128xbf16>, vector<64x128xf32> -> vector<64x128xf32>
    %11 = arith.addf %7, %10 : vector<64x128xf32>
    %c0_11 = arith.constant 0 : index
    %c0_12 = arith.constant 0 : index
    %12 = vector.load %arg3[%c0_11, %c0_12] : memref<64x128xf32, #tpu.memory_space<vmem>>, vector<64x128xf32>
    tpu.vector_store %arg3[%c0_11, %c0_12], %11 {strides = array<i32>} : memref<64x128xf32, #tpu.memory_space<vmem>>, vector<64x128xf32>,
    %c0_13 = arith.constant 0 : index
    %c0_14 = arith.constant 0 : index
    %c1 = arith.constant 1 : index
    %c0_15 = arith.constant 0 : index
    %13 = vector.load %arg1[%c0_13, %c0_14, %c1, %c0_15] : memref<1x10x10x128xbf16, #tpu.memory_space<vmem>>, vector<1x8x8x128xbf16>
    %14 = vector.shape_cast %13 : vector<1x8x8x128xbf16> to vector<8x8x128xbf16>
    %15 = arith.extf %14 : vector<8x8x128xbf16> to vector<8x8x128xf32>
    %16 = vector.shape_cast %15 : vector<8x8x128xf32> to vector<64x128xf32>
    %17 = arith.truncf %16 : vector<64x128xf32> to vector<64x128xbf16>
    %c0_16 = arith.constant 0 : index
    %c0_17 = arith.constant 0 : index
    %18 = vector.load %arg3[%c0_16, %c0_17] : memref<64x128xf32, #tpu.memory_space<vmem>>, vector<64x128xf32>
    %c1_18 = arith.constant 1 : index
    %c0_19 = arith.constant 0 : index
    %c0_20 = arith.constant 0 : index
    %19 = vector.load %arg2[%c1_18, %c0_19, %c0_20] : memref<9x128x128xbf16, #tpu.memory_space<vmem>>, vector<1x128x128xbf16>
    %20 = vector.shape_cast %19 : vector<1x128x128xbf16> to vector<128x128xbf16>
    %cst_21 = arith.constant dense<0.000000e+00> : vector<64x128xf32>
    %21 = tpu.matmul %17, %20, %cst_21 {dimension_numbers = #tpu.dot_dimension_numbers<[1], [0], [0], [1], [0, 0, 1, 1], [], []>} : vector<64x128xbf16>, vector<128x128xbf16>, vector<64x128xf32> -> vector<64x128xf32>
    %22 = arith.addf %18, %21 : vector<64x128xf32>
    %c0_22 = arith.constant 0 : index
    %c0_23 = arith.constant 0 : index
    %23 = vector.load %arg3[%c0_22, %c0_23] : memref<64x128xf32, #tpu.memory_space<vmem>>, vector<64x128xf32>
    tpu.vector_store %arg3[%c0_22, %c0_23], %22 {strides = array<i32>} : memref<64x128xf32, #tpu.memory_space<vmem>>, vector<64x128xf32>,
    %c0_24 = arith.constant 0 : index
    %c0_25 = arith.constant 0 : index
    %c2 = arith.constant 2 : index
    %c0_26 = arith.constant 0 : index
    %24 = vector.load %arg1[%c0_24, %c0_25, %c2, %c0_26] : memref<1x10x10x128xbf16, #tpu.memory_space<vmem>>, vector<1x8x8x128xbf16>
    %25 = vector.shape_cast %24 : vector<1x8x8x128xbf16> to vector<8x8x128xbf16>
    %26 = arith.extf %25 : vector<8x8x128xbf16> to vector<8x8x128xf32>
    %27 = vector.shape_cast %26 : vector<8x8x128xf32> to vector<64x128xf32>
    %28 = arith.truncf %27 : vector<64x128xf32> to vector<64x128xbf16>
    %c0_27 = arith.constant 0 : index
    %c0_28 = arith.constant 0 : index
    %29 = vector.load %arg3[%c0_27, %c0_28] : memref<64x128xf32, #tpu.memory_space<vmem>>, vector<64x128xf32>
    %c2_29 = arith.constant 2 : index
    %c0_30 = arith.constant 0 : index
    %c0_31 = arith.constant 0 : index
    %30 = vector.load %arg2[%c2_29, %c0_30, %c0_31] : memref<9x128x128xbf16, #tpu.memory_space<vmem>>, vector<1x128x128xbf16>
    %31 = vector.shape_cast %30 : vector<1x128x128xbf16> to vector<128x128xbf16>
    %cst_32 = arith.constant dense<0.000000e+00> : vector<64x128xf32>
    %32 = tpu.matmul %28, %31, %cst_32 {dimension_numbers = #tpu.dot_dimension_numbers<[1], [0], [0], [1], [0, 0, 1, 1], [], []>} : vector<64x128xbf16>, vector<128x128xbf16>, vector<64x128xf32> -> vector<64x128xf32>
    %33 = arith.addf %29, %32 : vector<64x128xf32>
    %c0_33 = arith.constant 0 : index
    %c0_34 = arith.constant 0 : index
    %34 = vector.load %arg3[%c0_33, %c0_34] : memref<64x128xf32, #tpu.memory_space<vmem>>, vector<64x128xf32>
    tpu.vector_store %arg3[%c0_33, %c0_34], %33 {strides = array<i32>} : memref<64x128xf32, #tpu.memory_space<vmem>>, vector<64x128xf32>,
    %c0_35 = arith.constant 0 : index
    %c1_36 = arith.constant 1 : index
    %c0_37 = arith.constant 0 : index
    %c0_38 = arith.constant 0 : index
    %35 = vector.load %arg1[%c0_35, %c1_36, %c0_37, %c0_38] : memref<1x10x10x128xbf16, #tpu.memory_space<vmem>>, vector<1x8x8x128xbf16>
    %36 = vector.shape_cast %35 : vector<1x8x8x128xbf16> to vector<8x8x128xbf16>
    %37 = arith.extf %36 : vector<8x8x128xbf16> to vector<8x8x128xf32>
    %38 = vector.shape_cast %37 : vector<8x8x128xf32> to vector<64x128xf32>
    %39 = arith.truncf %38 : vector<64x128xf32> to vector<64x128xbf16>
    %c0_39 = arith.constant 0 : index
    %c0_40 = arith.constant 0 : index
    %40 = vector.load %arg3[%c0_39, %c0_40] : memref<64x128xf32, #tpu.memory_space<vmem>>, vector<64x128xf32>
    %c3 = arith.constant 3 : index
    %c0_41 = arith.constant 0 : index
    %c0_42 = arith.constant 0 : index
    %41 = vector.load %arg2[%c3, %c0_41, %c0_42] : memref<9x128x128xbf16, #tpu.memory_space<vmem>>, vector<1x128x128xbf16>
    %42 = vector.shape_cast %41 : vector<1x128x128xbf16> to vector<128x128xbf16>
    %cst_43 = arith.constant dense<0.000000e+00> : vector<64x128xf32>
    %43 = tpu.matmul %39, %42, %cst_43 {dimension_numbers = #tpu.dot_dimension_numbers<[1], [0], [0], [1], [0, 0, 1, 1], [], []>} : vector<64x128xbf16>, vector<128x128xbf16>, vector<64x128xf32> -> vector<64x128xf32>
    %44 = arith.addf %40, %43 : vector<64x128xf32>
    %c0_44 = arith.constant 0 : index
    %c0_45 = arith.constant 0 : index
    %45 = vector.load %arg3[%c0_44, %c0_45] : memref<64x128xf32, #tpu.memory_space<vmem>>, vector<64x128xf32>
    tpu.vector_store %arg3[%c0_44, %c0_45], %44 {strides = array<i32>} : memref<64x128xf32, #tpu.memory_space<vmem>>, vector<64x128xf32>,
    %c0_46 = arith.constant 0 : index
    %c1_47 = arith.constant 1 : index
    %c1_48 = arith.constant 1 : index
    %c0_49 = arith.constant 0 : index
    %46 = vector.load %arg1[%c0_46, %c1_47, %c1_48, %c0_49] : memref<1x10x10x128xbf16, #tpu.memory_space<vmem>>, vector<1x8x8x128xbf16>
    %47 = vector.shape_cast %46 : vector<1x8x8x128xbf16> to vector<8x8x128xbf16>
    %48 = arith.extf %47 : vector<8x8x128xbf16> to vector<8x8x128xf32>
    %49 = vector.shape_cast %48 : vector<8x8x128xf32> to vector<64x128xf32>
    %50 = arith.truncf %49 : vector<64x128xf32> to vector<64x128xbf16>
    %c0_50 = arith.constant 0 : index
    %c0_51 = arith.constant 0 : index
    %51 = vector.load %arg3[%c0_50, %c0_51] : memref<64x128xf32, #tpu.memory_space<vmem>>, vector<64x128xf32>
    %c4 = arith.constant 4 : index
    %c0_52 = arith.constant 0 : index
    %c0_53 = arith.constant 0 : index
    %52 = vector.load %arg2[%c4, %c0_52, %c0_53] : memref<9x128x128xbf16, #tpu.memory_space<vmem>>, vector<1x128x128xbf16>
    %53 = vector.shape_cast %52 : vector<1x128x128xbf16> to vector<128x128xbf16>
    %cst_54 = arith.constant dense<0.000000e+00> : vector<64x128xf32>
    %54 = tpu.matmul %50, %53, %cst_54 {dimension_numbers = #tpu.dot_dimension_numbers<[1], [0], [0], [1], [0, 0, 1, 1], [], []>} : vector<64x128xbf16>, vector<128x128xbf16>, vector<64x128xf32> -> vector<64x128xf32>
    %55 = arith.addf %51, %54 : vector<64x128xf32>
    %c0_55 = arith.constant 0 : index
    %c0_56 = arith.constant 0 : index
    %56 = vector.load %arg3[%c0_55, %c0_56] : memref<64x128xf32, #tpu.memory_space<vmem>>, vector<64x128xf32>
    tpu.vector_store %arg3[%c0_55, %c0_56], %55 {strides = array<i32>} : memref<64x128xf32, #tpu.memory_space<vmem>>, vector<64x128xf32>,
    %c0_57 = arith.constant 0 : index
    %c1_58 = arith.constant 1 : index
    %c2_59 = arith.constant 2 : index
    %c0_60 = arith.constant 0 : index
    %57 = vector.load %arg1[%c0_57, %c1_58, %c2_59, %c0_60] : memref<1x10x10x128xbf16, #tpu.memory_space<vmem>>, vector<1x8x8x128xbf16>
    %58 = vector.shape_cast %57 : vector<1x8x8x128xbf16> to vector<8x8x128xbf16>
    %59 = arith.extf %58 : vector<8x8x128xbf16> to vector<8x8x128xf32>
    %60 = vector.shape_cast %59 : vector<8x8x128xf32> to vector<64x128xf32>
    %61 = arith.truncf %60 : vector<64x128xf32> to vector<64x128xbf16>
    %c0_61 = arith.constant 0 : index
    %c0_62 = arith.constant 0 : index
    %62 = vector.load %arg3[%c0_61, %c0_62] : memref<64x128xf32, #tpu.memory_space<vmem>>, vector<64x128xf32>
    %c5 = arith.constant 5 : index
    %c0_63 = arith.constant 0 : index
    %c0_64 = arith.constant 0 : index
    %63 = vector.load %arg2[%c5, %c0_63, %c0_64] : memref<9x128x128xbf16, #tpu.memory_space<vmem>>, vector<1x128x128xbf16>
    %64 = vector.shape_cast %63 : vector<1x128x128xbf16> to vector<128x128xbf16>
    %cst_65 = arith.constant dense<0.000000e+00> : vector<64x128xf32>
    %65 = tpu.matmul %61, %64, %cst_65 {dimension_numbers = #tpu.dot_dimension_numbers<[1], [0], [0], [1], [0, 0, 1, 1], [], []>} : vector<64x128xbf16>, vector<128x128xbf16>, vector<64x128xf32> -> vector<64x128xf32>
    %66 = arith.addf %62, %65 : vector<64x128xf32>
    %c0_66 = arith.constant 0 : index
    %c0_67 = arith.constant 0 : index
    %67 = vector.load %arg3[%c0_66, %c0_67] : memref<64x128xf32, #tpu.memory_space<vmem>>, vector<64x128xf32>
    tpu.vector_store %arg3[%c0_66, %c0_67], %66 {strides = array<i32>} : memref<64x128xf32, #tpu.memory_space<vmem>>, vector<64x128xf32>,
    %c0_68 = arith.constant 0 : index
    %c2_69 = arith.constant 2 : index
    %c0_70 = arith.constant 0 : index
    %c0_71 = arith.constant 0 : index
    %68 = vector.load %arg1[%c0_68, %c2_69, %c0_70, %c0_71] : memref<1x10x10x128xbf16, #tpu.memory_space<vmem>>, vector<1x8x8x128xbf16>
    %69 = vector.shape_cast %68 : vector<1x8x8x128xbf16> to vector<8x8x128xbf16>
    %70 = arith.extf %69 : vector<8x8x128xbf16> to vector<8x8x128xf32>
    %71 = vector.shape_cast %70 : vector<8x8x128xf32> to vector<64x128xf32>
    %72 = arith.truncf %71 : vector<64x128xf32> to vector<64x128xbf16>
    %c0_72 = arith.constant 0 : index
    %c0_73 = arith.constant 0 : index
    %73 = vector.load %arg3[%c0_72, %c0_73] : memref<64x128xf32, #tpu.memory_space<vmem>>, vector<64x128xf32>
    %c6 = arith.constant 6 : index
    %c0_74 = arith.constant 0 : index
    %c0_75 = arith.constant 0 : index
    %74 = vector.load %arg2[%c6, %c0_74, %c0_75] : memref<9x128x128xbf16, #tpu.memory_space<vmem>>, vector<1x128x128xbf16>
    %75 = vector.shape_cast %74 : vector<1x128x128xbf16> to vector<128x128xbf16>
    %cst_76 = arith.constant dense<0.000000e+00> : vector<64x128xf32>
    %76 = tpu.matmul %72, %75, %cst_76 {dimension_numbers = #tpu.dot_dimension_numbers<[1], [0], [0], [1], [0, 0, 1, 1], [], []>} : vector<64x128xbf16>, vector<128x128xbf16>, vector<64x128xf32> -> vector<64x128xf32>
    %77 = arith.addf %73, %76 : vector<64x128xf32>
    %c0_77 = arith.constant 0 : index
    %c0_78 = arith.constant 0 : index
    %78 = vector.load %arg3[%c0_77, %c0_78] : memref<64x128xf32, #tpu.memory_space<vmem>>, vector<64x128xf32>
    tpu.vector_store %arg3[%c0_77, %c0_78], %77 {strides = array<i32>} : memref<64x128xf32, #tpu.memory_space<vmem>>, vector<64x128xf32>,
    %c0_79 = arith.constant 0 : index
    %c2_80 = arith.constant 2 : index
    %c1_81 = arith.constant 1 : index
    %c0_82 = arith.constant 0 : index
    %79 = vector.load %arg1[%c0_79, %c2_80, %c1_81, %c0_82] : memref<1x10x10x128xbf16, #tpu.memory_space<vmem>>, vector<1x8x8x128xbf16>
    %80 = vector.shape_cast %79 : vector<1x8x8x128xbf16> to vector<8x8x128xbf16>
    %81 = arith.extf %80 : vector<8x8x128xbf16> to vector<8x8x128xf32>
    %82 = vector.shape_cast %81 : vector<8x8x128xf32> to vector<64x128xf32>
    %83 = arith.truncf %82 : vector<64x128xf32> to vector<64x128xbf16>
    %c0_83 = arith.constant 0 : index
    %c0_84 = arith.constant 0 : index
    %84 = vector.load %arg3[%c0_83, %c0_84] : memref<64x128xf32, #tpu.memory_space<vmem>>, vector<64x128xf32>
    %c7 = arith.constant 7 : index
    %c0_85 = arith.constant 0 : index
    %c0_86 = arith.constant 0 : index
    %85 = vector.load %arg2[%c7, %c0_85, %c0_86] : memref<9x128x128xbf16, #tpu.memory_space<vmem>>, vector<1x128x128xbf16>
    %86 = vector.shape_cast %85 : vector<1x128x128xbf16> to vector<128x128xbf16>
    %cst_87 = arith.constant dense<0.000000e+00> : vector<64x128xf32>
    %87 = tpu.matmul %83, %86, %cst_87 {dimension_numbers = #tpu.dot_dimension_numbers<[1], [0], [0], [1], [0, 0, 1, 1], [], []>} : vector<64x128xbf16>, vector<128x128xbf16>, vector<64x128xf32> -> vector<64x128xf32>
    %88 = arith.addf %84, %87 : vector<64x128xf32>
    %c0_88 = arith.constant 0 : index
    %c0_89 = arith.constant 0 : index
    %89 = vector.load %arg3[%c0_88, %c0_89] : memref<64x128xf32, #tpu.memory_space<vmem>>, vector<64x128xf32>
    tpu.vector_store %arg3[%c0_88, %c0_89], %88 {strides = array<i32>} : memref<64x128xf32, #tpu.memory_space<vmem>>, vector<64x128xf32>,
    %c0_90 = arith.constant 0 : index
    %c2_91 = arith.constant 2 : index
    %c2_92 = arith.constant 2 : index
    %c0_93 = arith.constant 0 : index
    %90 = vector.load %arg1[%c0_90, %c2_91, %c2_92, %c0_93] : memref<1x10x10x128xbf16, #tpu.memory_space<vmem>>, vector<1x8x8x128xbf16>
    %91 = vector.shape_cast %90 : vector<1x8x8x128xbf16> to vector<8x8x128xbf16>
    %92 = arith.extf %91 : vector<8x8x128xbf16> to vector<8x8x128xf32>
    %93 = vector.shape_cast %92 : vector<8x8x128xf32> to vector<64x128xf32>
    %94 = arith.truncf %93 : vector<64x128xf32> to vector<64x128xbf16>
    %c0_94 = arith.constant 0 : index
    %c0_95 = arith.constant 0 : index
    %95 = vector.load %arg3[%c0_94, %c0_95] : memref<64x128xf32, #tpu.memory_space<vmem>>, vector<64x128xf32>
    %c8 = arith.constant 8 : index
    %c0_96 = arith.constant 0 : index
    %c0_97 = arith.constant 0 : index
    %96 = vector.load %arg2[%c8, %c0_96, %c0_97] : memref<9x128x128xbf16, #tpu.memory_space<vmem>>, vector<1x128x128xbf16>
    %97 = vector.shape_cast %96 : vector<1x128x128xbf16> to vector<128x128xbf16>
    %cst_98 = arith.constant dense<0.000000e+00> : vector<64x128xf32>
    %98 = tpu.matmul %94, %97, %cst_98 {dimension_numbers = #tpu.dot_dimension_numbers<[1], [0], [0], [1], [0, 0, 1, 1], [], []>} : vector<64x128xbf16>, vector<128x128xbf16>, vector<64x128xf32> -> vector<64x128xf32>
    %99 = arith.addf %95, %98 : vector<64x128xf32>
    %c0_99 = arith.constant 0 : index
    %c0_100 = arith.constant 0 : index
    %100 = vector.load %arg3[%c0_99, %c0_100] : memref<64x128xf32, #tpu.memory_space<vmem>>, vector<64x128xf32>
    tpu.vector_store %arg3[%c0_99, %c0_100], %99 {strides = array<i32>} : memref<64x128xf32, #tpu.memory_space<vmem>>, vector<64x128xf32>,
    %c0_101 = arith.constant 0 : index
    %c0_102 = arith.constant 0 : index
    %101 = vector.load %arg3[%c0_101, %c0_102] : memref<64x128xf32, #tpu.memory_space<vmem>>, vector<64x128xf32>
    %cst_103 = arith.constant dense<0.000000e+00> : vector<128xf32>
    %102 = vector.multi_reduction <add>, %101, %cst_103 [0] : vector<64x128xf32> to vector<128xf32>
    %103 = vector.shape_cast %102 : vector<128xf32> to vector<1x128xf32>
    %c0_104 = arith.constant 0 : index
    %c0_105 = arith.constant 0 : index
    %c0_106 = arith.constant 0 : index
    %104 = vector.load %arg4[%c0_104, %c0_105, %c0_106] : memref<1x2x128xf32, #tpu.memory_space<vmem>>, vector<1x1x128xf32>
    %105 = vector.shape_cast %104 : vector<1x1x128xf32> to vector<1x128xf32>
    %106 = vector.shape_cast %103 : vector<1x128xf32> to vector<1x1x128xf32>
    tpu.vector_store %arg4[%c0_104, %c0_105, %c0_106], %106 {strides = array<i32>} : memref<1x2x128xf32, #tpu.memory_space<vmem>>, vector<1x1x128xf32>,
    %107 = arith.mulf %101, %101 : vector<64x128xf32>
    %cst_107 = arith.constant dense<0.000000e+00> : vector<128xf32>
    %108 = vector.multi_reduction <add>, %107, %cst_107 [0] : vector<64x128xf32> to vector<128xf32>
    %109 = vector.shape_cast %108 : vector<128xf32> to vector<1x128xf32>
    %c0_108 = arith.constant 0 : index
    %c1_109 = arith.constant 1 : index
    %c0_110 = arith.constant 0 : index
    %110 = vector.load %arg4[%c0_108, %c1_109, %c0_110] : memref<1x2x128xf32, #tpu.memory_space<vmem>>, vector<1x1x128xf32>
    %111 = vector.shape_cast %110 : vector<1x1x128xf32> to vector<1x128xf32>
    %112 = vector.shape_cast %109 : vector<1x128xf32> to vector<1x1x128xf32>
    tpu.vector_store %arg4[%c0_108, %c1_109, %c0_110], %112 {strides = array<i32>} : memref<1x2x128xf32, #tpu.memory_space<vmem>>, vector<1x1x128xf32>,
    return
  }
  func.func @transform_0(%arg0: i32) -> (i32, i32, i32, i32) {
    %c0_i32 = arith.constant 0 : i32
    %c0_i32_0 = arith.constant 0 : i32
    %c0_i32_1 = arith.constant 0 : i32
    %c0_i32_2 = arith.constant 0 : i32
    return %arg0, %c0_i32, %c0_i32_0, %c0_i32_1 : i32, i32, i32, i32
  }
  func.func @transform_1(%arg0: i32) -> (i32, i32, i32) {
    %c0_i32 = arith.constant 0 : i32
    %c0_i32_0 = arith.constant 0 : i32
    %c0_i32_1 = arith.constant 0 : i32
    %c0_i32_2 = arith.constant 0 : i32
    return %c0_i32, %c0_i32_0, %c0_i32_1 : i32, i32, i32
  }
  func.func @transform_2(%arg0: i32) -> (i32, i32) {
    %c0_i32 = arith.constant 0 : i32
    %c0_i32_0 = arith.constant 0 : i32
    return %arg0, %c0_i32 : i32, i32
  }
  func.func @transform_3(%arg0: i32) -> (i32, i32, i32) {
    %c0_i32 = arith.constant 0 : i32
    %c0_i32_0 = arith.constant 0 : i32
    %c0_i32_1 = arith.constant 0 : i32
    return %arg0, %c0_i32, %c0_i32_0 : i32, i32, i32
  }
}

module attributes {stable_mosaic.version = 11 : i64} {
  func.func @_bn_add_relu_kernel(%arg0: i32, %arg1: memref<128x128xf32, #tpu.memory_space<vmem>>, %arg2: memref<1x128xf32, #tpu.memory_space<vmem>>, %arg3: memref<1x128xf32, #tpu.memory_space<vmem>>, %arg4: memref<128x128xf32, #tpu.memory_space<vmem>>, %arg5: memref<1x128xf32, #tpu.memory_space<vmem>>, %arg6: memref<1x128xf32, #tpu.memory_space<vmem>>, %arg7: memref<128x128xf32, #tpu.memory_space<vmem>>) attributes {dimension_semantics = [#tpu.dimension_semantics<parallel>], iteration_bounds = array<i64: 1>, scalar_prefetch = 0 : i64, scratch_operands = 0 : i64, tpu.core_type = #tpu.core_type<tc>, window_params = [{transform_indices = @transform_0, window_bounds = array<i64: 128, 128>}, {pipeline_mode = #tpu.pipeline_mode<synchronous>, transform_indices = @transform_1, window_bounds = array<i64: 1, 128>}, {pipeline_mode = #tpu.pipeline_mode<synchronous>, transform_indices = @transform_2, window_bounds = array<i64: 1, 128>}, {transform_indices = @transform_3, window_bounds = array<i64: 128, 128>}, {pipeline_mode = #tpu.pipeline_mode<synchronous>, transform_indices = @transform_4, window_bounds = array<i64: 1, 128>}, {pipeline_mode = #tpu.pipeline_mode<synchronous>, transform_indices = @transform_5, window_bounds = array<i64: 1, 128>}, {transform_indices = @transform_6, window_bounds = array<i64: 128, 128>}]} {
    %c0 = arith.constant 0 : index
    %c0_0 = arith.constant 0 : index
    %0 = vector.load %arg1[%c0, %c0_0] : memref<128x128xf32, #tpu.memory_space<vmem>>, vector<128x128xf32>
    %c0_1 = arith.constant 0 : index
    %c0_2 = arith.constant 0 : index
    %1 = vector.load %arg2[%c0_1, %c0_2] : memref<1x128xf32, #tpu.memory_space<vmem>>, vector<1x128xf32>
    %2 = vector.broadcast %1 : vector<1x128xf32> to vector<128x128xf32>
    %3 = arith.mulf %0, %2 : vector<128x128xf32>
    %c0_3 = arith.constant 0 : index
    %c0_4 = arith.constant 0 : index
    %4 = vector.load %arg3[%c0_3, %c0_4] : memref<1x128xf32, #tpu.memory_space<vmem>>, vector<1x128xf32>
    %5 = vector.broadcast %4 : vector<1x128xf32> to vector<128x128xf32>
    %6 = arith.addf %3, %5 : vector<128x128xf32>
    %c0_5 = arith.constant 0 : index
    %c0_6 = arith.constant 0 : index
    %7 = vector.load %arg4[%c0_5, %c0_6] : memref<128x128xf32, #tpu.memory_space<vmem>>, vector<128x128xf32>
    %c0_7 = arith.constant 0 : index
    %c0_8 = arith.constant 0 : index
    %8 = vector.load %arg5[%c0_7, %c0_8] : memref<1x128xf32, #tpu.memory_space<vmem>>, vector<1x128xf32>
    %9 = vector.broadcast %8 : vector<1x128xf32> to vector<128x128xf32>
    %10 = arith.mulf %7, %9 : vector<128x128xf32>
    %11 = arith.addf %6, %10 : vector<128x128xf32>
    %c0_9 = arith.constant 0 : index
    %c0_10 = arith.constant 0 : index
    %12 = vector.load %arg6[%c0_9, %c0_10] : memref<1x128xf32, #tpu.memory_space<vmem>>, vector<1x128xf32>
    %13 = vector.broadcast %12 : vector<1x128xf32> to vector<128x128xf32>
    %14 = arith.addf %11, %13 : vector<128x128xf32>
    %cst = arith.constant 0.000000e+00 : f32
    %15 = vector.broadcast %cst : f32 to vector<128x128xf32>
    %16 = arith.maximumf %14, %15 : vector<128x128xf32>
    %c0_11 = arith.constant 0 : index
    %c0_12 = arith.constant 0 : index
    %17 = vector.load %arg7[%c0_11, %c0_12] : memref<128x128xf32, #tpu.memory_space<vmem>>, vector<128x128xf32>
    tpu.vector_store %arg7[%c0_11, %c0_12], %16 {strides = array<i32>} : memref<128x128xf32, #tpu.memory_space<vmem>>, vector<128x128xf32>,
    return
  }
  func.func @transform_0(%arg0: i32) -> (i32, i32) {
    %c0_i32 = arith.constant 0 : i32
    %c0_i32_0 = arith.constant 0 : i32
    return %arg0, %c0_i32 : i32, i32
  }
  func.func @transform_1(%arg0: i32) -> (i32, i32) {
    %c0_i32 = arith.constant 0 : i32
    %c0_i32_0 = arith.constant 0 : i32
    %c0_i32_1 = arith.constant 0 : i32
    return %c0_i32, %c0_i32_0 : i32, i32
  }
  func.func @transform_2(%arg0: i32) -> (i32, i32) {
    %c0_i32 = arith.constant 0 : i32
    %c0_i32_0 = arith.constant 0 : i32
    %c0_i32_1 = arith.constant 0 : i32
    return %c0_i32, %c0_i32_0 : i32, i32
  }
  func.func @transform_3(%arg0: i32) -> (i32, i32) {
    %c0_i32 = arith.constant 0 : i32
    %c0_i32_0 = arith.constant 0 : i32
    return %arg0, %c0_i32 : i32, i32
  }
  func.func @transform_4(%arg0: i32) -> (i32, i32) {
    %c0_i32 = arith.constant 0 : i32
    %c0_i32_0 = arith.constant 0 : i32
    %c0_i32_1 = arith.constant 0 : i32
    return %c0_i32, %c0_i32_0 : i32, i32
  }
  func.func @transform_5(%arg0: i32) -> (i32, i32) {
    %c0_i32 = arith.constant 0 : i32
    %c0_i32_0 = arith.constant 0 : i32
    %c0_i32_1 = arith.constant 0 : i32
    return %c0_i32, %c0_i32_0 : i32, i32
  }
  func.func @transform_6(%arg0: i32) -> (i32, i32) {
    %c0_i32 = arith.constant 0 : i32
    %c0_i32_0 = arith.constant 0 : i32
    return %arg0, %c0_i32 : i32, i32
  }
}

</mosaic_0001>

<bundles_post_ra>
// kernel: residual_block_forward.5
= control target key start
LH: loop header
LB: loop body
LE: loop exit
PB: predicated region body
PF: predicated region fallthrough
CT: control target
= control target key end

     0   :  { %s287_s0 = inlined_call_operand.vmem [shape: f32[128,128], index: 0, kind: input, shape index: {}]   ;;  %s288_s1 = inlined_call_operand.vmem [shape: f32[1,128], index: 1, kind: input, shape index: {}]   ;;  %s289_s2 = inlined_call_operand.vmem [shape: f32[1,128], index: 2, kind: input, shape index: {}]   ;;  %s290_s3 = inlined_call_operand.vmem [shape: bf16[128,128], index: 3, kind: output, shape index: {}]  }
   0x1   :  { %v14_v0 = vld [vmem:[%s287_s0] sm:$0xff]  ;;  %v15_v1 = vld [vmem:[%s287_s0 + $0x8] sm:$0xff]  ;;  %v16_v4 = vld [vmem:[%s287_s0 + $0x10] sm:$0xff] }
   0x2   :  { %v169_v2 = vld [vmem:[%s288_s1] ss:$0 sm:$0xff]  ;;  %v17_v5 = vld [vmem:[%s287_s0 + $0x18] sm:$0xff]  ;;  %v19_v11 = vld [vmem:[%s287_s0 + $0x28] sm:$0xff] }
   0x3   :  { %v203_v3 = vld [vmem:[%s289_s2] ss:$0 sm:$0xff]  ;;  %v34_v7 = vmul.f32 %v169_v2, %v14_v0  ;;  %v35_v8 = vmul.f32 %v169_v2, %v15_v1  ;;  %v36_v9 = vmul.f32 %v169_v2, %v16_v4  ;;  %v37_v10 = vmul.f32 %v169_v2, %v17_v5  ;;  %v20_v12 = vld [vmem:[%s287_s0 + $0x30] sm:$0xff]  ;;  %v21_v13 = vld [vmem:[%s287_s0 + $0x38] sm:$0xff] }
   0x4   :  { %v18_v6 = vld [vmem:[%s287_s0 + $0x20] sm:$0xff]  ;;  %v39_v15 = vmul.f32 %v169_v2, %v19_v11  ;;  %v40_v16 = vmul.f32 %v169_v2, %v20_v12  ;;  %v41_v17 = vmul.f32 %v169_v2, %v21_v13  ;;  %v23_v27 = vld [vmem:[%s287_s0 + $0x48] sm:$0xff]  ;;  %v24_v32 = vld [vmem:[%s287_s0 + $0x50] sm:$0xff] }
   0x5   :  { %v38_v14 = vmul.f32 %v169_v2, %v18_v6  ;;  %v54_v18 = vadd.f32 %v203_v3, %v34_v7  ;;  %v55_v19 = vadd.f32 %v203_v3, %v35_v8  ;;  %v56_v20 = vadd.f32 %v203_v3, %v36_v9  ;;  %v22_v26 = vld [vmem:[%s287_s0 + $0x40] sm:$0xff]  ;;  %v25_v33 = vld [vmem:[%s287_s0 + $0x58] sm:$0xff]  ;;  %v27_v39 = vld [vmem:[%s287_s0 + $0x68] sm:$0xff] }
   0x6   :  { %v57_v21 = vadd.f32 %v203_v3, %v37_v10  ;;  %v59_v23 = vadd.f32 %v203_v3, %v39_v15  ;;  %v60_v24 = vadd.f32 %v203_v3, %v40_v16  ;;  %v61_v25 = vadd.f32 %v203_v3, %v41_v17  ;;  %v26_v38 = vld [vmem:[%s287_s0 + $0x60] sm:$0xff]  ;;  %v28_v44 = vld [vmem:[%s287_s0 + $0x70] sm:$0xff]  ;;  %v29_v45 = vld [vmem:[%s287_s0 + $0x78] sm:$0xff] }
   0x7   :  { %v58_v22 = vadd.f32 %v203_v3, %v38_v14  ;;  %v70_v28 = vmax.f32 %v54_v18, 0.0  ;;  %v71_v29 = vmax.f32 %v55_v19, 0.0  ;;  %v72_v30 = vmax.f32 %v56_v20, 0.0 }
   0x8   :  { %v73_v31 = vmax.f32 %v57_v21, 0.0  ;;  %v75_v35 = vmax.f32 %v59_v23, 0.0  ;;  %v76_v36 = vmax.f32 %v60_v24, 0.0  ;;  %v77_v37 = vmax.f32 %v61_v25, 0.0 }
   0x9   :  { %v74_v34 = vmax.f32 %v58_v22, 0.0  ;;  %v125_v40 = vpack.c.bf16 %v71_v29, %v70_v28  ;;  %v42_v42 = vmul.f32 %v169_v2, %v22_v26  ;;  %v43_v43 = vmul.f32 %v169_v2, %v23_v27 }
   0xa   :  { %v130_v41 = vpack.c.bf16 %v73_v31, %v72_v30  ;;  %v140_v47 = vpack.c.bf16 %v77_v37, %v76_v36  ;;  %v44_v48 = vmul.f32 %v169_v2, %v24_v32  ;;  %v45_v49 = vmul.f32 %v169_v2, %v25_v33 }
   0xb   :  { %v135_v46 = vpack.c.bf16 %v75_v35, %v74_v34  ;;  %126 = vst [vmem:[%s290_s3] sm:$0xff] %v125_v40   ;;  %v62_v50 = vadd.f32 %v203_v3, %v42_v42  ;;  %v63_v51 = vadd.f32 %v203_v3, %v43_v43  ;;  %v46_v52 = vmul.f32 %v169_v2, %v26_v38 }
   0xc   :  { %v47_v53 = vmul.f32 %v169_v2, %v27_v39  ;;  %162 = vst [vmem:[%s290_s3 + $0x8] sm:$0xff] %v130_v41   ;;  %v64_v54 = vadd.f32 %v203_v3, %v44_v48  ;;  %v65_v55 = vadd.f32 %v203_v3, %v45_v49  ;;  %v48_v56 = vmul.f32 %v169_v2, %v28_v44 }
   0xd   :  { %v49_v57 = vmul.f32 %v169_v2, %v29_v45  ;;  %163 = vst [vmem:[%s290_s3 + $0x10] sm:$0xff] %v135_v46   ;;  %v78_v58 = vmax.f32 %v62_v50, 0.0  ;;  %v79_v59 = vmax.f32 %v63_v51, 0.0  ;;  %v66_v60 = vadd.f32 %v203_v3, %v46_v52 }
   0xe   :  { %v67_v61 = vadd.f32 %v203_v3, %v47_v53  ;;  %164 = vst [vmem:[%s290_s3 + $0x18] sm:$0xff] %v140_v47   ;;  %v80_v62 = vmax.f32 %v64_v54, 0.0  ;;  %v81_v63 = vmax.f32 %v65_v55, 0.0  ;;  %v68_v0 = vadd.f32 %v203_v3, %v48_v56 }
   0xf   :  { %v69_v1 = vadd.f32 %v203_v3, %v49_v57  ;;  %v145_v2 = vpack.c.bf16 %v79_v59, %v78_v58  ;;  %v82_v4 = vmax.f32 %v66_v60, 0.0 }
  0x10   :  { %v83_v5 = vmax.f32 %v67_v61, 0.0  ;;  %v150_v6 = vpack.c.bf16 %v81_v63, %v80_v62  ;;  %v84_v7 = vmax.f32 %v68_v0, 0.0 }
  0x11   :  { %v85_v8 = vmax.f32 %v69_v1, 0.0  ;;  %165 = vst [vmem:[%s290_s3 + $0x20] sm:$0xff] %v145_v2  }
  0x12   :  { %v155_v9 = vpack.c.bf16 %v83_v5, %v82_v4  ;;  %166 = vst [vmem:[%s290_s3 + $0x28] sm:$0xff] %v150_v6  }
  0x13   :  { %v160_v10 = vpack.c.bf16 %v85_v8, %v84_v7 }
  0x14   :  { %167 = vst [vmem:[%s290_s3 + $0x30] sm:$0xff] %v155_v9  }
  0x15   :  { %168 = vst [vmem:[%s290_s3 + $0x38] sm:$0xff] %v160_v10  }

// kernel: residual_block_forward.7
= control target key start
LH: loop header
LB: loop body
LE: loop exit
PB: predicated region body
PF: predicated region fallthrough
CT: control target
= control target key end

     0   :  { %s454_s0 = inlined_call_operand.vmem [shape: f32[128,128], index: 0, kind: input, shape index: {}]   ;;  %s455_s1 = inlined_call_operand.vmem [shape: f32[1,128], index: 1, kind: input, shape index: {}]   ;;  %s456_s2 = inlined_call_operand.vmem [shape: f32[1,128], index: 2, kind: input, shape index: {}]   ;;  %s457_s3 = inlined_call_operand.vmem [shape: f32[128,128], index: 3, kind: input, shape index: {}]   ;;  %s458_s4 = inlined_call_operand.vmem [shape: f32[1,128], index: 4, kind: input, shape index: {}]   ;;  %s459_s5 = inlined_call_operand.vmem [shape: f32[1,128], index: 5, kind: input, shape index: {}]   ;;  %s460_s6 = inlined_call_operand.vmem [shape: f32[128,128], index: 6, kind: output, shape index: {}]  }
   0x1   :  { %v23_v0 = vld [vmem:[%s454_s0] sm:$0xff]  ;;  %v24_v7 = vld [vmem:[%s454_s0 + $0x8] sm:$0xff]  ;;  %v25_v13 = vld [vmem:[%s454_s0 + $0x10] sm:$0xff] }
   0x2   :  { %v232_v1 = vld [vmem:[%s455_s1] ss:$0 sm:$0xff]  ;;  %v80_v8 = vld [vmem:[%s457_s3 + $0x8] sm:$0xff]  ;;  %v81_v14 = vld [vmem:[%s457_s3 + $0x10] sm:$0xff] }
   0x3   :  { %v237_v2 = vld [vmem:[%s456_s2] ss:$0 sm:$0xff]  ;;  %v43_v4 = vmul.f32 %v232_v1, %v23_v0  ;;  %v44_v11 = vmul.f32 %v232_v1, %v24_v7  ;;  %v26_v15 = vld [vmem:[%s454_s0 + $0x18] sm:$0xff]  ;;  %v45_v16 = vmul.f32 %v232_v1, %v25_v13  ;;  %v28_v26 = vld [vmem:[%s454_s0 + $0x28] sm:$0xff] }
   0x4   :  { %v79_v3 = vld [vmem:[%s457_s3] sm:$0xff]  ;;  %v46_v18 = vmul.f32 %v232_v1, %v26_v15  ;;  %v82_v19 = vld [vmem:[%s457_s3 + $0x18] sm:$0xff]  ;;  %v84_v27 = vld [vmem:[%s457_s3 + $0x28] sm:$0xff]  ;;  %v48_v32 = vmul.f32 %v232_v1, %v28_v26 }
   0x5   :  { %v246_v5 = vld [vmem:[%s458_s4] ss:$0 sm:$0xff]  ;;  %v63_v9 = vadd.f32 %v237_v2, %v43_v4  ;;  %v64_v23 = vadd.f32 %v237_v2, %v44_v11  ;;  %v29_v28 = vld [vmem:[%s454_s0 + $0x30] sm:$0xff]  ;;  %v65_v29 = vadd.f32 %v237_v2, %v45_v16  ;;  %v30_v42 = vld [vmem:[%s454_s0 + $0x38] sm:$0xff] }
   0x6   :  { %v251_v6 = vld [vmem:[%s459_s5] ss:$0 sm:$0xff]  ;;  %v99_v10 = vmul.f32 %v246_v5, %v79_v3  ;;  %v100_v12 = vmul.f32 %v246_v5, %v80_v8  ;;  %v101_v17 = vmul.f32 %v246_v5, %v81_v14  ;;  %v102_v24 = vmul.f32 %v246_v5, %v82_v19  ;;  %v85_v33 = vld [vmem:[%s457_s3 + $0x30] sm:$0xff]  ;;  %v86_v43 = vld [vmem:[%s457_s3 + $0x38] sm:$0xff] }
   0x7   :  { %v27_v20 = vld [vmem:[%s454_s0 + $0x20] sm:$0xff]  ;;  %v66_v30 = vadd.f32 %v237_v2, %v46_v18  ;;  %v104_v37 = vmul.f32 %v246_v5, %v84_v27  ;;  %v68_v40 = vadd.f32 %v237_v2, %v48_v32  ;;  %v49_v41 = vmul.f32 %v232_v1, %v29_v28  ;;  %v32_v58 = vld [vmem:[%s454_s0 + $0x48] sm:$0xff]  ;;  %v33_v0 = vld [vmem:[%s454_s0 + $0x50] sm:$0xff] }
   0x8   :  { %v83_v21 = vld [vmem:[%s457_s3 + $0x20] sm:$0xff]  ;;  %v115_v22 = vadd.f32 %v99_v10, %v63_v9  ;;  %v47_v25 = vmul.f32 %v232_v1, %v27_v20  ;;  %v116_v35 = vadd.f32 %v100_v12, %v64_v23  ;;  %v117_v38 = vadd.f32 %v101_v17, %v65_v29  ;;  %v88_v59 = vld [vmem:[%s457_s3 + $0x48] sm:$0xff]  ;;  %v89_v3 = vld [vmem:[%s457_s3 + $0x50] sm:$0xff] }
   0x9   :  { %v103_v31 = vmul.f32 %v246_v5, %v83_v21  ;;  %v118_v39 = vadd.f32 %v102_v24, %v66_v30  ;;  %v105_v47 = vmul.f32 %v246_v5, %v85_v33  ;;  %v120_v50 = vadd.f32 %v104_v37, %v68_v40  ;;  %v31_v52 = vld [vmem:[%s454_s0 + $0x40] sm:$0xff]  ;;  %v34_v10 = vld [vmem:[%s454_s0 + $0x58] sm:$0xff] }
   0xa   :  { %v135_v34 = vadd.f32 %v251_v6, %v115_v22  ;;  %v67_v36 = vadd.f32 %v237_v2, %v47_v25  ;;  %v136_v45 = vadd.f32 %v251_v6, %v116_v35  ;;  %v137_v48 = vadd.f32 %v251_v6, %v117_v38  ;;  %v87_v53 = vld [vmem:[%s457_s3 + $0x40] sm:$0xff]  ;;  %v90_v11 = vld [vmem:[%s457_s3 + $0x58] sm:$0xff]  ;;  %v36_v22 = vld [vmem:[%s454_s0 + $0x68] sm:$0xff] }
   0xb   :  { %v138_v49 = vadd.f32 %v251_v6, %v118_v39  ;;  %v69_v51 = vadd.f32 %v237_v2, %v49_v41  ;;  %v50_v56 = vmul.f32 %v232_v1, %v30_v42  ;;  %v106_v57 = vmul.f32 %v246_v5, %v86_v43  ;;  %v35_v16 = vld [vmem:[%s454_s0 + $0x60] sm:$0xff]  ;;  %v93_v41 = vld [vmem:[%s457_s3 + $0x70] sm:$0xff] }
   0xc   :  { %v151_v44 = vmax.f32 %v135_v34, 0.0  ;;  %v119_v46 = vadd.f32 %v103_v31, %v67_v36  ;;  %v152_v54 = vmax.f32 %v136_v45, 0.0  ;;  %v153_v60 = vmax.f32 %v137_v48, 0.0  ;;  %v91_v21 = vld [vmem:[%s457_s3 + $0x60] sm:$0xff]  ;;  %v92_v31 = vld [vmem:[%s457_s3 + $0x68] sm:$0xff]  ;;  %v37_v36 = vld [vmem:[%s454_s0 + $0x70] sm:$0xff] }
   0xd   :  { %v154_v61 = vmax.f32 %v138_v49, 0.0  ;;  %v140_v62 = vadd.f32 %v251_v6, %v120_v50  ;;  %v121_v63 = vadd.f32 %v105_v47, %v69_v51  ;;  %v70_v7 = vadd.f32 %v237_v2, %v50_v56  ;;  %v94_v51 = vld [vmem:[%s457_s3 + $0x78] sm:$0xff] }
   0xe   :  { %167 = vst [vmem:[%s460_s6] sm:$0xff] %v151_v44  ;;  %v139_v55 = vadd.f32 %v251_v6, %v119_v46  ;;  %v51_v8 = vmul.f32 %v232_v1, %v31_v52  ;;  %v107_v9 = vmul.f32 %v246_v5, %v87_v53  ;;  %v52_v14 = vmul.f32 %v232_v1, %v32_v58  ;;  %v38_v46 = vld [vmem:[%s454_s0 + $0x78] sm:$0xff] }
   0xf   :  { %168 = vst [vmem:[%s460_s6 + $0x8] sm:$0xff] %v152_v54  ;;  %v156_v12 = vmax.f32 %v140_v62, 0.0  ;;  %v141_v13 = vadd.f32 %v251_v6, %v121_v63  ;;  %v108_v15 = vmul.f32 %v246_v5, %v88_v59  ;;  %v122_v17 = vadd.f32 %v106_v57, %v70_v7 }
  0x10   :  { %v155_v4 = vmax.f32 %v139_v55, 0.0  ;;  %169 = vst [vmem:[%s460_s6 + $0x10] sm:$0xff] %v153_v60  ;;  %v71_v18 = vadd.f32 %v237_v2, %v51_v8  ;;  %v53_v19 = vmul.f32 %v232_v1, %v33_v0  ;;  %v109_v20 = vmul.f32 %v246_v5, %v89_v3 }
  0x11   :  { %170 = vst [vmem:[%s460_s6 + $0x18] sm:$0xff] %v154_v61  ;;  %v157_v23 = vmax.f32 %v141_v13, 0.0  ;;  %v72_v24 = vadd.f32 %v237_v2, %v52_v14  ;;  %v54_v25 = vmul.f32 %v232_v1, %v34_v10  ;;  %v110_v26 = vmul.f32 %v246_v5, %v90_v11 }
  0x12   :  { %171 = vst [vmem:[%s460_s6 + $0x20] sm:$0xff] %v155_v4  ;;  %v142_v27 = vadd.f32 %v251_v6, %v122_v17  ;;  %v123_v28 = vadd.f32 %v107_v9, %v71_v18  ;;  %v73_v29 = vadd.f32 %v237_v2, %v53_v19  ;;  %v55_v30 = vmul.f32 %v232_v1, %v35_v16 }
  0x13   :  { %172 = vst [vmem:[%s460_s6 + $0x28] sm:$0xff] %v156_v12  ;;  %v124_v32 = vadd.f32 %v108_v15, %v72_v24  ;;  %v74_v33 = vadd.f32 %v237_v2, %v54_v25  ;;  %v111_v34 = vmul.f32 %v246_v5, %v91_v21  ;;  %v56_v35 = vmul.f32 %v232_v1, %v36_v22 }
  0x14   :  { %173 = vst [vmem:[%s460_s6 + $0x30] sm:$0xff] %v157_v23  ;;  %v158_v37 = vmax.f32 %v142_v27, 0.0  ;;  %v143_v38 = vadd.f32 %v251_v6, %v123_v28  ;;  %v125_v39 = vadd.f32 %v109_v20, %v73_v29  ;;  %v75_v40 = vadd.f32 %v237_v2, %v55_v30 }
  0x15   :  { %v144_v42 = vadd.f32 %v251_v6, %v124_v32  ;;  %v126_v43 = vadd.f32 %v110_v26, %v74_v33  ;;  %v76_v44 = vadd.f32 %v237_v2, %v56_v35  ;;  %v112_v45 = vmul.f32 %v246_v5, %v92_v31 }
  0x16   :  { %174 = vst [vmem:[%s460_s6 + $0x38] sm:$0xff] %v158_v37  ;;  %v159_v47 = vmax.f32 %v143_v38, 0.0  ;;  %v145_v48 = vadd.f32 %v251_v6, %v125_v39  ;;  %v127_v49 = vadd.f32 %v111_v34, %v75_v40  ;;  %v57_v50 = vmul.f32 %v232_v1, %v37_v36 }
  0x17   :  { %v160_v52 = vmax.f32 %v144_v42, 0.0  ;;  %v146_v53 = vadd.f32 %v251_v6, %v126_v43  ;;  %v128_v54 = vadd.f32 %v112_v45, %v76_v44  ;;  %v113_v55 = vmul.f32 %v246_v5, %v93_v41 }
  0x18   :  { %175 = vst [vmem:[%s460_s6 + $0x40] sm:$0xff] %v159_v47  ;;  %v161_v56 = vmax.f32 %v145_v48, 0.0  ;;  %v147_v57 = vadd.f32 %v251_v6, %v127_v49  ;;  %v77_v58 = vadd.f32 %v237_v2, %v57_v50  ;;  %v58_v59 = vmul.f32 %v232_v1, %v38_v46 }
  0x19   :  { %176 = vst [vmem:[%s460_s6 + $0x48] sm:$0xff] %v160_v52  ;;  %v162_v60 = vmax.f32 %v146_v53, 0.0  ;;  %v148_v61 = vadd.f32 %v251_v6, %v128_v54  ;;  %v114_v62 = vmul.f32 %v246_v5, %v94_v51 }
  0x1a   :  { %177 = vst [vmem:[%s460_s6 + $0x50] sm:$0xff] %v161_v56  ;;  %v163_v63 = vmax.f32 %v147_v57, 0.0  ;;  %v129_v0 = vadd.f32 %v113_v55, %v77_v58  ;;  %v78_v3 = vadd.f32 %v237_v2, %v58_v59 }
  0x1b   :  { %178 = vst [vmem:[%s460_s6 + $0x58] sm:$0xff] %v162_v60  ;;  %v164_v1 = vmax.f32 %v148_v61, 0.0 }
  0x1c   :  { %179 = vst [vmem:[%s460_s6 + $0x60] sm:$0xff] %v163_v63  ;;  %v149_v4 = vadd.f32 %v251_v6, %v129_v0  ;;  %v130_v5 = vadd.f32 %v114_v62, %v78_v3 }
  0x1d   :  { %180 = vst [vmem:[%s460_s6 + $0x68] sm:$0xff] %v164_v1 }
  0x1e   :  { %v165_v7 = vmax.f32 %v149_v4, 0.0  ;;  %v150_v8 = vadd.f32 %v251_v6, %v130_v5 }
  0x20   :  { %181 = vst [vmem:[%s460_s6 + $0x70] sm:$0xff] %v165_v7  ;;  %v166_v2 = vmax.f32 %v150_v8, 0.0 }
  0x22   :  { %182 = vst [vmem:[%s460_s6 + $0x78] sm:$0xff] %v166_v2 }

// kernel: residual_block_forward.4
= control target key start
LH: loop header
LB: loop body
LE: loop exit
PB: predicated region body
PF: predicated region fallthrough
CT: control target
= control target key end

     0   :  { %s1953_s21 = smov 0   ;;  %s2254_s0 = inlined_call_operand.vmem [shape: bf16[8,9,9,4], index: 0, kind: input, shape index: {}]   ;;  %s2255_s1 = inlined_call_operand.vmem [shape: bf16[9,4,128], index: 1, kind: input, shape index: {}]   ;;  %s2256_s2 = inlined_call_operand.vmem [shape: bf16[4,128], index: 2, kind: input, shape index: {}]   ;;  %s2257_s3 = inlined_call_operand.vmem [shape: f32[128,128], index: 3, kind: output, shape index: {0}]   ;;  %s2258_s4 = inlined_call_operand.vmem [shape: f32[2,2,128], index: 4, kind: output, shape index: {1}]   ;;  %s2259_s5 = inlined_call_operand.vmem [shape: f32[128,128], index: 5, kind: output, shape index: {2}]   ;;  %s2260_s6 = inlined_call_operand.vmem [shape: f32[2,2,128], index: 6, kind: output, shape index: {3}]  }
   0x1 LB: > { %s1959_s22 = sadd.s32 4294967295, %s1916_s21   ;;  %p1619_p0 = scmp.ge.s32.totalorder %s1916_s21, 1  ;;  %s1916_s21 = sphi %s1953_s21, %s17_s21  }
   0x2   : > { %p221_p1 = scmp.lt.s32.totalorder %s1916_s21, 3 }
   0x4   : > { %p222_p2 = pnand %p1619_p0, %p221_p1 }
   0x5   : > { %s1620_s27 = sshll.u32 (!%p222_p2), %s1959_s22, 2  ;;  %s1622_s26 = sshll.u32 (!%p222_p2), %s1959_s22, 3 }
   0x6   : > { %225 = sbr.rel (%p222_p2) target bundleno = 327 (0x147), region = 32  ;;  %p266_p3 = scmp.lt.s32.totalorder (!%p222_p2), %s1620_s27, 7 }
   0x7   : > { %p273_p4 = scmp.lt.s32.totalorder (!%p222_p2), %s1622_s26, 15  ;;  %p278_p5 = scmp.lt.s32.totalorder (!%p222_p2), %s1959_s22, 1 }
   0xb   : > { %v329_v0 = vld [vmem:[%s2255_s1] sm:$0x3]  ;;  %vm343_vm0 = vcmask 1041408   ;;  %v1672_v1 = vld [vmem:[%s2255_s1 + $0x2] sm:$0x3]  ;;  %s2262_s27 = smov (!%p266_p3, %s1620_s27), 7 }
   0xc   : > { %v345_v2 = vsel %vm343_vm0, %v329_v0, 0  ;;  %v436_v3 = vsel %vm343_vm0, %v1672_v1, 0  ;;  %v1677_v4 = vld [vmem:[%s2255_s1 + $0x4] sm:$0x3]  ;;  %v1706_v6 = vld [vmem:[%s2255_s1 + $0x6] sm:$0x3] }
   0xd   : > { %1898 = vmatpush.bf16.msra.mxu2 %v345_v2  ;;  %445 = vmatpush.bf16.msra.mxu1 %v436_v3  ;;  %v591_v5 = vsel %vm343_vm0, %v1677_v4, 0  ;;  %v1735_v7 = vld [vmem:[%s2255_s1 + $0x8] sm:$0x3]  ;;  %v682_v8 = vsel %vm343_vm0, %v1706_v6, 0  ;;  %v1756_v10 = vld [vmem:[%s2255_s1 + $0xa] sm:$0x3] }
   0xe   : > { %1899 = vmatpush.bf16.msra.mxu3 %v436_v3  ;;  %v773_v9 = vsel %vm343_vm0, %v1735_v7, 0  ;;  %354 = vmatpush.bf16.msra.mxu0 %v345_v2  ;;  %v927_v11 = vsel %vm343_vm0, %v1756_v10, 0  ;;  %s1900_s12 = smul.u32 72, %s2262_s27  ;;  %vm330_vm1 = vcmask 31744   ;;  %v1785_v24 = vld [vmem:[%s2255_s1 + $0xc] sm:$0x3] }
   0xf   : > { %v1018_v25 = vsel %vm343_vm0, %v1785_v24, 0  ;;  %v1814_v27 = vld [vmem:[%s2255_s1 + $0xe] sm:$0x3]  ;;  %v1835_v53 = vld [vmem:[%s2255_s1 + $0x10] sm:$0x3]  ;;  %vm531_vm2 = vcmask 1046528  }
  0x10   : > { %s1991_s15 = scalar_lea.vmem %s2254_s0, %s1900_s12  ;;  %v1109_v30 = vsel %vm343_vm0, %v1814_v27, 0  ;;  %v1263_v57 = vsel %vm343_vm0, %v1835_v53, 0  ;;  %v1374_v27 = vld [vmem:[%s2256_s2] sm:$0x3]  ;;  %s2264_s26 = smov (!%p273_p4, %s1622_s26), 15 }
  0x11   : > { %600 = vmatpush.bf16.msrb.mxu2 %v591_v5  ;;  %936 = vmatpush.bf16.msrb.mxu1 %v927_v11  ;;  %v1638_v12 = vld [vmem:[%s1991_s15 + $0x20] sm:$0xf]  ;;  %v1872_v13 = vld [vmem:[%s1991_s15 + $0x24] sm:$0xf0]  ;;  %v1874_v16 = vld [vmem:[%s1991_s15 + $0x4c] sm:$0xf0] }
  0x12   : > { %691 = vmatpush.bf16.msrb.mxu3 %v682_v8  ;;  %782 = vmatpush.bf16.msrb.mxu0 %v773_v9  ;;  %v1658_v14 = vld [vmem:[%s1991_s15 + $0x48] sm:$0xf]  ;;  %v1639_v15 = vor.u32 %v1872_v13, %v1638_v12  ;;  %v1876_v18 = vld [vmem:[%s1991_s15 + $0x6c] sm:$0xf0]  ;;  %v1630_v21 = vld [vmem:[%s1991_s15] sm:$0xf] }
  0x13   : > { %v1666_v17 = vld [vmem:[%s1991_s15 + $0x68] sm:$0xf]  ;;  %v1659_v19 = vor.u32 %v1874_v16, %v1658_v14  ;;  %v1642_v26 = vld [vmem:[%s1991_s15 + $0x30] sm:$0xf]  ;;  %v1873_v28 = vld [vmem:[%s1991_s15 + $0x34] sm:$0xf0] }
  0x14   : > { %v1667_v20 = vor.u32 %v1876_v18, %v1666_v17  ;;  %1646 = vmatmul.msk.bf16.vlgmr.msra.gmra.mxu2 %vm330_vm1, %v1639_v15  ;;  %v1870_v22 = vld [vmem:[%s1991_s15 + $0x4] sm:$0xf0]  ;;  %v1662_v29 = vld [vmem:[%s1991_s15 + $0x58] sm:$0xf]  ;;  %v1875_v31 = vld [vmem:[%s1991_s15 + $0x5c] sm:$0xf0]  ;;  %v1643_v34 = vor.u32 %v1873_v28, %v1642_v26 }
  0x15   : > { %1673 = vmatmul.msk.bf16.vlgmr.msra.gmra.mxu1 %vm330_vm1, %v1659_v19  ;;  %v1631_v23 = vor.u32 %v1870_v22, %v1630_v21  ;;  %1027 = vmatpush.bf16.msra.mxu2 %v1018_v25  ;;  %v1670_v32 = vld [vmem:[%s1991_s15 + $0x78] sm:$0xf]  ;;  %v1877_v33 = vld [vmem:[%s1991_s15 + $0x7c] sm:$0xf0]  ;;  %v1634_v35 = vld [vmem:[%s1991_s15 + $0x10] sm:$0xf]  ;;  %v1663_v37 = vor.u32 %v1875_v31, %v1662_v29 }
  0x16   : > { %1675 = vmatmul.msk.bf16.vlgmr.msra.gmra.mxu3 %vm330_vm1, %v1667_v20  ;;  %v1871_v36 = vld [vmem:[%s1991_s15 + $0x14] sm:$0xf0]  ;;  %v1671_v38 = vor.u32 %v1877_v33, %v1670_v32  ;;  %v483_v39 = vld [vmem:[%s1991_s15] sm:$0xf]  ;;  %v484_v40 = vld [vmem:[%s1991_s15 + $0x4] sm:$0x1] }
  0x17   : > { %1644 = vmatmul.msk.bf16.vlgmr.msra.gmra.mxu0 %vm330_vm1, %v1631_v23  ;;  %1118 = vmatpush.bf16.msra.mxu3 %v1109_v30  ;;  %v485_v41 = vld [vmem:[%s1991_s15 + $0x8] sm:$0xf]  ;;  %v486_v42 = vld [vmem:[%s1991_s15 + $0xc] sm:$0x1]  ;;  %v1740_v43 = vld [vmem:[%s1991_s15 + $0x90] sm:$0xf]  ;;  %v1635_v47 = vor.u32 %v1871_v36, %v1634_v35  ;;  %v499_v48 = vunpack.c.l.bf16 %v483_v39  ;;  %v500_v49 = vunpack.c.l.bf16 %v484_v40 }
  0x18   : > { %v1741_v44 = vld [vmem:[%s1991_s15 + $0x94] sm:$0x1]  ;;  %v1742_v45 = vld [vmem:[%s1991_s15 + $0x98] sm:$0xf]  ;;  %v1743_v46 = vld [vmem:[%s1991_s15 + $0x9c] sm:$0x1]  ;;  %v501_v50 = vunpack.c.l.bf16 %v485_v41  ;;  %v502_v51 = vunpack.c.l.bf16 %v486_v42  ;;  %v836_v52 = vunpack.c.l.bf16 %v1740_v43  ;;  %1272 = vmatpush.bf16.msra.mxu0 %v1263_v57 }
  0x19   : > { %v837_v54 = vunpack.c.l.bf16 %v1741_v44  ;;  %v838_v55 = vunpack.c.l.bf16 %v1742_v45  ;;  %v839_v56 = vunpack.c.l.bf16 %v1743_v46  ;;  %v532_v58 = vrot.slane %v499_v48, 1  ;;  %v1692_v6 = vld [vmem:[%s1991_s15 + $0x90] sm:$0xf]  ;;  %v1878_v7 = vld [vmem:[%s1991_s15 + $0x94] sm:$0xf0]  ;;  %s1623_s27 = sshll.u32 %s2264_s26, 3 }
  0x1a   : > { %v533_v59 = vrot.slane %v500_v49, 1  ;;  %v535_v60 = vrot.slane %v501_v50, 1  ;;  %v536_v61 = vrot.slane %v502_v51, 1  ;;  %v868_v62 = vrot.slane %v836_v52, 1  ;;  %v1721_v9 = vld [vmem:[%s1991_s15 + $0xd8] sm:$0xf]  ;;  %s2201_s30 = scalar_lea.vmem %s2259_s5, %s1623_s27  ;;  %s2213_s9 = scalar_lea.vmem %s2257_s3, %s1623_s27 }
  0x1b   : > { %v869_v63 = vrot.slane %v837_v54, 1  ;;  %v871_v0 = vrot.slane %v838_v55, 1  ;;  %v872_v1 = vrot.slane %v839_v56, 1  ;;  %v1882_v10 = vld [vmem:[%s1991_s15 + $0xdc] sm:$0xf0]  ;;  %v1693_v12 = vor.u32 %v1878_v7, %v1692_v6  ;;  %s2266_s22 = smov (!%p278_p5, %s1959_s22), 1 }
  0x1c   : > { %v534_v2 = vsel %vm531_vm2, %v532_v58, %v533_v59  ;;  %v537_v3 = vsel %vm531_vm2, %v535_v60, %v536_v61  ;;  %v487_v13 = vld [vmem:[%s1991_s15 + $0x10] sm:$0xf]  ;;  %v488_v14 = vld [vmem:[%s1991_s15 + $0x14] sm:$0x1]  ;;  %v489_v15 = vld [vmem:[%s1991_s15 + $0x18] sm:$0xf]  ;;  %v1722_v21 = vor.u32 %v1882_v10, %v1721_v9 }
  0x1d   : > { %v870_v4 = vsel %vm531_vm2, %v868_v62, %v869_v63  ;;  %v873_v5 = vsel %vm531_vm2, %v871_v0, %v872_v1  ;;  %v564_v8 = vpack.c.bf16 %v537_v3, %v534_v2  ;;  %v490_v16 = vld [vmem:[%s1991_s15 + $0x1c] sm:$0x1]  ;;  %v1744_v17 = vld [vmem:[%s1991_s15 + $0xa0] sm:$0xf]  ;;  %v1745_v18 = vld [vmem:[%s1991_s15 + $0xa4] sm:$0x1]  ;;  %v503_v22 = vunpack.c.l.bf16 %v487_v13 }
  0x1e   : > { %v900_v11 = vpack.c.bf16 %v873_v5, %v870_v4  ;;  %v1746_v19 = vld [vmem:[%s1991_s15 + $0xa8] sm:$0xf]  ;;  %v1747_v20 = vld [vmem:[%s1991_s15 + $0xac] sm:$0x1]  ;;  %v504_v23 = vunpack.c.l.bf16 %v488_v14  ;;  %v505_v24 = vunpack.c.l.bf16 %v489_v15  ;;  %v506_v25 = vunpack.c.l.bf16 %v490_v16  ;;  %v1696_v44 = vld [vmem:[%s1991_s15 + $0xa0] sm:$0xf] }
  0x1f   : > { %v840_v26 = vunpack.c.l.bf16 %v1744_v17  ;;  %v841_v28 = vunpack.c.l.bf16 %v1745_v18  ;;  %v842_v29 = vunpack.c.l.bf16 %v1746_v19  ;;  %v843_v30 = vunpack.c.l.bf16 %v1747_v20  ;;  %v1879_v45 = vld [vmem:[%s1991_s15 + $0xa4] sm:$0xf0]  ;;  %v1883_v48 = vld [vmem:[%s1991_s15 + $0xec] sm:$0xf0]  ;;  %v491_v51 = vld [vmem:[%s1991_s15 + $0x20] sm:$0xf] }
  0x20   : > { %v1388_v31 = vsel %vm343_vm0, %v1374_v27, 0  ;;  %v538_v32 = vrot.slane %v503_v22, 1  ;;  %v539_v33 = vrot.slane %v504_v23, 1  ;;  %v542_v35 = vrot.slane %v506_v25, 1  ;;  %v492_v52 = vld [vmem:[%s1991_s15 + $0x24] sm:$0x1] }
  0x21   : > { %1397 = vmatpush.bf16.msra.mxu1 %v1388_v31  ;;  %v874_v36 = vrot.slane %v840_v26, 1  ;;  %v878_v39 = vrot.slane %v843_v30, 1  ;;  %v1697_v50 = vor.u32 %v1879_v45, %v1696_v44  ;;  %v493_v53 = vld [vmem:[%s1991_s15 + $0x28] sm:$0xf]  ;;  %v494_v54 = vld [vmem:[%s1991_s15 + $0x2c] sm:$0x1]  ;;  %v507_v60 = vunpack.c.l.bf16 %v491_v51 }
  0x22   : > { %v540_v40 = vsel %vm531_vm2, %v538_v32, %v539_v33  ;;  %v1748_v55 = vld [vmem:[%s1991_s15 + $0xb0] sm:$0xf]  ;;  %v1749_v56 = vld [vmem:[%s1991_s15 + $0xb4] sm:$0x1]  ;;  %v1750_v57 = vld [vmem:[%s1991_s15 + $0xb8] sm:$0xf]  ;;  %v508_v61 = vunpack.c.l.bf16 %v492_v52  ;;  %v509_v62 = vunpack.c.l.bf16 %v493_v53  ;;  %v510_v63 = vunpack.c.l.bf16 %v494_v54 }
  0x23   : > { %v1751_v58 = vld [vmem:[%s1991_s15 + $0xbc] sm:$0x1]  ;;  %v844_v0 = vunpack.c.l.bf16 %v1748_v55  ;;  %v845_v1 = vunpack.c.l.bf16 %v1749_v56  ;;  %v846_v2 = vunpack.c.l.bf16 %v1750_v57  ;;  %v544_v4 = vrot.slane %v507_v60, 1  ;;  %v1700_v16 = vld [vmem:[%s1991_s15 + $0xb0] sm:$0xf]  ;;  %s1624_s10 = sshll.u32 %s2266_s22, 1 }
  0x24   : > { %1647 = vmatmul.msk.bf16.gmra.mxu2 %vm330_vm1, %v1643_v34  ;;  %v541_v34 = vrot.slane %v505_v24, 1  ;;  %v847_v3 = vunpack.c.l.bf16 %v1751_v58  ;;  %v545_v5 = vrot.slane %v508_v61, 1  ;;  %v547_v6 = vrot.slane %v509_v62, 1  ;;  %v1880_v17 = vld [vmem:[%s1991_s15 + $0xb4] sm:$0xf0]  ;;  %s291_s13 = scalar_lea.vmem %s2260_s6, %s1624_s10 }
  0x25   : > { %1674 = vmatmul.msk.bf16.gmra.mxu1 %vm330_vm1, %v1663_v37  ;;  %v875_v37 = vrot.slane %v841_v28, 1  ;;  %v548_v7 = vrot.slane %v510_v63, 1  ;;  %v881_v9 = vrot.slane %v845_v1, 1  ;;  %v883_v10 = vrot.slane %v846_v2, 1  ;;  %v1729_v19 = vld [vmem:[%s1991_s15 + $0xf8] sm:$0xf] }
  0x26   : > { %1676 = vmatmul.msk.bf16.gmra.mxu3 %vm330_vm1, %v1671_v38  ;;  %v877_v38 = vrot.slane %v842_v29, 1  ;;  %v543_v41 = vsel %vm531_vm2, %v541_v34, %v542_v35  ;;  %v1884_v20 = vld [vmem:[%s1991_s15 + $0xfc] sm:$0xf0]  ;;  %v1701_v22 = vor.u32 %v1880_v17, %v1700_v16  ;;  %v495_v23 = vld [vmem:[%s1991_s15 + $0x30] sm:$0xf] }
  0x27   : > { %1645 = vmatmul.msk.bf16.gmra.mxu0 %vm330_vm1, %v1635_v47  ;;  %v876_v42 = vsel %vm531_vm2, %v874_v36, %v875_v37  ;;  %v565_v46 = vpack.c.bf16 %v543_v41, %v540_v40  ;;  %v1725_v47 = vld [vmem:[%s1991_s15 + $0xe8] sm:$0xf]  ;;  %v549_v13 = vsel %vm531_vm2, %v547_v6, %v548_v7  ;;  %v496_v24 = vld [vmem:[%s1991_s15 + $0x34] sm:$0x1]  ;;  %v497_v25 = vld [vmem:[%s1991_s15 + $0x38] sm:$0xf]  ;;  %v1730_v31 = vor.u32 %v1884_v20, %v1729_v19 }
  0x28   : > { %v879_v43 = vsel %vm531_vm2, %v877_v38, %v878_v39  ;;  %v1726_v59 = vor.u32 %v1883_v48, %v1725_v47  ;;  %v498_v26 = vld [vmem:[%s1991_s15 + $0x3c] sm:$0x1]  ;;  %v1752_v27 = vld [vmem:[%s1991_s15 + $0xc0] sm:$0xf]  ;;  %v1753_v28 = vld [vmem:[%s1991_s15 + $0xc4] sm:$0x1]  ;;  %v511_v32 = vunpack.c.l.bf16 %v495_v23  ;;  %v512_v33 = vunpack.c.l.bf16 %v496_v24 }
  0x29   : > { %v901_v49 = vpack.c.bf16 %v879_v43, %v876_v42  ;;  %v1754_v29 = vld [vmem:[%s1991_s15 + $0xc8] sm:$0xf]  ;;  %v1755_v30 = vld [vmem:[%s1991_s15 + $0xcc] sm:$0x1]  ;;  %v513_v34 = vunpack.c.l.bf16 %v497_v25  ;;  %v514_v35 = vunpack.c.l.bf16 %v498_v26  ;;  %v848_v36 = vunpack.c.l.bf16 %v1752_v27  ;;  %v1704_v52 = vld [vmem:[%s1991_s15 + $0xc0] sm:$0xf] }
  0x2a   : > { %v849_v37 = vunpack.c.l.bf16 %v1753_v28  ;;  %v850_v38 = vunpack.c.l.bf16 %v1754_v29  ;;  %v851_v39 = vunpack.c.l.bf16 %v1755_v30  ;;  %v550_v40 = vrot.slane %v511_v32, 1  ;;  %v1881_v53 = vld [vmem:[%s1991_s15 + $0xc4] sm:$0xf0]  ;;  %v1885_v56 = vld [vmem:[%s1991_s15 + $0x10c] sm:$0xf0] }
  0x2b   : > { %v551_v41 = vrot.slane %v512_v33, 1  ;;  %v553_v42 = vrot.slane %v513_v34, 1  ;;  %v554_v43 = vrot.slane %v514_v35, 1  ;;  %v886_v44 = vrot.slane %v848_v36, 1  ;;  %v1733_v55 = vld [vmem:[%s1991_s15 + $0x108] sm:$0xf] }
  0x2c   : > { %v887_v45 = vrot.slane %v849_v37, 1  ;;  %v890_v47 = vrot.slane %v851_v39, 1  ;;  %v1705_v58 = vor.u32 %v1881_v53, %v1704_v52  ;;  %v1819_v60 = vld [vmem:[%s1991_s15 + $0x8] sm:$0xf]  ;;  %v1820_v61 = vld [vmem:[%s1991_s15 + $0xc] sm:$0x1] }
  0x2d   : > { %v552_v48 = vsel %vm531_vm2, %v550_v40, %v551_v41  ;;  %v1821_v62 = vld [vmem:[%s1991_s15 + $0x10] sm:$0xf]  ;;  %v1822_v63 = vld [vmem:[%s1991_s15 + $0x14] sm:$0x1]  ;;  %v1173_v1 = vunpack.c.l.bf16 %v1820_v61  ;;  %v1823_v20 = vld [vmem:[%s1991_s15 + $0x18] sm:$0xf] }
  0x2e   : > { %v1174_v2 = vunpack.c.l.bf16 %v1821_v62  ;;  %v1826_v23 = vld [vmem:[%s1991_s15 + $0x24] sm:$0x1]  ;;  %v1176_v24 = vunpack.c.l.bf16 %v1823_v20  ;;  %v1775_v32 = vld [vmem:[%s1991_s15 + $0x18] sm:$0xf]  ;;  %v1887_v33 = vld [vmem:[%s1991_s15 + $0x1c] sm:$0xf0] }
  0x2f   : > { %v1179_v27 = vunpack.c.l.bf16 %v1826_v23  ;;  %v1854_v34 = vld [vmem:[%s1991_s15 + $0xe8] sm:$0xf]  ;;  %v1895_v35 = vld [vmem:[%s1991_s15 + $0xec] sm:$0xf0]  ;;  %v1804_v36 = vld [vmem:[%s1991_s15 + $0x60] sm:$0xf] }
  0x30   : > { %v1207_v6 = vrot.slane %v1174_v2, 1  ;;  %v1210_v28 = vrot.slane %v1176_v24, 1  ;;  %v1891_v37 = vld [vmem:[%s1991_s15 + $0x64] sm:$0xf0]  ;;  %v1855_v41 = vor.u32 %v1895_v35, %v1854_v34  ;;  %v1892_v61 = vld [vmem:[%s1991_s15 + $0x74] sm:$0xf0] }
  0x31   : > { %v1783_v24 = vld [vmem:[%s1991_s15 + $0x38] sm:$0xf] }
  0x34   : > { %1678 = vmatmul.msk.bf16.vlgmr.msrb.gmra.mxu2 %vm330_vm1, %v564_v8  ;;  %v880_v8 = vrot.slane %v844_v0, 1  ;;  %v1172_v0 = vunpack.c.l.bf16 %v1819_v60  ;;  %v1808_v60 = vld [vmem:[%s1991_s15 + $0x70] sm:$0xf] }
  0x35   : > { %1757 = vmatmul.msk.bf16.vlgmr.msrb.gmra.mxu1 %vm330_vm1, %v900_v11  ;;  %v884_v11 = vrot.slane %v847_v3, 1  ;;  %v1175_v3 = vunpack.c.l.bf16 %v1822_v63  ;;  %v1809_v2 = vor.u32 %v1892_v61, %v1808_v60 }
  0x36   : > { %1707 = vmatmul.msk.bf16.vlgmr.msrb.gmra.mxu3 %vm330_vm1, %v1693_v12  ;;  %v546_v12 = vsel %vm531_vm2, %v544_v4, %v545_v5  ;;  %v882_v14 = vsel %vm531_vm2, %v880_v8, %v881_v9  ;;  %v1204_v4 = vrot.slane %v1172_v0, 1  ;;  %v1205_v5 = vrot.slane %v1173_v1, 1  ;;  %v1771_v8 = vld [vmem:[%s1991_s15 + $0x8] sm:$0xf]  ;;  %v1886_v9 = vld [vmem:[%s1991_s15 + $0xc] sm:$0xf0] }
  0x37   : > { %1736 = vmatmul.msk.bf16.vlgmr.msrb.gmra.mxu0 %vm330_vm1, %v1722_v21  ;;  %v885_v15 = vsel %vm531_vm2, %v883_v10, %v884_v11  ;;  %v566_v18 = vpack.c.bf16 %v549_v13, %v546_v12  ;;  %v1208_v7 = vrot.slane %v1175_v3, 1  ;;  %v1850_v10 = vld [vmem:[%s1991_s15 + $0xd8] sm:$0xf]  ;;  %v1894_v11 = vld [vmem:[%s1991_s15 + $0xdc] sm:$0xf0] }
  0x38   : > { %v902_v21 = vpack.c.bf16 %v885_v15, %v882_v14  ;;  %v1800_v12 = vld [vmem:[%s1991_s15 + $0x50] sm:$0xf]  ;;  %v1890_v13 = vld [vmem:[%s1991_s15 + $0x54] sm:$0xf0]  ;;  %v1772_v14 = vor.u32 %v1886_v9, %v1771_v8  ;;  %v1206_v15 = vsel %vm531_vm2, %v1204_v4, %v1205_v5  ;;  %v1851_v17 = vor.u32 %v1894_v11, %v1850_v10  ;;  %v1833_v8 = vld [vmem:[%s1991_s15 + $0x40] sm:$0xf] }
  0x39   : > { %v1209_v16 = vsel %vm531_vm2, %v1207_v6, %v1208_v7  ;;  %v1831_v6 = vld [vmem:[%s1991_s15 + $0x38] sm:$0xf]  ;;  %v1832_v7 = vld [vmem:[%s1991_s15 + $0x3c] sm:$0x1]  ;;  %v1834_v9 = vld [vmem:[%s1991_s15 + $0x44] sm:$0x1] }
  0x3a   : > { %v1236_v19 = vpack.c.bf16 %v1209_v16, %v1206_v15  ;;  %v1184_v11 = vunpack.c.l.bf16 %v1831_v6  ;;  %v1186_v15 = vunpack.c.l.bf16 %v1833_v8  ;;  %v1187_v16 = vunpack.c.l.bf16 %v1834_v9 }
  0x3c   : > { %v1222_v20 = vrot.slane %v1184_v11, 1  ;;  %v1226_v23 = vrot.slane %v1187_v16, 1 }
  0x44   : > { %1679 = vmatmul.msk.bf16.gmra.mxu2 %vm330_vm1, %v565_v46  ;;  %v889_v46 = vrot.slane %v850_v38, 1  ;;  %v1776_v38 = vor.u32 %v1887_v33, %v1775_v32 }
  0x45   : > { %1758 = vmatmul.msk.bf16.gmra.mxu1 %vm330_vm1, %v901_v49  ;;  %v555_v49 = vsel %vm531_vm2, %v553_v42, %v554_v43  ;;  %v1805_v42 = vor.u32 %v1891_v37, %v1804_v36 }
  0x46   : > { %1708 = vmatmul.msk.bf16.gmra.mxu3 %vm330_vm1, %v1697_v50  ;;  %v888_v50 = vsel %vm531_vm2, %v886_v44, %v887_v45  ;;  %v891_v51 = vsel %vm531_vm2, %v889_v46, %v890_v47  ;;  %v567_v54 = vpack.c.bf16 %v555_v49, %v552_v48  ;;  %v1827_v44 = vld [vmem:[%s1991_s15 + $0x28] sm:$0xf]  ;;  %v1828_v45 = vld [vmem:[%s1991_s15 + $0x2c] sm:$0x1]  ;;  %v1829_v46 = vld [vmem:[%s1991_s15 + $0x30] sm:$0xf] }
  0x47   : > { %1737 = vmatmul.msk.bf16.gmra.mxu0 %vm330_vm1, %v1726_v59  ;;  %v903_v57 = vpack.c.bf16 %v891_v51, %v888_v50  ;;  %v1734_v59 = vor.u32 %v1885_v56, %v1733_v55  ;;  %v1830_v47 = vld [vmem:[%s1991_s15 + $0x34] sm:$0x1]  ;;  %v1180_v48 = vunpack.c.l.bf16 %v1827_v44  ;;  %v1181_v49 = vunpack.c.l.bf16 %v1828_v45  ;;  %v1779_v56 = vld [vmem:[%s1991_s15 + $0x28] sm:$0xf] }
  0x48   : > { %v1182_v50 = vunpack.c.l.bf16 %v1829_v46  ;;  %v1183_v51 = vunpack.c.l.bf16 %v1830_v47 }
  0x49   : > { %v1216_v52 = vrot.slane %v1180_v48, 1  ;;  %v1217_v53 = vrot.slane %v1181_v49, 1 }
  0x4a   : > { %v1220_v55 = vrot.slane %v1183_v51, 1 }
  0x4b   : > { %v1218_v63 = vsel %vm531_vm2, %v1216_v52, %v1217_v53 }
  0x54   : > { %1680 = vmatmul.msk.bf16.gmra.mxu2 %vm330_vm1, %v566_v18  ;;  %v1801_v18 = vor.u32 %v1890_v13, %v1800_v12 }
  0x55   : > { %1759 = vmatmul.msk.bf16.gmra.mxu1 %vm330_vm1, %v902_v21  ;;  %v1824_v21 = vld [vmem:[%s1991_s15 + $0x1c] sm:$0x1] }
  0x56   : > { %1709 = vmatmul.msk.bf16.gmra.mxu3 %vm330_vm1, %v1701_v22  ;;  %v1825_v22 = vld [vmem:[%s1991_s15 + $0x20] sm:$0xf]  ;;  %v1177_v25 = vunpack.c.l.bf16 %v1824_v21 }
  0x57   : > { %1738 = vmatmul.msk.bf16.gmra.mxu0 %vm330_vm1, %v1730_v31  ;;  %v1178_v26 = vunpack.c.l.bf16 %v1825_v22  ;;  %v1214_v31 = vrot.slane %v1179_v27, 1  ;;  %v1225_v22 = vrot.slane %v1186_v15, 1  ;;  %v1897_v27 = vld [vmem:[%s1991_s15 + $0x10c] sm:$0xf0] }
  0x58   : > { %v1211_v29 = vrot.slane %v1177_v25, 1  ;;  %v1889_v25 = vld [vmem:[%s1991_s15 + $0x3c] sm:$0xf0] }
  0x59   : > { %v1213_v30 = vrot.slane %v1178_v26, 1  ;;  %v1862_v26 = vld [vmem:[%s1991_s15 + $0x108] sm:$0xf]  ;;  %v1784_v33 = vor.u32 %v1889_v25, %v1783_v24  ;;  %v1227_v35 = vsel %vm531_vm2, %v1225_v22, %v1226_v23 }
  0x5a   : > { %v1212_v39 = vsel %vm531_vm2, %v1210_v28, %v1211_v29  ;;  %v1812_v28 = vld [vmem:[%s1991_s15 + $0x80] sm:$0xf]  ;;  %v1893_v29 = vld [vmem:[%s1991_s15 + $0x84] sm:$0xf0]  ;;  %v1863_v36 = vor.u32 %v1897_v27, %v1862_v26 }
  0x5b   : > { %v1215_v40 = vsel %vm531_vm2, %v1213_v30, %v1214_v31  ;;  %v1813_v37 = vor.u32 %v1893_v29, %v1812_v28 }
  0x5c   : > { %v1237_v43 = vpack.c.bf16 %v1215_v40, %v1212_v39 }
  0x64   : > { %1681 = vmatmul.msk.bf16.gmra.mxu2 %vm330_vm1, %v567_v54  ;;  %v1219_v54 = vrot.slane %v1182_v50, 1 }
  0x65   : > { %1760 = vmatmul.msk.bf16.gmra.mxu1 %vm330_vm1, %v903_v57  ;;  %v1888_v57 = vld [vmem:[%s1991_s15 + $0x2c] sm:$0xf0] }
  0x66   : > { %1710 = vmatmul.msk.bf16.gmra.mxu3 %vm330_vm1, %v1705_v58  ;;  %v1858_v58 = vld [vmem:[%s1991_s15 + $0xf8] sm:$0xf]  ;;  %v1780_v62 = vor.u32 %v1888_v57, %v1779_v56  ;;  %v1221_v0 = vsel %vm531_vm2, %v1219_v54, %v1220_v55 }
  0x67   : > { %1739 = vmatmul.msk.bf16.gmra.mxu0 %vm330_vm1, %v1734_v59  ;;  %v1896_v59 = vld [vmem:[%s1991_s15 + $0xfc] sm:$0xf0]  ;;  %v1238_v4 = vpack.c.bf16 %v1221_v0, %v1218_v63  ;;  %s281_s15 = scalar_lea.vmem %s2258_s4, %s1624_s10 }
  0x68   : > { %v1859_v1 = vor.u32 %v1896_v59, %v1858_v58 }
  0x74   : > { %1786 = vmatmul.msk.bf16.vlgmr.msra.gmra.mxu2 %vm330_vm1, %v1772_v14  ;;  %v1185_v14 = vunpack.c.l.bf16 %v1832_v7 }
  0x75   : > { %1864 = vmatmul.msk.bf16.vlgmr.msra.gmra.mxu1 %vm330_vm1, %v1851_v17 }
  0x76   : > { %1815 = vmatmul.msk.bf16.vlgmr.msra.gmra.mxu3 %vm330_vm1, %v1801_v18  ;;  %v1223_v21 = vrot.slane %v1185_v14, 1 }
  0x77   : > { %1836 = vmatmul.msk.bf16.vlgmr.msra.gmra.mxu0 %vm330_vm1, %v1236_v19 }
  0x78   : > { %v1224_v34 = vsel %vm531_vm2, %v1222_v20, %v1223_v21 }
  0x79   : > { %v1239_v40 = vpack.c.bf16 %v1227_v35, %v1224_v34 }
  0x84   : > { %1787 = vmatmul.msk.bf16.gmra.mxu2 %vm330_vm1, %v1776_v38 }
  0x85   : > { %1865 = vmatmul.msk.bf16.gmra.mxu1 %vm330_vm1, %v1855_v41 }
  0x86   : > { %1816 = vmatmul.msk.bf16.gmra.mxu3 %vm330_vm1, %v1805_v42 }
  0x87   : > { %1837 = vmatmul.msk.bf16.gmra.mxu0 %vm330_vm1, %v1237_v43 }
  0x92   : > { %v447_v3 = vpop.f32.mrf.mxu1 }
  0x94   : > { %1788 = vmatmul.msk.bf16.gmra.mxu2 %vm330_vm1, %v1780_v62  ;;  %v356_v5 = vpop.f32.mrf.mxu0 }
  0x95   : > { %1866 = vmatmul.msk.bf16.gmra.mxu1 %vm330_vm1, %v1859_v1  ;;  %v467_v12 = vadd.f32 %v447_v3, %v356_v5 }
  0x96   : > { %1817 = vmatmul.msk.bf16.gmra.mxu3 %vm330_vm1, %v1809_v2 }
  0x97   : > { %v366_v10 = vpop.f32.mrf.mxu2  ;;  %1838 = vmatmul.msk.bf16.gmra.mxu0 %vm330_vm1, %v1238_v4 }
  0x99   : > { %v457_v13 = vpop.f32.mrf.mxu3 }
  0x9a   : > { %v449_v17 = vpop.f32.mrf.mxu1  ;;  %v2165_v18 = vadd.f32 %v457_v13, %v366_v10 }
  0x9c   : > { %v358_v19 = vpop.f32.mrf.mxu0 }
  0x9d   : > { %v468_v31 = vadd.f32 %v449_v17, %v358_v19 }
  0x9f   : > { %v368_v30 = vpop.f32.mrf.mxu2 }
  0xa1   : > { %v459_v32 = vpop.f32.mrf.mxu3 }
  0xa2   : > { %v452_v38 = vpop.f32.mrf.mxu1  ;;  %v472_v39 = vadd.f32 %v459_v32, %v368_v30 }
  0xa4   : > { %1789 = vmatmul.msk.bf16.gmra.mxu2 %vm330_vm1, %v1784_v33  ;;  %v361_v41 = vpop.f32.mrf.mxu0 }
  0xa5   : > { %1867 = vmatmul.msk.bf16.gmra.mxu1 %vm330_vm1, %v1863_v36  ;;  %v469_v43 = vadd.f32 %v452_v38, %v361_v41 }
  0xa6   : > { %1818 = vmatmul.msk.bf16.gmra.mxu3 %vm330_vm1, %v1813_v37 }
  0xa7   : > { %v371_v42 = vpop.f32.mrf.mxu2  ;;  %1839 = vmatmul.msk.bf16.gmra.mxu0 %vm330_vm1, %v1239_v40 }
  0xa9   : > { %v462_v44 = vpop.f32.mrf.mxu3 }
  0xaa   : > { %v454_v45 = vpop.f32.mrf.mxu1  ;;  %v473_v46 = vadd.f32 %v462_v44, %v371_v42 }
  0xac   : > { %v363_v47 = vpop.f32.mrf.mxu0 }
  0xad   : > { %v470_v49 = vadd.f32 %v454_v45, %v363_v47 }
  0xaf   : > { %v373_v48 = vpop.f32.mrf.mxu2 }
  0xb1   : > { %v464_v50 = vpop.f32.mrf.mxu3 }
  0xb2   : > { %v2179_v51 = vadd.f32 %v464_v50, %v373_v48  ;;  %v938_v52 = vpop.f32.mrf.mxu1 }
  0xb4   : > { %v784_v53 = vpop.f32.mrf.mxu0 }
  0xb7   : > { %v602_v54 = vpop.f32.mrf.mxu2 }
  0xb8   : > { %v622_v55 = vadd.f32 %v602_v54, %v467_v12 }
  0xb9   : > { %v693_v56 = vpop.f32.mrf.mxu3 }
  0xba   : > { %v713_v57 = vadd.f32 %v693_v56, %v622_v55  ;;  %v940_v58 = vpop.f32.mrf.mxu1 }
  0xbc   : > { %v804_v59 = vadd.f32 %v784_v53, %v713_v57  ;;  %v786_v60 = vpop.f32.mrf.mxu0 }
  0xbe   : > { %v2181_v61 = vadd.f32 %v938_v52, %v804_v59 }
  0xbf   : > { %v604_v62 = vpop.f32.mrf.mxu2 }
  0xc0   : > { %v623_v63 = vadd.f32 %v604_v62, %v468_v31 }
  0xc1   : > { %v695_v0 = vpop.f32.mrf.mxu3 }
  0xc2   : > { %v714_v1 = vadd.f32 %v695_v0, %v623_v63  ;;  %v943_v2 = vpop.f32.mrf.mxu1 }
  0xc4   : > { %v805_v3 = vadd.f32 %v786_v60, %v714_v1  ;;  %v789_v4 = vpop.f32.mrf.mxu0 }
  0xc6   : > { %v2183_v5 = vadd.f32 %v940_v58, %v805_v3 }
  0xc7   : > { %v607_v6 = vpop.f32.mrf.mxu2 }
  0xc8   : > { %v624_v7 = vadd.f32 %v607_v6, %v469_v43 }
  0xc9   : > { %v698_v8 = vpop.f32.mrf.mxu3 }
  0xca   : > { %v715_v9 = vadd.f32 %v698_v8, %v624_v7  ;;  %v945_v10 = vpop.f32.mrf.mxu1 }
  0xcc   : > { %v806_v11 = vadd.f32 %v789_v4, %v715_v9  ;;  %v791_v12 = vpop.f32.mrf.mxu0 }
  0xce   : > { %v2185_v13 = vadd.f32 %v943_v2, %v806_v11 }
  0xcf   : > { %v609_v14 = vpop.f32.mrf.mxu2 }
  0xd0   : > { %v625_v15 = vadd.f32 %v609_v14, %v470_v49 }
  0xd1   : > { %v700_v16 = vpop.f32.mrf.mxu3 }
  0xd2   : > { %v716_v17 = vadd.f32 %v700_v16, %v625_v15  ;;  %v948_v19 = vpop.f32.mrf.mxu1 }
  0xd4   : > { %v807_v20 = vadd.f32 %v791_v12, %v716_v17  ;;  %v794_v21 = vpop.f32.mrf.mxu0 }
  0xd6   : > { %v2187_v22 = vadd.f32 %v945_v10, %v807_v20 }
  0xd7   : > { %v612_v23 = vpop.f32.mrf.mxu2 }
  0xd8   : > { %v626_v24 = vadd.f32 %v612_v23, %v2165_v18 }
  0xd9   : > { %v703_v25 = vpop.f32.mrf.mxu3 }
  0xda   : > { %v717_v26 = vadd.f32 %v703_v25, %v626_v24  ;;  %v950_v27 = vpop.f32.mrf.mxu1 }
  0xdc   : > { %v808_v28 = vadd.f32 %v794_v21, %v717_v26  ;;  %v796_v29 = vpop.f32.mrf.mxu0 }
  0xde   : > { %v2190_v30 = vadd.f32 %v948_v19, %v808_v28 }
  0xdf   : > { %v614_v31 = vpop.f32.mrf.mxu2 }
  0xe0   : > { %v627_v32 = vadd.f32 %v614_v31, %v472_v39 }
  0xe1   : > { %v705_v33 = vpop.f32.mrf.mxu3 }
  0xe2   : > { %v718_v34 = vadd.f32 %v705_v33, %v627_v32  ;;  %v953_v35 = vpop.f32.mrf.mxu1 }
  0xe4   : > { %v809_v36 = vadd.f32 %v796_v29, %v718_v34  ;;  %v799_v37 = vpop.f32.mrf.mxu0 }
  0xe6   : > { %v2193_v38 = vadd.f32 %v950_v27, %v809_v36 }
  0xe7   : > { %v617_v40 = vpop.f32.mrf.mxu2 }
  0xe8   : > { %v628_v18 = vadd.f32 %v617_v40, %v473_v46 }
  0xe9   : > { %v708_v41 = vpop.f32.mrf.mxu3 }
  0xea   : > { %v719_v42 = vadd.f32 %v708_v41, %v628_v18  ;;  %v955_v43 = vpop.f32.mrf.mxu1 }
  0xec   : > { %v810_v44 = vadd.f32 %v799_v37, %v719_v42  ;;  %v801_v45 = vpop.f32.mrf.mxu0 }
  0xee   : > { %v2195_v47 = vadd.f32 %v953_v35, %v810_v44 }
  0xef   : > { %v619_v39 = vpop.f32.mrf.mxu2 }
  0xf0   : > { %v629_v48 = vadd.f32 %v619_v39, %v2179_v51 }
  0xf1   : > { %v710_v49 = vpop.f32.mrf.mxu3 }
  0xf2   : > { %v720_v46 = vadd.f32 %v710_v49, %v629_v48  ;;  %v2203_v50 = vpop.f32.mrf.mxu1 }
  0xf3   : > { %1419 = vst [vmem:[%s2201_s30] sm:$0xff] %v2203_v50  ;;  %v1441_v36 = vmul.f32 %v2203_v50, %v2203_v50 }
  0xf4   : > { %v811_v52 = vadd.f32 %v801_v45, %v720_v46  ;;  %v1274_v53 = vpop.f32.mrf.mxu0 }
  0xf6   : > { %v2207_v54 = vadd.f32 %v955_v43, %v811_v52 }
  0xf7   : > { %v1029_v55 = vpop.f32.mrf.mxu2 }
  0xf8   : > { %v1049_v51 = vadd.f32 %v1029_v55, %v2181_v61 }
  0xf9   : > { %v1120_v56 = vpop.f32.mrf.mxu3 }
  0xfa   : > { %v1140_v57 = vadd.f32 %v1120_v56, %v1049_v51  ;;  %v1401_v58 = vpop.f32.mrf.mxu1 }
  0xfb   : > { %1420 = vst [vmem:[%s2201_s30 + $0x8] sm:$0xff] %v1401_v58  ;;  %v1442_v37 = vmul.f32 %v1401_v58, %v1401_v58  ;;  %v1427_v41 = vadd.f32 %v1401_v58, %v2203_v50 }
  0xfc   : > { %v1294_v59 = vadd.f32 %v1274_v53, %v1140_v57  ;;  %v1276_v60 = vpop.f32.mrf.mxu0 }
  0xfd   : > { %v1449_v48 = vadd.f32 %v1442_v37, %v1441_v36 }
  0xfe   : > { %1302 = vst [vmem:[%s2213_s9] sm:$0xff] %v1294_v59  ;;  %v1332_v4 = vmul.f32 %v1294_v59, %v1294_v59 }
  0xff   : > { %v1031_v62 = vpop.f32.mrf.mxu2 }
 0x100   : > { %v1050_v63 = vadd.f32 %v1031_v62, %v2183_v5 }
 0x101   : > { %v1122_v0 = vpop.f32.mrf.mxu3 }
 0x102   : > { %v1141_v61 = vadd.f32 %v1122_v0, %v1050_v63  ;;  %v1404_v1 = vpop.f32.mrf.mxu1 }
 0x103   : > { %1421 = vst [vmem:[%s2201_s30 + $0x10] sm:$0xff] %v1404_v1  ;;  %v1443_v42 = vmul.f32 %v1404_v1, %v1404_v1  ;;  %v1428_v49 = vadd.f32 %v1427_v41, %v1404_v1 }
 0x104   : > { %v1295_v2 = vadd.f32 %v1276_v60, %v1141_v61  ;;  %v1279_v3 = vpop.f32.mrf.mxu0 }
 0x105   : > { %v1450_v55 = vadd.f32 %v1449_v48, %v1443_v42 }
 0x106   : > { %1303 = vst [vmem:[%s2213_s9 + $0x8] sm:$0xff] %v1295_v2  ;;  %v1318_v6 = vadd.f32 %v1295_v2, %v1294_v59  ;;  %v1333_v7 = vmul.f32 %v1295_v2, %v1295_v2 }
 0x107   : > { %v1034_v8 = vpop.f32.mrf.mxu2 }
 0x108   : > { %v1051_v9 = vadd.f32 %v1034_v8, %v2185_v13  ;;  %v1340_v11 = vadd.f32 %v1333_v7, %v1332_v4 }
 0x109   : > { %v1125_v10 = vpop.f32.mrf.mxu3 }
 0x10a   : > { %v1142_v12 = vadd.f32 %v1125_v10, %v1051_v9  ;;  %v1406_v5 = vpop.f32.mrf.mxu1 }
 0x10b   : > { %1422 = vst [vmem:[%s2201_s30 + $0x18] sm:$0xff] %v1406_v5  ;;  %v1444_v46 = vmul.f32 %v1406_v5, %v1406_v5  ;;  %v1429_v51 = vadd.f32 %v1428_v49, %v1406_v5 }
 0x10c   : > { %v1296_v14 = vadd.f32 %v1279_v3, %v1142_v12  ;;  %v1281_v15 = vpop.f32.mrf.mxu0 }
 0x10d   : > { %v1451_v59 = vadd.f32 %v1450_v55, %v1444_v46 }
 0x10e   : > { %1304 = vst [vmem:[%s2213_s9 + $0x10] sm:$0xff] %v1296_v14  ;;  %v1319_v16 = vadd.f32 %v1318_v6, %v1296_v14  ;;  %v1334_v17 = vmul.f32 %v1296_v14, %v1296_v14 }
 0x10f   : > { %v1036_v19 = vpop.f32.mrf.mxu2 }
 0x110   : > { %v1052_v20 = vadd.f32 %v1036_v19, %v2187_v22  ;;  %v1341_v23 = vadd.f32 %v1340_v11, %v1334_v17 }
 0x111   : > { %v1127_v21 = vpop.f32.mrf.mxu3 }
 0x112   : > { %v1143_v24 = vadd.f32 %v1127_v21, %v1052_v20  ;;  %v1409_v13 = vpop.f32.mrf.mxu1 }
 0x113   : > { %1423 = vst [vmem:[%s2201_s30 + $0x20] sm:$0xff] %v1409_v13  ;;  %v1445_v56 = vmul.f32 %v1409_v13, %v1409_v13  ;;  %v1430_v50 = vadd.f32 %v1429_v51, %v1409_v13 }
 0x114   : > { %v1297_v25 = vadd.f32 %v1281_v15, %v1143_v24  ;;  %v1284_v26 = vpop.f32.mrf.mxu0 }
 0x115   : > { %v1452_v62 = vadd.f32 %v1451_v59, %v1445_v56 }
 0x116   : > { %1305 = vst [vmem:[%s2213_s9 + $0x18] sm:$0xff] %v1297_v25  ;;  %v1320_v27 = vadd.f32 %v1319_v16, %v1297_v25  ;;  %v1335_v28 = vmul.f32 %v1297_v25, %v1297_v25 }
 0x117   : > { %v1039_v29 = vpop.f32.mrf.mxu2 }
 0x118   : > { %v1053_v31 = vadd.f32 %v1039_v29, %v2190_v30  ;;  %v1342_v33 = vadd.f32 %v1341_v23, %v1335_v28 }
 0x119   : > { %v1130_v32 = vpop.f32.mrf.mxu3 }
 0x11a   : > { %v1144_v34 = vadd.f32 %v1130_v32, %v1053_v31  ;;  %v1411_v35 = vpop.f32.mrf.mxu1 }
 0x11b   : > { %1424 = vst [vmem:[%s2201_s30 + $0x28] sm:$0xff] %v1411_v35  ;;  %v1446_v58 = vmul.f32 %v1411_v35, %v1411_v35  ;;  %v1431_v63 = vadd.f32 %v1430_v50, %v1411_v35 }
 0x11c   : > { %v1298_v22 = vadd.f32 %v1284_v26, %v1144_v34  ;;  %v1286_v44 = vpop.f32.mrf.mxu0 }
 0x11d   : > { %v1453_v4 = vadd.f32 %v1452_v62, %v1446_v58 }
 0x11e   : > { %1306 = vst [vmem:[%s2213_s9 + $0x20] sm:$0xff] %v1298_v22  ;;  %v1321_v40 = vadd.f32 %v1320_v27, %v1298_v22  ;;  %v1336_v18 = vmul.f32 %v1298_v22, %v1298_v22 }
 0x11f   : > { %v1041_v43 = vpop.f32.mrf.mxu2 }
 0x120   : > { %v1054_v30 = vadd.f32 %v1041_v43, %v2193_v38  ;;  %v1343_v39 = vadd.f32 %v1342_v33, %v1336_v18 }
 0x121   : > { %v1132_v45 = vpop.f32.mrf.mxu3 }
 0x122   : > { %v1145_v52 = vadd.f32 %v1132_v45, %v1054_v30  ;;  %v1414_v53 = vpop.f32.mrf.mxu1 }
 0x123   : > { %1425 = vst [vmem:[%s2201_s30 + $0x30] sm:$0xff] %v1414_v53  ;;  %v1447_v0 = vmul.f32 %v1414_v53, %v1414_v53  ;;  %v1432_v6 = vadd.f32 %v1431_v63, %v1414_v53 }
 0x124   : > { %v1299_v57 = vadd.f32 %v1286_v44, %v1145_v52  ;;  %v1289_v7 = vpop.f32.mrf.mxu0 }
 0x125   : > { %v1454_v10 = vadd.f32 %v1453_v4, %v1447_v0 }
 0x126   : > { %1307 = vst [vmem:[%s2213_s9 + $0x28] sm:$0xff] %v1299_v57  ;;  %v1322_v60 = vadd.f32 %v1321_v40, %v1299_v57  ;;  %v1337_v38 = vmul.f32 %v1299_v57, %v1299_v57 }
 0x127   : > { %v1044_v61 = vpop.f32.mrf.mxu2 }
 0x128   : > { %v1055_v1 = vadd.f32 %v1044_v61, %v2195_v47  ;;  %v1344_v3 = vadd.f32 %v1343_v39, %v1337_v38 }
 0x129   : > { %v1135_v2 = vpop.f32.mrf.mxu3 }
 0x12a   : > { %v1146_v8 = vadd.f32 %v1135_v2, %v1055_v1  ;;  %v1416_v9 = vpop.f32.mrf.mxu1 }
 0x12b   : > { %1426 = vst [vmem:[%s2201_s30 + $0x38] sm:$0xff] %v1416_v9  ;;  %v1433_v11 = vadd.f32 %v1432_v6, %v1416_v9  ;;  %v1448_v12 = vmul.f32 %v1416_v9, %v1416_v9 }
 0x12c   : > { %v1300_v5 = vadd.f32 %v1289_v7, %v1146_v8  ;;  %v1291_v29 = vpop.f32.mrf.mxu0 }
 0x12d   : > { %v1434_v14 = vrot.slane %v1433_v11, 4  ;;  %v1455_v15 = vadd.f32 %v1454_v10, %v1448_v12 }
 0x12e   : > { %1308 = vst [vmem:[%s2213_s9 + $0x30] sm:$0xff] %v1300_v5  ;;  %v1323_v16 = vadd.f32 %v1322_v60, %v1300_v5  ;;  %v1338_v47 = vmul.f32 %v1300_v5, %v1300_v5 }
 0x12f   : > { %v1435_v17 = vadd.f32 %v1434_v14, %v1433_v11  ;;  %v1456_v19 = vrot.slane %v1455_v15, 4  ;;  %v1046_v20 = vpop.f32.mrf.mxu2 }
 0x130   : > { %v1056_v21 = vadd.f32 %v1046_v20, %v2207_v54  ;;  %v1345_v23 = vadd.f32 %v1344_v3, %v1338_v47 }
 0x131   : > { %v1436_v24 = vrot.slane %v1435_v17, 2  ;;  %v1457_v13 = vadd.f32 %v1456_v19, %v1455_v15  ;;  %v1137_v25 = vpop.f32.mrf.mxu3 }
 0x132   : > { %v1147_v26 = vadd.f32 %v1137_v25, %v1056_v21 }
 0x133   : > { %v1437_v27 = vadd.f32 %v1436_v24, %v1435_v17  ;;  %v1458_v28 = vrot.slane %v1457_v13, 2 }
 0x134   : > { %v1301_v31 = vadd.f32 %v1291_v29, %v1147_v26 }
 0x135   : > { %v1438_v32 = vrot.slane %v1437_v27, 1  ;;  %v1459_v33 = vadd.f32 %v1458_v28, %v1457_v13 }
 0x136   : > { %1309 = vst [vmem:[%s2213_s9 + $0x38] sm:$0xff] %v1301_v31  ;;  %v1324_v34 = vadd.f32 %v1323_v16, %v1301_v31  ;;  %v1339_v35 = vmul.f32 %v1301_v31, %v1301_v31 }
 0x137   : > { %v1439_v54 = vadd.f32 %v1438_v32, %v1437_v27  ;;  %v1460_v22 = vrot.slane %v1459_v33, 1 }
 0x138   : > { %v1325_v36 = vrot.slane %v1324_v34, 4  ;;  %v1346_v37 = vadd.f32 %v1345_v23, %v1339_v35 }
 0x139   : > { %1440 = vst [vmem:[%s291_s13] sm:$0x1] %v1439_v54  ;;  %v1461_v40 = vadd.f32 %v1460_v22, %v1459_v33 }
 0x13a   : > { %v1326_v18 = vadd.f32 %v1325_v36, %v1324_v34  ;;  %v1347_v41 = vrot.slane %v1346_v37, 4 }
 0x13b   : > { %1462 = vst [vmem:[%s291_s13 + $0x1] sm:$0x1] %v1461_v40 }
 0x13c   : > { %v1327_v42 = vrot.slane %v1326_v18, 2  ;;  %v1348_v43 = vadd.f32 %v1347_v41, %v1346_v37 }
 0x13e   : > { %v1328_v44 = vadd.f32 %v1327_v42, %v1326_v18  ;;  %v1349_v30 = vrot.slane %v1348_v43, 2 }
 0x140   : > { %v1329_v45 = vrot.slane %v1328_v44, 1  ;;  %v1350_v39 = vadd.f32 %v1349_v30, %v1348_v43 }
 0x142   : > { %v1330_v48 = vadd.f32 %v1329_v45, %v1328_v44  ;;  %v1351_v49 = vrot.slane %v1350_v39, 1 }
 0x144   : > { %1331 = vst [vmem:[%s281_s15] sm:$0x1] %v1330_v48  ;;  %v1352_v46 = vadd.f32 %v1351_v49, %v1350_v39 }
 0x146   : > { %1353 = vst [vmem:[%s281_s15 + $0x1] sm:$0x1] %v1352_v46 }
 0x147 PF: > { %s17_s21 = sadd.s32 1, %s1916_s21  }
 0x148   : > { %p14_p6 = scmp.ge.s32.totalorder %s17_s21, 4  }
 0x14a   :  { %16 = sbr.rel (!%p14_p6) target bundleno = 1 (0x1), region = 111 }

// kernel: residual_block_forward.6
= control target key start
LH: loop header
LB: loop body
LE: loop exit
PB: predicated region body
PF: predicated region fallthrough
CT: control target
= control target key end

     0   :  { %s2644_s12 = smov 0   ;;  %s3114_s0 = inlined_call_operand.vmem [shape: bf16[2,10,10,128], index: 0, kind: input, shape index: {}]   ;;  %s3115_s1 = inlined_call_operand.vmem [shape: bf16[9,128,128], index: 1, kind: input, shape index: {}]   ;;  %s3116_s2 = inlined_call_operand.vmem [shape: f32[128,128], index: 2, kind: output, shape index: {0}]   ;;  %s3117_s3 = inlined_call_operand.vmem [shape: f32[2,2,128], index: 3, kind: output, shape index: {1}]  }
   0x1 LB: > { %s2650_s13 = sadd.s32 4294967295, %s2622_s12   ;;  %p1955_p0 = scmp.ge.s32.totalorder %s2622_s12, 1  ;;  %s2622_s12 = sphi %s2644_s12, %s14_s12  }
   0x2   : > { %p140_p1 = scmp.lt.s32.totalorder %s2622_s12, 3 }
   0x4   : > { %p141_p2 = pnand %p1955_p0, %p140_p1 }
   0x5   : > { %p168_p3 = scmp.lt.s32.totalorder (!%p141_p2), %s2650_s13, 1 }
   0x6   : > { %144 = sbr.rel (%p141_p2) target bundleno = 346 (0x15a), region = 28 }
   0xb   : > { %v2517_v0 = vld [vmem:[%s3115_s1 + $0x38] sm:$0xff]  ;;  %v2516_v1 = vld [vmem:[%s3115_s1 + $0x30] sm:$0xff]  ;;  %v2515_v5 = vld [vmem:[%s3115_s1 + $0x28] sm:$0xff]  ;;  %s2674_s26 = scalar_select %p168_p3, %s2650_s13, 1  ;;  %vm579_vm0 = vcmask 1045504   ;;  %vm376_vm1 = vcmask 1046528  }
   0xc   : > { %2590 = vmatpush.bf16.msra.mxu1 %v2517_v0  ;;  %283 = vmatpush.bf16.msra.mxu0 %v2517_v0  ;;  %v2533_v2 = vld [vmem:[%s3115_s1 + $0xb8] sm:$0xff]  ;;  %v2532_v3 = vld [vmem:[%s3115_s1 + $0xb0] sm:$0xff]  ;;  %v2531_v7 = vld [vmem:[%s3115_s1 + $0xa8] sm:$0xff] }
   0xd   : > { %689 = vmatpush.bf16.msra.mxu2 %v2533_v2  ;;  %v2545_v4 = vld [vmem:[%s3115_s1 + $0xf8] sm:$0xff]  ;;  %v2544_v6 = vld [vmem:[%s3115_s1 + $0xf0] sm:$0xff]  ;;  %v2514_v8 = vld [vmem:[%s3115_s1 + $0x20] sm:$0xff]  ;;  %s2606_s6 = smul.u32 80, %s2674_s26  ;;  %s1959_s27 = sshll.u32 %s2674_s26, 1 }
   0xe   : > { %828 = vmatpush.bf16.msra.mxu3 %v2545_v4  ;;  %v2543_v9 = vld [vmem:[%s3115_s1 + $0xe8] sm:$0xff]  ;;  %v2530_v10 = vld [vmem:[%s3115_s1 + $0xa0] sm:$0xff]  ;;  %v2513_v11 = vld [vmem:[%s3115_s1 + $0x18] sm:$0xff]  ;;  %s182_s30 = scalar_lea.vmem %s3117_s3, %s1959_s27 }
   0xf   : > { %s2698_s17 = scalar_lea.vmem %s3114_s0, %s2606_s6  ;;  %v2542_v12 = vld [vmem:[%s3115_s1 + $0xe0] sm:$0xff]  ;;  %v2529_v13 = vld [vmem:[%s3115_s1 + $0x98] sm:$0xff]  ;;  %v2512_v18 = vld [vmem:[%s3115_s1 + $0x10] sm:$0xff] }
  0x10   : > { %2591 = vmatpush.bf16.msra.mxu1 %v2516_v1  ;;  %284 = vmatpush.bf16.msra.mxu0 %v2516_v1  ;;  %v531_v14 = vld [vmem:[%s2698_s17] sm:$0xe]  ;;  %v532_v15 = vld [vmem:[%s2698_s17 + $0x4] sm:$0x1]  ;;  %v533_v16 = vld [vmem:[%s2698_s17 + $0x8] sm:$0xe] }
  0x11   : > { %690 = vmatpush.bf16.msra.mxu2 %v2532_v3  ;;  %v534_v17 = vld [vmem:[%s2698_s17 + $0xc] sm:$0x1]  ;;  %v2541_v19 = vld [vmem:[%s3115_s1 + $0xd8] sm:$0xff]  ;;  %v2528_v20 = vld [vmem:[%s3115_s1 + $0x90] sm:$0xff]  ;;  %v547_v21 = vunpack.c.l.bf16 %v531_v14  ;;  %v548_v22 = vunpack.c.l.bf16 %v532_v15  ;;  %v549_v23 = vunpack.c.l.bf16 %v533_v16 }
  0x12   : > { %829 = vmatpush.bf16.msra.mxu3 %v2544_v6  ;;  %v550_v24 = vunpack.c.l.bf16 %v534_v17  ;;  %v2511_v25 = vld [vmem:[%s3115_s1 + $0x8] sm:$0xff]  ;;  %v2540_v26 = vld [vmem:[%s3115_s1 + $0xd0] sm:$0xff]  ;;  %v2510_v32 = vld [vmem:[%s3115_s1] sm:$0xff] }
  0x13   : > { %v2527_v27 = vld [vmem:[%s3115_s1 + $0x88] sm:$0xff]  ;;  %v580_v28 = vrot.slane %v547_v21, 2  ;;  %v581_v29 = vrot.slane %v548_v22, 2  ;;  %v583_v30 = vrot.slane %v549_v23, 2  ;;  %v1970_v33 = vld [vmem:[%s2698_s17 + $0x20] sm:$0xf] }
  0x14   : > { %2592 = vmatpush.bf16.msra.mxu1 %v2515_v5  ;;  %285 = vmatpush.bf16.msra.mxu0 %v2515_v5  ;;  %v584_v31 = vrot.slane %v550_v24, 2  ;;  %v2508_v34 = vld [vmem:[%s2698_s17 + $0x24] sm:$0xf0]  ;;  %v1962_v35 = vld [vmem:[%s2698_s17] sm:$0xf]  ;;  %v2525_v37 = vld [vmem:[%s3115_s1 + $0x78] sm:$0xff] }
  0x15   : > { %691 = vmatpush.bf16.msra.mxu2 %v2531_v7  ;;  %v2506_v36 = vld [vmem:[%s2698_s17 + $0x4] sm:$0xf0]  ;;  %v2526_v39 = vld [vmem:[%s3115_s1 + $0x80] sm:$0xff]  ;;  %v582_v40 = vsel %vm579_vm0, %v580_v28, %v581_v29  ;;  %v2553_v42 = vld [vmem:[%s3115_s1 + $0x138] sm:$0xff]  ;;  %v1971_v43 = vor.u32 %v2508_v34, %v1970_v33 }
  0x16   : > { %830 = vmatpush.bf16.msra.mxu3 %v2543_v9  ;;  %v2539_v38 = vld [vmem:[%s3115_s1 + $0xc8] sm:$0xff]  ;;  %v585_v41 = vsel %vm579_vm0, %v583_v30, %v584_v31  ;;  %v1963_v44 = vor.u32 %v2506_v36, %v1962_v35  ;;  %v2524_v45 = vld [vmem:[%s3115_s1 + $0x70] sm:$0xff]  ;;  %v2538_v50 = vld [vmem:[%s3115_s1 + $0xc0] sm:$0xff] }
  0x17   : > { %v612_v46 = vpack.c.bf16 %v585_v41, %v582_v40  ;;  %v2552_v47 = vld [vmem:[%s3115_s1 + $0x130] sm:$0xff]  ;;  %v2114_v51 = vld [vmem:[%s2698_s17 + $0x8] sm:$0xf]  ;;  %v2573_v53 = vld [vmem:[%s3115_s1 + $0x1b8] sm:$0xff] }
  0x18   : > { %2593 = vmatpush.bf16.msra.mxu1 %v2514_v8  ;;  %286 = vmatpush.bf16.msra.mxu0 %v2514_v8  ;;  %v535_v48 = vld [vmem:[%s2698_s17 + $0x10] sm:$0xe]  ;;  %v536_v49 = vld [vmem:[%s2698_s17 + $0x14] sm:$0x1]  ;;  %v537_v54 = vld [vmem:[%s2698_s17 + $0x18] sm:$0xe] }
  0x19   : > { %692 = vmatpush.bf16.msra.mxu2 %v2530_v10  ;;  %v2534_v52 = vld [vmem:[%s2698_s17 + $0xc] sm:$0xf0]  ;;  %v538_v55 = vld [vmem:[%s2698_s17 + $0x1c] sm:$0x1]  ;;  %v2523_v57 = vld [vmem:[%s3115_s1 + $0x68] sm:$0xff]  ;;  %v551_v60 = vunpack.c.l.bf16 %v535_v48  ;;  %v552_v61 = vunpack.c.l.bf16 %v536_v49  ;;  %v553_v62 = vunpack.c.l.bf16 %v537_v54 }
  0x1a   : > { %831 = vmatpush.bf16.msra.mxu3 %v2542_v12  ;;  %v2581_v56 = vld [vmem:[%s3115_s1 + $0x1f8] sm:$0xff]  ;;  %v2115_v58 = vor.u32 %v2534_v52, %v2114_v51  ;;  %v2551_v59 = vld [vmem:[%s3115_s1 + $0x128] sm:$0xff]  ;;  %v554_v63 = vunpack.c.l.bf16 %v538_v55  ;;  %v2572_v0 = vld [vmem:[%s3115_s1 + $0x1b0] sm:$0xff] }
  0x1b   : > { %v2522_v1 = vld [vmem:[%s3115_s1 + $0x60] sm:$0xff]  ;;  %v586_v3 = vrot.slane %v551_v60, 2  ;;  %v587_v4 = vrot.slane %v552_v61, 2  ;;  %v589_v5 = vrot.slane %v553_v62, 2  ;;  %v1974_v7 = vld [vmem:[%s2698_s17 + $0x30] sm:$0xf] }
  0x1c   : > { %2594 = vmatpush.bf16.msra.mxu1 %v2513_v11  ;;  %287 = vmatpush.bf16.msra.mxu0 %v2513_v11  ;;  %v2550_v2 = vld [vmem:[%s3115_s1 + $0x120] sm:$0xff]  ;;  %v590_v6 = vrot.slane %v554_v63, 2  ;;  %v2509_v8 = vld [vmem:[%s2698_s17 + $0x34] sm:$0xf0]  ;;  %v1966_v9 = vld [vmem:[%s2698_s17 + $0x10] sm:$0xf] }
  0x1d   : > { %693 = vmatpush.bf16.msra.mxu2 %v2529_v13  ;;  %v2507_v10 = vld [vmem:[%s2698_s17 + $0x14] sm:$0xf0]  ;;  %v328_v12 = vld [vmem:[%s2698_s17] sm:$0xf]  ;;  %v588_v13 = vsel %vm579_vm0, %v586_v3, %v587_v4  ;;  %v1975_v16 = vor.u32 %v2509_v8, %v1974_v7  ;;  %v2520_v17 = vld [vmem:[%s3115_s1 + $0x50] sm:$0xff] }
  0x1e   : > { %832 = vmatpush.bf16.msra.mxu3 %v2541_v19  ;;  %v2521_v11 = vld [vmem:[%s3115_s1 + $0x58] sm:$0xff]  ;;  %v591_v14 = vsel %vm579_vm0, %v589_v5, %v590_v6  ;;  %v330_v19 = vld [vmem:[%s2698_s17 + $0x8] sm:$0xf]  ;;  %v1967_v21 = vor.u32 %v2507_v10, %v1966_v9  ;;  %v2548_v22 = vld [vmem:[%s3115_s1 + $0x110] sm:$0xff]  ;;  %v344_v33 = vunpack.c.l.bf16 %v328_v12 }
  0x1f   : > { %v2549_v15 = vld [vmem:[%s3115_s1 + $0x118] sm:$0xff]  ;;  %v2176_v23 = vld [vmem:[%s2698_s17 + $0x8] sm:$0xf]  ;;  %v2177_v24 = vld [vmem:[%s2698_s17 + $0xc] sm:$0x1]  ;;  %v346_v35 = vunpack.c.l.bf16 %v330_v19 }
  0x20   : > { %2595 = vmatpush.bf16.msra.mxu1 %v2512_v18  ;;  %288 = vmatpush.bf16.msra.mxu0 %v2512_v18  ;;  %v329_v18 = vld [vmem:[%s2698_s17 + $0x4] sm:$0x1]  ;;  %v2535_v28 = vld [vmem:[%s2698_s17 + $0x1c] sm:$0xf0]  ;;  %v2179_v29 = vld [vmem:[%s2698_s17 + $0x14] sm:$0x1]  ;;  %v889_v41 = vunpack.c.l.bf16 %v2176_v23 }
  0x21   : > { %694 = vmatpush.bf16.msra.mxu2 %v2528_v20  ;;  %v331_v20 = vld [vmem:[%s2698_s17 + $0xc] sm:$0x1]  ;;  %v539_v31 = vld [vmem:[%s2698_s17 + $0x20] sm:$0xe]  ;;  %v345_v34 = vunpack.c.l.bf16 %v329_v18  ;;  %v380_v55 = vrot.slane %v346_v35, 1  ;;  %v2561_v62 = vld [vmem:[%s3115_s1 + $0x178] sm:$0xff] }
  0x22   : > { %833 = vmatpush.bf16.msra.mxu3 %v2540_v26  ;;  %v613_v26 = vpack.c.bf16 %v591_v14, %v588_v13  ;;  %v2571_v30 = vld [vmem:[%s3115_s1 + $0x1a8] sm:$0xff]  ;;  %v347_v36 = vunpack.c.l.bf16 %v331_v20  ;;  %v2570_v40 = vld [vmem:[%s3115_s1 + $0x1a0] sm:$0xff]  ;;  %v555_v48 = vunpack.c.l.bf16 %v539_v31  ;;  %v2569_v4 = vld [vmem:[%s3115_s1 + $0x198] sm:$0xff] }
  0x23   : > { %v2579_v52 = vld [vmem:[%s3115_s1 + $0x1e8] sm:$0xff]  ;;  %v378_v54 = vrot.slane %v345_v34, 1  ;;  %v2518_v61 = vld [vmem:[%s3115_s1 + $0x40] sm:$0xff]  ;;  %v2560_v9 = vld [vmem:[%s3115_s1 + $0x170] sm:$0xff] }
  0x24   : > { %2596 = vmatpush.bf16.msra.mxu1 %v2511_v25  ;;  %289 = vmatpush.bf16.msra.mxu0 %v2511_v25  ;;  %v2178_v25 = vld [vmem:[%s2698_s17 + $0x10] sm:$0xf]  ;;  %v2546_v63 = vld [vmem:[%s3115_s1 + $0x100] sm:$0xff]  ;;  %v2180_v19 = vld [vmem:[%s2698_s17 + $0x18] sm:$0xf] }
  0x25   : > { %695 = vmatpush.bf16.msra.mxu2 %v2527_v27  ;;  %v2118_v27 = vld [vmem:[%s2698_s17 + $0x18] sm:$0xf]  ;;  %v332_v10 = vld [vmem:[%s2698_s17 + $0x10] sm:$0xf]  ;;  %v2181_v20 = vld [vmem:[%s2698_s17 + $0x1c] sm:$0x1] }
  0x26   : > { %834 = vmatpush.bf16.msra.mxu3 %v2539_v38  ;;  %v541_v38 = vld [vmem:[%s2698_s17 + $0x28] sm:$0xe]  ;;  %v2568_v14 = vld [vmem:[%s3115_s1 + $0x190] sm:$0xff]  ;;  %v2578_v34 = vld [vmem:[%s3115_s1 + $0x1e0] sm:$0xff] }
  0x27   : > { %v2559_v23 = vld [vmem:[%s3115_s1 + $0x168] sm:$0xff]  ;;  %v545_v35 = vld [vmem:[%s2698_s17 + $0x38] sm:$0xe] }
  0x28   : > { %2597 = vmatpush.bf16.msra.mxu1 %v2510_v32  ;;  %290 = vmatpush.bf16.msra.mxu0 %v2510_v32  ;;  %v540_v32 = vld [vmem:[%s2698_s17 + $0x24] sm:$0x1] }
  0x29   : > { %696 = vmatpush.bf16.msra.mxu2 %v2526_v39  ;;  %v542_v39 = vld [vmem:[%s2698_s17 + $0x2c] sm:$0x1]  ;;  %v556_v49 = vunpack.c.l.bf16 %v540_v32 }
  0x2a   : > { %835 = vmatpush.bf16.msra.mxu3 %v2538_v50  ;;  %v557_v50 = vunpack.c.l.bf16 %v541_v38  ;;  %v558_v51 = vunpack.c.l.bf16 %v542_v39  ;;  %v893_v38 = vunpack.c.l.bf16 %v2180_v19  ;;  %v894_v39 = vunpack.c.l.bf16 %v2181_v20  ;;  %v2185_v19 = vld [vmem:[%s2698_s17 + $0x2c] sm:$0x1]  ;;  %v2186_v20 = vld [vmem:[%s2698_s17 + $0x30] sm:$0xf] }
  0x2b   : > { %301 = vmatmul.bf16.vlgmr.msra.gmra.mxu1 %v1971_v43  ;;  %291 = vmatmul.bf16.vlgmr.msra.gmra.mxu0 %v1963_v44  ;;  %v891_v43 = vunpack.c.l.bf16 %v2178_v25  ;;  %v892_v44 = vunpack.c.l.bf16 %v2179_v29  ;;  %v2122_v25 = vld [vmem:[%s2698_s17 + $0x28] sm:$0xf] }
  0x2c   : > { %486 = vmatpush.bf16.msrb.mxu1 %v2525_v37  ;;  %1030 = vmatpush.bf16.msrb.mxu0 %v2553_v42  ;;  %v2580_v37 = vld [vmem:[%s3115_s1 + $0x1f0] sm:$0xff]  ;;  %v890_v42 = vunpack.c.l.bf16 %v2177_v24  ;;  %v596_v3 = vrot.slane %v558_v51, 2  ;;  %v2567_v29 = vld [vmem:[%s3115_s1 + $0x188] sm:$0xff] }
  0x2d   : > { %697 = vmatmul.bf16.vlgmr.msra.gmra.mxu2 %v612_v46  ;;  %836 = vmatmul.bf16.vlgmr.msra.gmra.mxu3 %v2115_v58  ;;  %v2119_v46 = vor.u32 %v2535_v28, %v2118_v27  ;;  %v925_v60 = vrot.slane %v892_v44, 1  ;;  %v543_v27 = vld [vmem:[%s2698_s17 + $0x30] sm:$0xe]  ;;  %v544_v28 = vld [vmem:[%s2698_s17 + $0x34] sm:$0x1] }
  0x2e   : > { %1371 = vmatpush.bf16.msrb.mxu2 %v2573_v53  ;;  %1573 = vmatpush.bf16.msrb.mxu3 %v2581_v56  ;;  %v377_v53 = vrot.slane %v344_v33, 1  ;;  %v381_v56 = vrot.slane %v347_v36, 1  ;;  %v922_v58 = vrot.slane %v890_v42, 1  ;;  %v546_v36 = vld [vmem:[%s2698_s17 + $0x3c] sm:$0x1]  ;;  %v559_v44 = vunpack.c.l.bf16 %v543_v27  ;;  %v2555_v27 = vld [vmem:[%s3115_s1 + $0x148] sm:$0xff] }
  0x30   : > { %487 = vmatpush.bf16.msrb.mxu1 %v2524_v45  ;;  %1031 = vmatpush.bf16.msrb.mxu0 %v2552_v47  ;;  %v2519_v45 = vld [vmem:[%s3115_s1 + $0x48] sm:$0xff]  ;;  %v379_v5 = vsel %vm376_vm1, %v377_v53, %v378_v54  ;;  %v382_v6 = vsel %vm376_vm1, %v380_v55, %v381_v56  ;;  %v927_v54 = vrot.slane %v893_v38, 1  ;;  %v928_v55 = vrot.slane %v894_v39, 1  ;;  %v2554_v39 = vld [vmem:[%s3115_s1 + $0x140] sm:$0xff] }
  0x31   : > { %v2547_v47 = vld [vmem:[%s3115_s1 + $0x108] sm:$0xff] }
  0x32   : > { %1372 = vmatpush.bf16.msrb.mxu2 %v2572_v0  ;;  %1574 = vmatpush.bf16.msrb.mxu3 %v2580_v37  ;;  %v592_v0 = vrot.slane %v555_v48, 2  ;;  %v2589_v37 = vld [vmem:[%s3115_s1 + $0x238] sm:$0xff] }
  0x33   : > { %v2577_v48 = vld [vmem:[%s3115_s1 + $0x1d8] sm:$0xff] }
  0x34   : > { %488 = vmatpush.bf16.msrb.mxu1 %v2523_v57  ;;  %1032 = vmatpush.bf16.msrb.mxu0 %v2551_v59  ;;  %v921_v57 = vrot.slane %v889_v41, 1  ;;  %v924_v59 = vrot.slane %v891_v43, 1  ;;  %v2558_v43 = vld [vmem:[%s3115_s1 + $0x160] sm:$0xff] }
  0x36   : > { %1373 = vmatpush.bf16.msrb.mxu2 %v2571_v30  ;;  %1575 = vmatpush.bf16.msrb.mxu3 %v2579_v52  ;;  %v923_v7 = vsel %vm376_vm1, %v921_v57, %v922_v58  ;;  %v926_v8 = vsel %vm376_vm1, %v924_v59, %v925_v60  ;;  %v348_v30 = vunpack.c.l.bf16 %v332_v10  ;;  %v2557_v58 = vld [vmem:[%s3115_s1 + $0x158] sm:$0xff]  ;;  %v598_v59 = vrot.slane %v559_v44, 2  ;;  %v337_v10 = vld [vmem:[%s2698_s17 + $0x24] sm:$0x1] }
  0x37   : > { %v953_v18 = vpack.c.bf16 %v926_v8, %v923_v7 }
  0x38   : > { %489 = vmatpush.bf16.msrb.mxu1 %v2522_v1  ;;  %1033 = vmatpush.bf16.msrb.mxu0 %v2550_v2  ;;  %v593_v1 = vrot.slane %v556_v49, 2  ;;  %v595_v2 = vrot.slane %v557_v50, 2  ;;  %v2566_v49 = vld [vmem:[%s3115_s1 + $0x180] sm:$0xff]  ;;  %v383_v50 = vrot.slane %v348_v30, 1  ;;  %v899_v30 = vunpack.c.l.bf16 %v2186_v20 }
  0x3a   : > { %1374 = vmatpush.bf16.msrb.mxu2 %v2570_v40  ;;  %v594_v12 = vsel %vm579_vm0, %v592_v0, %v593_v1  ;;  %v597_v13 = vsel %vm579_vm0, %v595_v2, %v596_v3  ;;  %1576 = vmatpush.bf16.msrb.mxu3 %v2578_v34  ;;  %v929_v1 = vsel %vm376_vm1, %v927_v54, %v928_v55  ;;  %v2588_v3 = vld [vmem:[%s3115_s1 + $0x230] sm:$0xff]  ;;  %v2586_v34 = vld [vmem:[%s3115_s1 + $0x220] sm:$0xff] }
  0x3b   : > { %306 = vmatmul.bf16.gmra.mxu1 %v1975_v16  ;;  %296 = vmatmul.bf16.gmra.mxu0 %v1967_v21  ;;  %v334_v16 = vld [vmem:[%s2698_s17 + $0x18] sm:$0xf]  ;;  %v2182_v21 = vld [vmem:[%s2698_s17 + $0x20] sm:$0xf]  ;;  %v614_v24 = vpack.c.bf16 %v597_v13, %v594_v12  ;;  %v339_v12 = vld [vmem:[%s2698_s17 + $0x2c] sm:$0x1] }
  0x3c   : > { %490 = vmatpush.bf16.msrb.mxu1 %v2521_v11  ;;  %1034 = vmatpush.bf16.msrb.mxu0 %v2549_v15  ;;  %v333_v11 = vld [vmem:[%s2698_s17 + $0x14] sm:$0x1]  ;;  %v409_v15 = vpack.c.bf16 %v382_v6, %v379_v5  ;;  %v350_v32 = vunpack.c.l.bf16 %v334_v16  ;;  %v895_v40 = vunpack.c.l.bf16 %v2182_v21  ;;  %v336_v5 = vld [vmem:[%s2698_s17 + $0x20] sm:$0xf]  ;;  %v2575_v16 = vld [vmem:[%s3115_s1 + $0x1c8] sm:$0xff] }
  0x3d   : > { %702 = vmatmul.bf16.gmra.mxu2 %v613_v26  ;;  %841 = vmatmul.bf16.gmra.mxu3 %v2119_v46  ;;  %v2536_v26 = vld [vmem:[%s2698_s17 + $0x2c] sm:$0xf0]  ;;  %v349_v31 = vunpack.c.l.bf16 %v333_v11  ;;  %v561_v46 = vunpack.c.l.bf16 %v545_v35  ;;  %v338_v11 = vld [vmem:[%s2698_s17 + $0x28] sm:$0xf]  ;;  %v2187_v21 = vld [vmem:[%s2698_s17 + $0x34] sm:$0x1] }
  0x3e   : > { %1375 = vmatpush.bf16.msrb.mxu2 %v2569_v4  ;;  %v2123_v42 = vor.u32 %v2536_v26, %v2122_v25  ;;  %v386_v52 = vrot.slane %v350_v32, 1  ;;  %v930_v56 = vrot.slane %v895_v40, 1  ;;  %1577 = vmatpush.bf16.msrb.mxu3 %v2577_v48  ;;  %v2576_v4 = vld [vmem:[%s3115_s1 + $0x1d0] sm:$0xff]  ;;  %v2126_v25 = vld [vmem:[%s2698_s17 + $0x38] sm:$0xf]  ;;  %v2574_v35 = vld [vmem:[%s3115_s1 + $0x1c0] sm:$0xff] }
  0x3f   : > { %v384_v51 = vrot.slane %v349_v31, 1  ;;  %v2556_v6 = vld [vmem:[%s3115_s1 + $0x150] sm:$0xff]  ;;  %v2537_v26 = vld [vmem:[%s2698_s17 + $0x3c] sm:$0xf0]  ;;  %v900_v31 = vunpack.c.l.bf16 %v2187_v21  ;;  %v2585_v48 = vld [vmem:[%s3115_s1 + $0x218] sm:$0xff] }
  0x40   : > { %491 = vmatpush.bf16.msrb.mxu1 %v2520_v17  ;;  %1035 = vmatpush.bf16.msrb.mxu0 %v2548_v22  ;;  %v335_v17 = vld [vmem:[%s2698_s17 + $0x1c] sm:$0x1]  ;;  %v2183_v22 = vld [vmem:[%s2698_s17 + $0x24] sm:$0x1]  ;;  %v2376_v40 = vld [vmem:[%s2698_s17 + $0x10] sm:$0xf] }
  0x41   : > { %v351_v33 = vunpack.c.l.bf16 %v335_v17  ;;  %v896_v41 = vunpack.c.l.bf16 %v2183_v22  ;;  %v352_v17 = vunpack.c.l.bf16 %v336_v5  ;;  %v353_v22 = vunpack.c.l.bf16 %v337_v10 }
  0x42   : > { %1376 = vmatpush.bf16.msrb.mxu2 %v2568_v14  ;;  %1578 = vmatpush.bf16.msrb.mxu3 %v2576_v4  ;;  %v2587_v14 = vld [vmem:[%s3115_s1 + $0x228] sm:$0xff]  ;;  %v343_v4 = vld [vmem:[%s2698_s17 + $0x3c] sm:$0x1] }
  0x43   : > { %v387_v53 = vrot.slane %v351_v33, 1  ;;  %v931_v57 = vrot.slane %v896_v41, 1  ;;  %v389_v32 = vrot.slane %v352_v17, 1  ;;  %v2127_v33 = vor.u32 %v2537_v26, %v2126_v25  ;;  %v2377_v41 = vld [vmem:[%s2698_s17 + $0x14] sm:$0x1] }
  0x44   : > { %492 = vmatpush.bf16.msrb.mxu1 %v2519_v45  ;;  %1036 = vmatpush.bf16.msrb.mxu0 %v2547_v47  ;;  %v560_v45 = vunpack.c.l.bf16 %v544_v28  ;;  %v562_v47 = vunpack.c.l.bf16 %v546_v36  ;;  %v390_v36 = vrot.slane %v353_v22, 1  ;;  %v2582_v22 = vld [vmem:[%s3115_s1 + $0x200] sm:$0xff] }
  0x45   : > { %v388_v0 = vsel %vm376_vm1, %v386_v52, %v387_v53  ;;  %v932_v2 = vsel %vm376_vm1, %v930_v56, %v931_v57  ;;  %v2584_v57 = vld [vmem:[%s3115_s1 + $0x210] sm:$0xff] }
  0x46   : > { %1377 = vmatpush.bf16.msrb.mxu2 %v2567_v29  ;;  %v599_v60 = vrot.slane %v560_v45, 2  ;;  %v954_v13 = vpack.c.bf16 %v932_v2, %v929_v1  ;;  %v898_v29 = vunpack.c.l.bf16 %v2185_v19  ;;  %1579 = vmatpush.bf16.msrb.mxu3 %v2575_v16  ;;  %v391_v53 = vsel %vm376_vm1, %v389_v32, %v390_v36 }
  0x48   : > { %493 = vmatpush.bf16.msrb.mxu1 %v2518_v61  ;;  %1037 = vmatpush.bf16.msrb.mxu0 %v2546_v63  ;;  %v601_v61 = vrot.slane %v561_v46, 2  ;;  %v385_v63 = vsel %vm376_vm1, %v383_v50, %v384_v51  ;;  %v600_v7 = vsel %vm579_vm0, %v598_v59, %v599_v60  ;;  %v934_v45 = vrot.slane %v898_v29, 1  ;;  %v341_v59 = vld [vmem:[%s2698_s17 + $0x34] sm:$0x1]  ;;  %v2314_v60 = vld [vmem:[%s2698_s17 + $0x10] sm:$0xf] }
  0x49   : > { %v936_v46 = vrot.slane %v899_v30, 1  ;;  %v1433_v50 = vunpack.c.l.bf16 %v2377_v41  ;;  %v2381_v29 = vld [vmem:[%s2698_s17 + $0x24] sm:$0x1]  ;;  %v2382_v30 = vld [vmem:[%s2698_s17 + $0x28] sm:$0xf] }
  0x4a   : > { %1378 = vmatpush.bf16.msrb.mxu2 %v2566_v49  ;;  %1580 = vmatpush.bf16.msrb.mxu3 %v2574_v35  ;;  %v1432_v49 = vunpack.c.l.bf16 %v2376_v40 }
  0x4b   : > { %494 = vmatmul.bf16.vlgmr.msrb.gmra.mxu1 %v409_v15  ;;  %1038 = vmatmul.bf16.vlgmr.msrb.gmra.mxu0 %v953_v18  ;;  %v2184_v15 = vld [vmem:[%s2698_s17 + $0x28] sm:$0xf] }
  0x4c   : > { %1232 = vmatpush.bf16.msra.mxu1 %v2561_v62  ;;  %1775 = vmatpush.bf16.msra.mxu0 %v2589_v37  ;;  %v602_v62 = vrot.slane %v562_v47, 2  ;;  %v897_v28 = vunpack.c.l.bf16 %v2184_v15  ;;  %v937_v47 = vrot.slane %v900_v31, 1  ;;  %v359_v15 = vunpack.c.l.bf16 %v343_v4  ;;  %v2383_v31 = vld [vmem:[%s2698_s17 + $0x2c] sm:$0x1] }
  0x4d   : > { %707 = vmatmul.bf16.gmra.mxu2 %v614_v24  ;;  %846 = vmatmul.bf16.gmra.mxu3 %v2123_v42  ;;  %v355_v24 = vunpack.c.l.bf16 %v339_v12  ;;  %v2378_v42 = vld [vmem:[%s2698_s17 + $0x18] sm:$0xf]  ;;  %v2190_v12 = vld [vmem:[%s2698_s17 + $0x40] sm:$0xf] }
  0x4e   : > { %2598 = vmatpush.bf16.msra.mxu2 %v2589_v37  ;;  %v603_v8 = vsel %vm579_vm0, %v601_v61, %v602_v62  ;;  %v933_v44 = vrot.slane %v897_v28, 1  ;;  %v1434_v51 = vunpack.c.l.bf16 %v2378_v42  ;;  %v938_v56 = vsel %vm376_vm1, %v936_v46, %v937_v47  ;;  %v2562_v61 = vld [vmem:[%s2698_s17 + $0x14] sm:$0xf0]  ;;  %v2380_v28 = vld [vmem:[%s2698_s17 + $0x20] sm:$0xf] }
  0x4f   : > { %v615_v18 = vpack.c.bf16 %v603_v8, %v600_v7  ;;  %v393_v38 = vrot.slane %v355_v24, 1  ;;  %v1464_v62 = vrot.slane %v1432_v49, 1  ;;  %v2583_v7 = vld [vmem:[%s3115_s1 + $0x208] sm:$0xff]  ;;  %v2315_v10 = vor.u32 %v2562_v61, %v2314_v60  ;;  %v2318_v46 = vld [vmem:[%s2698_s17 + $0x20] sm:$0xf] }
  0x50   : > { %1233 = vmatpush.bf16.msra.mxu1 %v2560_v9  ;;  %1776 = vmatpush.bf16.msra.mxu0 %v2588_v3  ;;  %v410_v9 = vpack.c.bf16 %v388_v0, %v385_v63  ;;  %v935_v55 = vsel %vm376_vm1, %v933_v44, %v934_v45  ;;  %v1465_v63 = vrot.slane %v1433_v50, 1  ;;  %v1467_v0 = vrot.slane %v1434_v51, 1  ;;  %v2240_v44 = vld [vmem:[%s2698_s17 + $0x8] sm:$0xe]  ;;  %v2241_v45 = vld [vmem:[%s2698_s17 + $0xc] sm:$0x1] }
  0x51   : > { %v955_v5 = vpack.c.bf16 %v938_v56, %v935_v55  ;;  %v903_v20 = vunpack.c.l.bf16 %v2190_v12  ;;  %v1436_v36 = vunpack.c.l.bf16 %v2380_v28  ;;  %v2563_v47 = vld [vmem:[%s2698_s17 + $0x24] sm:$0xf0]  ;;  %v2440_v56 = vld [vmem:[%s2698_s17 + $0x10] sm:$0xe]  ;;  %v2441_v60 = vld [vmem:[%s2698_s17 + $0x14] sm:$0x1] }
  0x52   : > { %2599 = vmatpush.bf16.msra.mxu2 %v2588_v3  ;;  %v342_v3 = vld [vmem:[%s2698_s17 + $0x38] sm:$0xf]  ;;  %v1466_v16 = vsel %vm376_vm1, %v1464_v62, %v1465_v63  ;;  %v2443_v62 = vld [vmem:[%s2698_s17 + $0x1c] sm:$0x1]  ;;  %v1635_v4 = vunpack.c.l.bf16 %v2441_v60  ;;  %v2384_v12 = vld [vmem:[%s2698_s17 + $0x30] sm:$0xf] }
  0x53   : > { %v2442_v61 = vld [vmem:[%s2698_s17 + $0x18] sm:$0xe]  ;;  %v2388_v60 = vld [vmem:[%s2698_s17 + $0x40] sm:$0xf] }
  0x54   : > { %1234 = vmatpush.bf16.msra.mxu1 %v2559_v23  ;;  %v354_v23 = vunpack.c.l.bf16 %v338_v11  ;;  %1777 = vmatpush.bf16.msra.mxu0 %v2587_v14  ;;  %v2189_v11 = vld [vmem:[%s2698_s17 + $0x3c] sm:$0x1]  ;;  %v2244_v28 = vld [vmem:[%s2698_s17 + $0x18] sm:$0xe] }
  0x55   : > { %v902_v19 = vunpack.c.l.bf16 %v2189_v11 }
  0x56   : > { %2600 = vmatpush.bf16.msra.mxu2 %v2587_v14  ;;  %v392_v37 = vrot.slane %v354_v23, 1  ;;  %v358_v14 = vunpack.c.l.bf16 %v342_v3  ;;  %v1634_v3 = vunpack.c.l.bf16 %v2440_v56 }
  0x58   : > { %1235 = vmatpush.bf16.msra.mxu1 %v2558_v43  ;;  %1778 = vmatpush.bf16.msra.mxu0 %v2586_v34  ;;  %v2379_v43 = vld [vmem:[%s2698_s17 + $0x1c] sm:$0x1]  ;;  %v394_v54 = vsel %vm376_vm1, %v392_v37, %v393_v38  ;;  %v398_v26 = vrot.slane %v358_v14, 1  ;;  %v1437_v37 = vunpack.c.l.bf16 %v2381_v29  ;;  %v1438_v38 = vunpack.c.l.bf16 %v2382_v30  ;;  %v2386_v14 = vld [vmem:[%s2698_s17 + $0x38] sm:$0xf] }
  0x59   : > { %v1435_v52 = vunpack.c.l.bf16 %v2379_v43  ;;  %v411_v2 = vpack.c.bf16 %v394_v54, %v391_v53  ;;  %v2242_v53 = vld [vmem:[%s2698_s17 + $0x10] sm:$0xe]  ;;  %v2243_v54 = vld [vmem:[%s2698_s17 + $0x14] sm:$0x1]  ;;  %v2245_v29 = vld [vmem:[%s2698_s17 + $0x1c] sm:$0x1] }
  0x5a   : > { %2601 = vmatpush.bf16.msra.mxu2 %v2586_v34  ;;  %v942_v34 = vrot.slane %v903_v20, 1  ;;  %v1471_v49 = vrot.slane %v1437_v37, 1  ;;  %v1473_v50 = vrot.slane %v1438_v38, 1  ;;  %v1093_v63 = vunpack.c.l.bf16 %v2242_v53  ;;  %v2322_v30 = vld [vmem:[%s2698_s17 + $0x30] sm:$0xf] }
  0x5b   : > { %499 = vmatmul.bf16.gmra.mxu1 %v410_v9  ;;  %1043 = vmatmul.bf16.gmra.mxu0 %v954_v13  ;;  %v1468_v1 = vrot.slane %v1435_v52, 1  ;;  %v357_v9 = vunpack.c.l.bf16 %v341_v59  ;;  %v2191_v13 = vld [vmem:[%s2698_s17 + $0x44] sm:$0x1]  ;;  %v2319_v59 = vor.u32 %v2563_v47, %v2318_v46  ;;  %v1440_v20 = vunpack.c.l.bf16 %v2384_v12  ;;  %v2246_v37 = vld [vmem:[%s2698_s17 + $0x20] sm:$0xe] }
  0x5c   : > { %1236 = vmatpush.bf16.msra.mxu1 %v2557_v58  ;;  %1779 = vmatpush.bf16.msra.mxu0 %v2585_v48  ;;  %v340_v58 = vld [vmem:[%s2698_s17 + $0x30] sm:$0xf]  ;;  %v904_v21 = vunpack.c.l.bf16 %v2191_v13  ;;  %v2385_v13 = vld [vmem:[%s2698_s17 + $0x34] sm:$0x1]  ;;  %v2247_v38 = vld [vmem:[%s2698_s17 + $0x24] sm:$0x1]  ;;  %v1097_v47 = vunpack.c.l.bf16 %v2246_v37 }
  0x5d   : > { %712 = vmatmul.bf16.gmra.mxu2 %v615_v18  ;;  %851 = vmatmul.bf16.gmra.mxu3 %v2127_v33  ;;  %v356_v8 = vunpack.c.l.bf16 %v340_v58  ;;  %v1469_v17 = vsel %vm376_vm1, %v1467_v0, %v1468_v1  ;;  %v396_v25 = vrot.slane %v357_v9, 1  ;;  %v940_v33 = vrot.slane %v902_v19, 1  ;;  %v2447_v46 = vld [vmem:[%s2698_s17 + $0x2c] sm:$0x1]  ;;  %v2326_v12 = vld [vmem:[%s2698_s17 + $0x40] sm:$0xf] }
  0x5e   : > { %2602 = vmatpush.bf16.msra.mxu2 %v2585_v48  ;;  %v1496_v23 = vpack.c.bf16 %v1469_v17, %v1466_v16  ;;  %v943_v35 = vrot.slane %v904_v21, 1  ;;  %v1470_v48 = vrot.slane %v1436_v36, 1  ;;  %v1092_v58 = vunpack.c.l.bf16 %v2241_v45  ;;  %v2446_v45 = vld [vmem:[%s2698_s17 + $0x28] sm:$0xe] }
  0x5f   : > { %v395_v24 = vrot.slane %v356_v8, 1  ;;  %v1094_v0 = vunpack.c.l.bf16 %v2243_v54  ;;  %v1666_v16 = vrot.slane %v1634_v3, 2  ;;  %v1667_v17 = vrot.slane %v1635_v4, 2  ;;  %v2454_v37 = vld [vmem:[%s2698_s17 + $0x48] sm:$0xe] }
  0x60   : > { %1237 = vmatpush.bf16.msra.mxu1 %v2556_v6  ;;  %1780 = vmatpush.bf16.msra.mxu0 %v2584_v57  ;;  %v2188_v6 = vld [vmem:[%s2698_s17 + $0x38] sm:$0xf]  ;;  %v944_v43 = vsel %vm376_vm1, %v942_v34, %v943_v35  ;;  %v1472_v1 = vsel %vm376_vm1, %v1470_v48, %v1471_v49  ;;  %v1124_v9 = vrot.slane %v1092_v58, 2  ;;  %v1441_v21 = vunpack.c.l.bf16 %v2385_v13  ;;  %v2565_v13 = vld [vmem:[%s2698_s17 + $0x44] sm:$0xf0] }
  0x61   : > { %v901_v18 = vunpack.c.l.bf16 %v2188_v6  ;;  %v397_v40 = vsel %vm376_vm1, %v395_v24, %v396_v25  ;;  %v1637_v6 = vunpack.c.l.bf16 %v2443_v62  ;;  %v1127_v11 = vrot.slane %v1094_v0, 2  ;;  %v2390_v62 = vld [vmem:[%s2698_s17 + $0x48] sm:$0xf] }
  0x62   : > { %2603 = vmatpush.bf16.msra.mxu2 %v2584_v57  ;;  %v1091_v57 = vunpack.c.l.bf16 %v2240_v44  ;;  %v2445_v44 = vld [vmem:[%s2698_s17 + $0x24] sm:$0x1]  ;;  %v1098_v48 = vunpack.c.l.bf16 %v2247_v38  ;;  %v1640_v53 = vunpack.c.l.bf16 %v2446_v45  ;;  %v1641_v54 = vunpack.c.l.bf16 %v2447_v46  ;;  %v2455_v38 = vld [vmem:[%s2698_s17 + $0x4c] sm:$0x1] }
  0x63   : > { %v939_v32 = vrot.slane %v901_v18, 1  ;;  %v1670_v19 = vrot.slane %v1637_v6, 2  ;;  %v1132_v58 = vrot.slane %v1097_v47, 2  ;;  %v1444_v4 = vunpack.c.l.bf16 %v2388_v60 }
  0x64   : > { %1238 = vmatpush.bf16.msra.mxu1 %v2555_v27  ;;  %1781 = vmatpush.bf16.msra.mxu0 %v2583_v7  ;;  %v399_v27 = vrot.slane %v359_v15, 1  ;;  %v1123_v8 = vrot.slane %v1091_v57, 2  ;;  %v2387_v15 = vld [vmem:[%s2698_s17 + $0x3c] sm:$0x1]  ;;  %v1676_v3 = vrot.slane %v1641_v54, 2  ;;  %v1446_v6 = vunpack.c.l.bf16 %v2390_v62 }
  0x65   : > { %v941_v42 = vsel %vm376_vm1, %v939_v32, %v940_v33  ;;  %v1476_v32 = vrot.slane %v1440_v20, 1  ;;  %v1477_v33 = vrot.slane %v1441_v21, 1  ;;  %v2249_v20 = vld [vmem:[%s2698_s17 + $0x2c] sm:$0x1]  ;;  %v1648_v46 = vunpack.c.l.bf16 %v2454_v37 }
  0x66   : > { %2604 = vmatpush.bf16.msra.mxu2 %v2583_v7  ;;  %v400_v41 = vsel %vm376_vm1, %v398_v26, %v399_v27  ;;  %v956_v55 = vpack.c.bf16 %v944_v43, %v941_v42  ;;  %v1125_v24 = vsel %vm579_vm0, %v1123_v8, %v1124_v9  ;;  %v1668_v26 = vsel %vm579_vm0, %v1666_v16, %v1667_v17 }
  0x67   : > { %v412_v52 = vpack.c.bf16 %v400_v41, %v397_v40  ;;  %v2444_v40 = vld [vmem:[%s2698_s17 + $0x20] sm:$0xe]  ;;  %v1095_v41 = vunpack.c.l.bf16 %v2244_v28  ;;  %v1096_v42 = vunpack.c.l.bf16 %v2245_v29  ;;  %v1478_v49 = vsel %vm376_vm1, %v1476_v32, %v1477_v33  ;;  %v2451_v28 = vld [vmem:[%s2698_s17 + $0x3c] sm:$0x1] }
  0x68   : > { %1239 = vmatpush.bf16.msra.mxu1 %v2554_v39  ;;  %1782 = vmatpush.bf16.msra.mxu0 %v2582_v22  ;;  %v1439_v39 = vunpack.c.l.bf16 %v2383_v31  ;;  %v2564_v31 = vld [vmem:[%s2698_s17 + $0x34] sm:$0xf0]  ;;  %v1485_v16 = vrot.slane %v1446_v6, 1  ;;  %v1100_v33 = vunpack.c.l.bf16 %v2249_v20  ;;  %v1649_v47 = vunpack.c.l.bf16 %v2455_v38 }
  0x69   : > { %v2323_v43 = vor.u32 %v2564_v31, %v2322_v30  ;;  %v1129_v56 = vrot.slane %v1095_v41, 2  ;;  %v1130_v57 = vrot.slane %v1096_v42, 2  ;;  %v2452_v31 = vld [vmem:[%s2698_s17 + $0x40] sm:$0xe]  ;;  %v1645_v42 = vunpack.c.l.bf16 %v2451_v28 }
  0x6a   : > { %2605 = vmatpush.bf16.msra.mxu2 %v2582_v22  ;;  %v1474_v51 = vrot.slane %v1439_v39, 1  ;;  %v1442_v22 = vunpack.c.l.bf16 %v2386_v14  ;;  %v1482_v14 = vrot.slane %v1444_v4, 1 }
  0x6b   : > { %504 = vmatmul.bf16.gmra.mxu1 %v411_v2  ;;  %1048 = vmatmul.bf16.gmra.mxu0 %v955_v5  ;;  %v1636_v5 = vunpack.c.l.bf16 %v2442_v61  ;;  %v2389_v61 = vld [vmem:[%s2698_s17 + $0x44] sm:$0x1]  ;;  %v1131_v8 = vsel %vm579_vm0, %v1129_v56, %v1130_v57 }
  0x6c   : > { %v1475_v2 = vsel %vm376_vm1, %v1473_v50, %v1474_v51  ;;  %v1479_v34 = vrot.slane %v1442_v22, 1  ;;  %v1638_v51 = vunpack.c.l.bf16 %v2444_v40  ;;  %v2250_v22 = vld [vmem:[%s2698_s17 + $0x30] sm:$0xe] }
  0x6d   : > { %1379 = vmatmul.bf16.vlgmr.msrb.gmra.mxu2 %v2315_v10  ;;  %1581 = vmatmul.bf16.vlgmr.msrb.gmra.mxu3 %v1496_v23  ;;  %v1497_v7 = vpack.c.bf16 %v1475_v2, %v1472_v1  ;;  %v1126_v10 = vrot.slane %v1093_v63, 2  ;;  %v1669_v18 = vrot.slane %v1636_v5, 2  ;;  %v1443_v23 = vunpack.c.l.bf16 %v2387_v15  ;;  %v2391_v63 = vld [vmem:[%s2698_s17 + $0x4c] sm:$0x1] }
  0x6e   : > { %v1672_v0 = vrot.slane %v1638_v51, 2  ;;  %v1675_v2 = vrot.slane %v1640_v53, 2  ;;  %v1445_v5 = vunpack.c.l.bf16 %v2389_v61 }
  0x6f   : > { %v1128_v25 = vsel %vm579_vm0, %v1126_v10, %v1127_v11  ;;  %v1671_v27 = vsel %vm579_vm0, %v1669_v18, %v1670_v19  ;;  %v1480_v35 = vrot.slane %v1443_v23, 1  ;;  %v2248_v19 = vld [vmem:[%s2698_s17 + $0x28] sm:$0xe]  ;;  %v2251_v23 = vld [vmem:[%s2698_s17 + $0x34] sm:$0x1] }
  0x70   : > { %v1155_v36 = vpack.c.bf16 %v1128_v25, %v1125_v24  ;;  %v1698_v39 = vpack.c.bf16 %v1671_v27, %v1668_v26  ;;  %v1677_v11 = vsel %vm579_vm0, %v1675_v2, %v1676_v3  ;;  %v1483_v15 = vrot.slane %v1445_v5, 1  ;;  %v2448_v24 = vld [vmem:[%s2698_s17 + $0x30] sm:$0xe]  ;;  %v2449_v26 = vld [vmem:[%s2698_s17 + $0x34] sm:$0x1] }
  0x71   : > { %v1481_v50 = vsel %vm376_vm1, %v1479_v34, %v1480_v35  ;;  %v2327_v25 = vor.u32 %v2565_v13, %v2326_v12  ;;  %v2450_v27 = vld [vmem:[%s2698_s17 + $0x38] sm:$0xe]  ;;  %v1099_v32 = vunpack.c.l.bf16 %v2248_v19  ;;  %v1101_v34 = vunpack.c.l.bf16 %v2250_v22 }
  0x72   : > { %v1484_v29 = vsel %vm376_vm1, %v1482_v14, %v1483_v15  ;;  %v1102_v35 = vunpack.c.l.bf16 %v2251_v23  ;;  %v1643_v40 = vunpack.c.l.bf16 %v2449_v26  ;;  %v1644_v41 = vunpack.c.l.bf16 %v2450_v27  ;;  %v2252_v5 = vld [vmem:[%s2698_s17 + $0x38] sm:$0xe] }
  0x74   : > { %v1139_v51 = vrot.slane %v1102_v35, 2  ;;  %v1679_v53 = vrot.slane %v1643_v40, 2  ;;  %v1681_v54 = vrot.slane %v1644_v41, 2 }
  0x7b   : > { %509 = vmatmul.bf16.gmra.mxu1 %v412_v52  ;;  %1053 = vmatmul.bf16.gmra.mxu0 %v956_v55  ;;  %v1639_v52 = vunpack.c.l.bf16 %v2445_v44  ;;  %v1498_v55 = vpack.c.bf16 %v1481_v50, %v1478_v49  ;;  %v1646_v44 = vunpack.c.l.bf16 %v2452_v31  ;;  %v1136_v49 = vrot.slane %v1100_v33, 2 }
  0x7c   : > { %v1138_v50 = vrot.slane %v1101_v34, 2 }
  0x7d   : > { %1384 = vmatmul.bf16.gmra.mxu2 %v2319_v59  ;;  %1586 = vmatmul.bf16.gmra.mxu3 %v1497_v7  ;;  %v1133_v59 = vrot.slane %v1098_v48, 2  ;;  %v1673_v1 = vrot.slane %v1639_v52, 2  ;;  %v1447_v7 = vunpack.c.l.bf16 %v2391_v63  ;;  %v1135_v48 = vrot.slane %v1099_v32, 2 }
  0x7e   : > { %v1684_v56 = vrot.slane %v1646_v44, 2  ;;  %v1140_v61 = vsel %vm579_vm0, %v1138_v50, %v1139_v51 }
  0x7f   : > { %v1134_v9 = vsel %vm579_vm0, %v1132_v58, %v1133_v59  ;;  %v1674_v10 = vsel %vm579_vm0, %v1672_v0, %v1673_v1  ;;  %v1486_v17 = vrot.slane %v1447_v7, 1  ;;  %v1687_v58 = vrot.slane %v1648_v46, 2  ;;  %v2253_v7 = vld [vmem:[%s2698_s17 + $0x3c] sm:$0x1] }
  0x80   : > { %v1156_v18 = vpack.c.bf16 %v1134_v9, %v1131_v8  ;;  %v1699_v21 = vpack.c.bf16 %v1677_v11, %v1674_v10  ;;  %v1688_v59 = vrot.slane %v1649_v47, 2  ;;  %v1137_v60 = vsel %vm579_vm0, %v1135_v48, %v1136_v49  ;;  %v2254_v8 = vld [vmem:[%s2698_s17 + $0x40] sm:$0xe]  ;;  %v2255_v9 = vld [vmem:[%s2698_s17 + $0x44] sm:$0x1] }
  0x81   : > { %v1487_v30 = vsel %vm376_vm1, %v1485_v16, %v1486_v17  ;;  %v1157_v2 = vpack.c.bf16 %v1140_v61, %v1137_v60  ;;  %v1103_v11 = vunpack.c.l.bf16 %v2252_v5  ;;  %v1104_v12 = vunpack.c.l.bf16 %v2253_v7 }
  0x82   : > { %v1689_v1 = vsel %vm579_vm0, %v1687_v58, %v1688_v59  ;;  %v1105_v13 = vunpack.c.l.bf16 %v2254_v8  ;;  %v1106_v14 = vunpack.c.l.bf16 %v2255_v9 }
  0x83   : > { %v1141_v16 = vrot.slane %v1103_v11, 2  ;;  %v1142_v17 = vrot.slane %v1104_v12, 2 }
  0x84   : > { %v1145_v19 = vrot.slane %v1106_v14, 2 }
  0x85   : > { %v1143_v22 = vsel %vm579_vm0, %v1141_v16, %v1142_v17 }
  0x8b   : > { %1240 = vmatmul.bf16.vlgmr.msra.gmra.mxu1 %v1155_v36  ;;  %1783 = vmatmul.bf16.vlgmr.msra.gmra.mxu0 %v1698_v39  ;;  %v2453_v36 = vld [vmem:[%s2698_s17 + $0x44] sm:$0x1]  ;;  %v1642_v39 = vunpack.c.l.bf16 %v2448_v24  ;;  %s1957_s17 = sshll.u32 %s2650_s13, 3 }
  0x8c   : > { %v1647_v45 = vunpack.c.l.bf16 %v2453_v36  ;;  %p174_p4 = scmp.lt.s32.totalorder %s1957_s17, 15 }
  0x8d   : > { %1389 = vmatmul.bf16.gmra.mxu2 %v2323_v43  ;;  %1591 = vmatmul.bf16.gmra.mxu3 %v1498_v55  ;;  %v1499_v43 = vpack.c.bf16 %v1487_v30, %v1484_v29  ;;  %v1678_v52 = vrot.slane %v1642_v39, 2  ;;  %v1682_v55 = vrot.slane %v1645_v42, 2 }
  0x8e   : > { %v1685_v57 = vrot.slane %v1647_v45, 2  ;;  %s3119_s17 = smov (!%p174_p4, %s1957_s17), 15 }
  0x8f   : > { %v1680_v62 = vsel %vm579_vm0, %v1678_v52, %v1679_v53  ;;  %v1683_v63 = vsel %vm579_vm0, %v1681_v54, %v1682_v55  ;;  %s1958_s23 = sshll.u32 %s3119_s17, 3 }
  0x90   : > { %v1686_v0 = vsel %vm579_vm0, %v1684_v56, %v1685_v57  ;;  %v1700_v3 = vpack.c.bf16 %v1683_v63, %v1680_v62  ;;  %s3082_s25 = scalar_lea.vmem %s3116_s2, %s1958_s23 }
  0x91   : > { %v1701_v10 = vpack.c.bf16 %v1689_v1, %v1686_v0 }
  0x9b   : > { %1245 = vmatmul.bf16.gmra.mxu1 %v1156_v18  ;;  %1788 = vmatmul.bf16.gmra.mxu0 %v1699_v21  ;;  %v1144_v18 = vrot.slane %v1105_v13, 2 }
  0x9d   : > { %1394 = vmatmul.bf16.gmra.mxu2 %v2327_v25  ;;  %1596 = vmatmul.bf16.gmra.mxu3 %v1499_v43  ;;  %v1146_v23 = vsel %vm579_vm0, %v1144_v18, %v1145_v19 }
  0x9e   : > { %v1158_v25 = vpack.c.bf16 %v1146_v23, %v1143_v22 }
  0xa8   : > { %v302_v4 = vpop.f32.mrf.mxu1  ;;  %v292_v6 = vpop.f32.mrf.mxu0 }
  0xab   : > { %1250 = vmatmul.bf16.gmra.mxu1 %v1157_v2  ;;  %1793 = vmatmul.bf16.gmra.mxu0 %v1700_v3 }
  0xad   : > { %1798 = vmatmul.bf16.vlgmr.msra.gmra.mxu2 %v1701_v10 }
  0xb0   : > { %v304_v15 = vpop.f32.mrf.mxu1  ;;  %v294_v20 = vpop.f32.mrf.mxu0 }
  0xb1   : > { %v698_v21 = vpop.f32.mrf.mxu2  ;;  %v837_v24 = vpop.f32.mrf.mxu3 }
  0xb8   : > { %v307_v26 = vpop.f32.mrf.mxu1  ;;  %v297_v27 = vpop.f32.mrf.mxu0 }
  0xb9   : > { %v700_v28 = vpop.f32.mrf.mxu2  ;;  %v839_v29 = vpop.f32.mrf.mxu3 }
  0xbb   : > { %1255 = vmatmul.bf16.gmra.mxu1 %v1158_v25 }
  0xc0   : > { %v309_v30 = vpop.f32.mrf.mxu1  ;;  %v299_v31 = vpop.f32.mrf.mxu0 }
  0xc1   : > { %v703_v32 = vpop.f32.mrf.mxu2  ;;  %v3048_v33 = vpop.f32.mrf.mxu3 }
  0xc8   : > { %v495_v34 = vpop.f32.mrf.mxu1  ;;  %v1039_v35 = vpop.f32.mrf.mxu0 }
  0xc9   : > { %v515_v36 = vadd.f32 %v495_v34, %v292_v6  ;;  %v705_v37 = vpop.f32.mrf.mxu2  ;;  %v3050_v39 = vpop.f32.mrf.mxu3 }
  0xcb   : > { %v718_v38 = vadd.f32 %v698_v21, %v515_v36 }
  0xd0   : > { %v497_v40 = vpop.f32.mrf.mxu1  ;;  %v1041_v41 = vpop.f32.mrf.mxu0 }
  0xd1   : > { %v516_v42 = vadd.f32 %v497_v40, %v294_v20  ;;  %v708_v43 = vpop.f32.mrf.mxu2  ;;  %v3052_v45 = vpop.f32.mrf.mxu3 }
  0xd3   : > { %v719_v44 = vadd.f32 %v700_v28, %v516_v42 }
  0xd5   : > { %v858_v23 = vadd.f32 %v839_v29, %v719_v44 }
  0xd8   : > { %v500_v46 = vpop.f32.mrf.mxu1  ;;  %v1044_v47 = vpop.f32.mrf.mxu0 }
  0xd9   : > { %v517_v48 = vadd.f32 %v500_v46, %v297_v27  ;;  %v710_v49 = vpop.f32.mrf.mxu2  ;;  %v3054_v51 = vpop.f32.mrf.mxu3 }
  0xdb   : > { %v720_v50 = vadd.f32 %v703_v32, %v517_v48 }
  0xdd   : > { %v859_v34 = vadd.f32 %v3048_v33, %v720_v50 }
  0xe0   : > { %v502_v52 = vpop.f32.mrf.mxu1  ;;  %v3056_v53 = vpop.f32.mrf.mxu0 }
  0xe1   : > { %v518_v54 = vadd.f32 %v502_v52, %v299_v31  ;;  %v713_v55 = vpop.f32.mrf.mxu2  ;;  %v3060_v61 = vpop.f32.mrf.mxu3 }
  0xe3   : > { %v721_v56 = vadd.f32 %v705_v37, %v518_v54  ;;  %v1061_v37 = vadd.f32 %v1044_v47, %v859_v34 }
  0xe5   : > { %v860_v48 = vadd.f32 %v3050_v39, %v721_v56 }
  0xe7   : > { %v1062_v50 = vadd.f32 %v3056_v53, %v860_v48 }
  0xe8   : > { %v505_v57 = vpop.f32.mrf.mxu1  ;;  %v3058_v58 = vpop.f32.mrf.mxu0 }
  0xe9   : > { %v519_v59 = vadd.f32 %v505_v57, %v302_v4  ;;  %v715_v60 = vpop.f32.mrf.mxu2  ;;  %v3068_v5 = vpop.f32.mrf.mxu3 }
  0xeb   : > { %v3062_v62 = vadd.f32 %v708_v43, %v519_v59 }
  0xf0   : > { %v507_v63 = vpop.f32.mrf.mxu1  ;;  %v3064_v0 = vpop.f32.mrf.mxu0 }
  0xf1   : > { %v520_v1 = vadd.f32 %v507_v63, %v304_v15  ;;  %v1380_v2 = vpop.f32.mrf.mxu2  ;;  %v1582_v10 = vpop.f32.mrf.mxu3  ;;  %v857_v15 = vadd.f32 %v837_v24, %v718_v38  ;;  %v1060_v24 = vadd.f32 %v1041_v41, %v858_v23 }
  0xf3   : > { %v3066_v3 = vadd.f32 %v710_v49, %v520_v1  ;;  %v1059_v17 = vadd.f32 %v1039_v35, %v857_v15 }
  0xf8   : > { %v510_v6 = vpop.f32.mrf.mxu1  ;;  %v3070_v7 = vpop.f32.mrf.mxu0 }
  0xf9   : > { %v521_v8 = vadd.f32 %v510_v6, %v307_v26  ;;  %v1382_v4 = vpop.f32.mrf.mxu2  ;;  %v1584_v18 = vpop.f32.mrf.mxu3 }
  0xfb   : > { %v3072_v9 = vadd.f32 %v713_v55, %v521_v8 }
 0x100   : > { %v512_v11 = vpop.f32.mrf.mxu1  ;;  %v3075_v12 = vpop.f32.mrf.mxu0 }
 0x101   : > { %v522_v13 = vadd.f32 %v512_v11, %v309_v30  ;;  %v1385_v14 = vpop.f32.mrf.mxu2  ;;  %v1587_v32 = vpop.f32.mrf.mxu3 }
 0x103   : > { %v3077_v16 = vadd.f32 %v715_v60, %v522_v13 }
 0x108   : > { %v1241_v19 = vpop.f32.mrf.mxu1  ;;  %v1784_v20 = vpop.f32.mrf.mxu0 }
 0x109   : > { %v1261_v21 = vadd.f32 %v1241_v19, %v1059_v17  ;;  %v1387_v22 = vpop.f32.mrf.mxu2  ;;  %v1589_v54 = vpop.f32.mrf.mxu3 }
 0x10b   : > { %v1400_v25 = vadd.f32 %v1380_v2, %v1261_v21  ;;  %v861_v2 = vadd.f32 %v3052_v45, %v3062_v62 }
 0x10d   : > { %v1602_v26 = vadd.f32 %v1582_v10, %v1400_v25 }
 0x10f   : > { %v1804_v27 = vadd.f32 %v1784_v20, %v1602_v26 }
 0x110   : > { %v1243_v28 = vpop.f32.mrf.mxu1  ;;  %v1786_v30 = vpop.f32.mrf.mxu0 }
 0x111   : > { %v1262_v31 = vadd.f32 %v1243_v28, %v1060_v24  ;;  %1812 = vst [vmem:[%s3082_s25] sm:$0xff] %v1804_v27  ;;  %v1390_v29 = vpop.f32.mrf.mxu2  ;;  %v1842_v44 = vmul.f32 %v1804_v27, %v1804_v27  ;;  %v1592_v8 = vpop.f32.mrf.mxu3 }
 0x113   : > { %v1401_v35 = vadd.f32 %v1382_v4, %v1262_v31  ;;  %v1063_v4 = vadd.f32 %v3058_v58, %v861_v2 }
 0x115   : > { %v1603_v36 = vadd.f32 %v1584_v18, %v1401_v35  ;;  %v862_v18 = vadd.f32 %v3054_v51, %v3066_v3 }
 0x117   : > { %v1805_v38 = vadd.f32 %v1786_v30, %v1603_v36  ;;  %v1064_v20 = vadd.f32 %v3064_v0, %v862_v18 }
 0x118   : > { %v1246_v40 = vpop.f32.mrf.mxu1  ;;  %v1789_v42 = vpop.f32.mrf.mxu0 }
 0x119   : > { %v1263_v43 = vadd.f32 %v1246_v40, %v1061_v37  ;;  %1813 = vst [vmem:[%s3082_s25 + $0x8] sm:$0xff] %v1805_v38  ;;  %v1828_v41 = vadd.f32 %v1805_v38, %v1804_v27  ;;  %v1843_v46 = vmul.f32 %v1805_v38, %v1805_v38  ;;  %v1392_v33 = vpop.f32.mrf.mxu2  ;;  %v1594_v58 = vpop.f32.mrf.mxu3  ;;  %v863_v27 = vadd.f32 %v3060_v61, %v3072_v9 }
 0x11a   : > { %v864_v37 = vadd.f32 %v3068_v5, %v3077_v16 }
 0x11b   : > { %v1402_v49 = vadd.f32 %v1385_v14, %v1263_v43  ;;  %v1850_v52 = vadd.f32 %v1843_v46, %v1842_v44  ;;  %v1065_v31 = vadd.f32 %v3070_v7, %v863_v27 }
 0x11d   : > { %v1604_v55 = vadd.f32 %v1587_v32, %v1402_v49 }
 0x11f   : > { %v1806_v57 = vadd.f32 %v1789_v42, %v1604_v55  ;;  %v1066_v42 = vadd.f32 %v3075_v12, %v864_v37 }
 0x120   : > { %v1248_v47 = vpop.f32.mrf.mxu1  ;;  %v1791_v59 = vpop.f32.mrf.mxu0 }
 0x121   : > { %v1264_v60 = vadd.f32 %v1248_v47, %v1062_v50  ;;  %1814 = vst [vmem:[%s3082_s25 + $0x10] sm:$0xff] %v1806_v57  ;;  %v1829_v63 = vadd.f32 %v1828_v41, %v1806_v57  ;;  %v1844_v1 = vmul.f32 %v1806_v57, %v1806_v57  ;;  %v1395_v53 = vpop.f32.mrf.mxu2  ;;  %v1597_v36 = vpop.f32.mrf.mxu3 }
 0x123   : > { %v1403_v6 = vadd.f32 %v1387_v22, %v1264_v60  ;;  %v1851_v39 = vadd.f32 %v1850_v52, %v1844_v1 }
 0x125   : > { %v1605_v56 = vadd.f32 %v1589_v54, %v1403_v6 }
 0x127   : > { %v1807_v10 = vadd.f32 %v1791_v59, %v1605_v56 }
 0x128   : > { %v1251_v11 = vpop.f32.mrf.mxu1  ;;  %v1794_v17 = vpop.f32.mrf.mxu0 }
 0x129   : > { %v1265_v13 = vadd.f32 %v1251_v11, %v1063_v4  ;;  %1815 = vst [vmem:[%s3082_s25 + $0x18] sm:$0xff] %v1807_v10  ;;  %v1830_v14 = vadd.f32 %v1829_v63, %v1807_v10  ;;  %v1845_v15 = vmul.f32 %v1807_v10, %v1807_v10  ;;  %v1397_v24 = vpop.f32.mrf.mxu2  ;;  %v1599_v52 = vpop.f32.mrf.mxu3 }
 0x12b   : > { %v1404_v19 = vadd.f32 %v1390_v29, %v1265_v13  ;;  %v1852_v45 = vadd.f32 %v1851_v39, %v1845_v15 }
 0x12d   : > { %v1606_v62 = vadd.f32 %v1592_v8, %v1404_v19 }
 0x12f   : > { %v1808_v21 = vadd.f32 %v1794_v17, %v1606_v62 }
 0x130   : > { %v1253_v22 = vpop.f32.mrf.mxu1  ;;  %v1796_v51 = vpop.f32.mrf.mxu0 }
 0x131   : > { %v1266_v23 = vadd.f32 %v1253_v22, %v1064_v20  ;;  %1816 = vst [vmem:[%s3082_s25 + $0x20] sm:$0xff] %v1808_v21  ;;  %v1831_v25 = vadd.f32 %v1830_v14, %v1808_v21  ;;  %v1846_v26 = vmul.f32 %v1808_v21, %v1808_v21  ;;  %v1799_v61 = vpop.f32.mrf.mxu2 }
 0x133   : > { %v1405_v28 = vadd.f32 %v1392_v33, %v1266_v23  ;;  %v1853_v30 = vadd.f32 %v1852_v45, %v1846_v26 }
 0x135   : > { %v1607_v3 = vadd.f32 %v1594_v58, %v1405_v28 }
 0x137   : > { %v1809_v32 = vadd.f32 %v1796_v51, %v1607_v3 }
 0x138   : > { %v1256_v0 = vpop.f32.mrf.mxu1 }
 0x139   : > { %v1267_v34 = vadd.f32 %v1256_v0, %v1065_v31  ;;  %1817 = vst [vmem:[%s3082_s25 + $0x28] sm:$0xff] %v1809_v32  ;;  %v1832_v35 = vadd.f32 %v1831_v25, %v1809_v32  ;;  %v1847_v29 = vmul.f32 %v1809_v32, %v1809_v32  ;;  %v1801_v55 = vpop.f32.mrf.mxu2 }
 0x13b   : > { %v1406_v38 = vadd.f32 %v1395_v53, %v1267_v34  ;;  %v1854_v40 = vadd.f32 %v1853_v30, %v1847_v29 }
 0x13d   : > { %v1608_v9 = vadd.f32 %v1597_v36, %v1406_v38 }
 0x13f   : > { %v1810_v43 = vadd.f32 %v1799_v61, %v1608_v9 }
 0x140   : > { %v1258_v7 = vpop.f32.mrf.mxu1 }
 0x141   : > { %v1268_v44 = vadd.f32 %v1258_v7, %v1066_v42  ;;  %1818 = vst [vmem:[%s3082_s25 + $0x30] sm:$0xff] %v1810_v43  ;;  %v1833_v41 = vadd.f32 %v1832_v35, %v1810_v43  ;;  %v1848_v46 = vmul.f32 %v1810_v43, %v1810_v43 }
 0x143   : > { %v1407_v48 = vadd.f32 %v1397_v24, %v1268_v44  ;;  %v1855_v49 = vadd.f32 %v1854_v40, %v1848_v46 }
 0x145   : > { %v1609_v54 = vadd.f32 %v1599_v52, %v1407_v48 }
 0x147   : > { %v1811_v5 = vadd.f32 %v1801_v55, %v1609_v54 }
 0x149   : > { %1819 = vst [vmem:[%s3082_s25 + $0x38] sm:$0xff] %v1811_v5  ;;  %v1834_v16 = vadd.f32 %v1833_v41, %v1811_v5  ;;  %v1849_v33 = vmul.f32 %v1811_v5, %v1811_v5 }
 0x14b   : > { %v1835_v50 = vrot.slane %v1834_v16, 4  ;;  %v1856_v57 = vadd.f32 %v1855_v49, %v1849_v33 }
 0x14d   : > { %v1836_v47 = vadd.f32 %v1835_v50, %v1834_v16  ;;  %v1857_v12 = vrot.slane %v1856_v57, 4 }
 0x14f   : > { %v1837_v59 = vrot.slane %v1836_v47, 2  ;;  %v1858_v60 = vadd.f32 %v1857_v12, %v1856_v57 }
 0x151   : > { %v1838_v63 = vadd.f32 %v1837_v59, %v1836_v47  ;;  %v1859_v1 = vrot.slane %v1858_v60, 2 }
 0x153   : > { %v1839_v2 = vrot.slane %v1838_v63, 1  ;;  %v1860_v6 = vadd.f32 %v1859_v1, %v1858_v60 }
 0x155   : > { %v1840_v39 = vadd.f32 %v1839_v2, %v1838_v63  ;;  %v1861_v56 = vrot.slane %v1860_v6, 1 }
 0x157   : > { %1841 = vst [vmem:[%s182_s30] sm:$0x1] %v1840_v39  ;;  %v1862_v8 = vadd.f32 %v1861_v56, %v1860_v6 }
 0x159   : > { %1863 = vst [vmem:[%s182_s30 + $0x1] sm:$0x1] %v1862_v8 }
 0x15a PF: > { %s14_s12 = sadd.s32 1, %s2622_s12  }
 0x15b   : > { %p11_p5 = scmp.ge.s32.totalorder %s14_s12, 4  }
 0x15d   :  { %13 = sbr.rel (!%p11_p5) target bundleno = 1 (0x1), region = 80 }

</bundles_post_ra>
